<compile_context>
chip_gen: v7x
topology: tpu7x:2x2x1
jax: 0.10.0
libtpu: 0.0.40
codegen_flags: <defaults>
</compile_context>

<pallas_src>
import jax
import jax.numpy as jnp
from jax.experimental import pallas as pl
from jax.experimental.pallas import tpu as pltpu

EPS = 1e-5

# Architecture constants (fixed by the module) and packed-slab lane offsets.
F1, F2, F3 = 256, 512, 1024
O_B11, O_G11, O_BE11 = 0, 256, 512
O_B12, O_G12, O_BE12 = 768, 1024, 1280
O_B2, O_G2, O_BE2 = 1536, 2048, 2560
O_B4 = 3072                       # b4 lives at the tail of the slab (length H*W)


def _bn_relu(h, g, be):
    """Training-mode BatchNorm1d (per-feature batch stats) fused with ReLU."""
    mu = jnp.mean(h, axis=0, keepdims=True)
    var = jnp.maximum(jnp.mean(h * h, axis=0, keepdims=True) - mu * mu, 0.0)
    scale = g * jax.lax.rsqrt(var + EPS)
    shift = be - mu * scale
    return jnp.maximum(h * scale + shift, 0.0)


def _generator_kernel(z_ref, lbl_ref, w11_ref, w12_ref, w2x_ref, w2y_ref,
                      vec_ref, w3_ref, l3_ref, w4_ref, out_ref,
                      h2_sc, acc_sc):
    j = pl.program_id(0)
    bf16 = jnp.bfloat16

    # ---- step 0: layers 1_1, 1_2, 2 -> h2 scratch; zero the fc4 accumulator.
    @pl.when(j == 0)
    def _():
        acc_sc[...] = jnp.zeros_like(acc_sc)

        h = jnp.dot(z_ref[...].astype(bf16), w11_ref[...],
                    preferred_element_type=jnp.float32) + vec_ref[:, O_B11:O_B11 + F1]
        x = _bn_relu(h, vec_ref[:, O_G11:O_G11 + F1], vec_ref[:, O_BE11:O_BE11 + F1])

        h = jnp.dot(lbl_ref[...].astype(bf16), w12_ref[...],
                    preferred_element_type=jnp.float32) + vec_ref[:, O_B12:O_B12 + F1]
        y = _bn_relu(h, vec_ref[:, O_G12:O_G12 + F1], vec_ref[:, O_BE12:O_BE12 + F1])

        # concat([x, y]) @ w2 == x @ w2_top + y @ w2_bot  (no lane-axis concat)
        h = (jnp.dot(x.astype(bf16), w2x_ref[...], preferred_element_type=jnp.float32)
             + jnp.dot(y.astype(bf16), w2y_ref[...], preferred_element_type=jnp.float32)
             + vec_ref[:, O_B2:O_B2 + F2])
        h2_sc[...] = _bn_relu(h, vec_ref[:, O_G2:O_G2 + F2], vec_ref[:, O_BE2:O_BE2 + F2])

    # ---- every step: one feature-chunk of layer 3 + partial fc4 contraction.
    h = jnp.dot(h2_sc[...].astype(bf16), w3_ref[...],
                preferred_element_type=jnp.float32) + l3_ref[0:1, :]
    h3 = _bn_relu(h, l3_ref[1:2, :], l3_ref[2:3, :])
    acc_sc[...] += jnp.dot(h3.astype(bf16), w4_ref[...],
                           preferred_element_type=jnp.float32)

    # ---- last step: add b4, tanh, write output.
    @pl.when(j == pl.num_programs(0) - 1)
    def _():
        hw = out_ref.shape[1]
        out_ref[...] = jnp.tanh(acc_sc[...] + vec_ref[:, O_B4:O_B4 + hw])


def generator_forward(z, label, params, *, tk=256):
    """z: (B, 100) f32, label: (B, 10) f32 -> (B, H*W) f32."""
    B = z.shape[0]
    HW = params["w4"].shape[1]
    NK = params["w3"].shape[1]        # 1024 = h3 feature axis / fc4 contraction
    assert NK % tk == 0
    f32 = jnp.float32

    # Zero-pad the two tiny contractions to a lane-aligned K=128 (exact).
    def pad_k(x, w, k):
        kin = w.shape[0]
        return (jnp.pad(x, ((0, 0), (0, k - kin))),
                jnp.pad(w, ((0, k - kin), (0, 0))))

    z_p, w11_p = pad_k(z, params["w11"], 128)
    lbl_p, w12_p = pad_k(label, params["w12"], 128)

    # Split fc2 weight (removes the lane-axis concat inside the kernel).
    w2x, w2y = params["w2"][:F1], params["w2"][F1:]

    # Pack all small per-layer vectors into one f32 slab (single DMA) and the
    # layer-3 BN params into a (3, 1024) slab streamed per feature chunk.
    vec = jnp.concatenate(
        [params["b11"], params["g11"], params["be11"],
         params["b12"], params["g12"], params["be12"],
         params["b2"], params["g2"], params["be2"],
         params["b4"]], axis=1).astype(f32)
    l3 = jnp.concatenate([params["b3"], params["g3"], params["be3"]],
                         axis=0).astype(f32)

    w3, w4 = params["w3"], params["w4"]

    flops = 2 * B * (128 * F1 + 128 * F1 + 2 * F1 * F2 + F2 * F3 + F3 * HW)
    transcendentals = B * HW + (F1 + F1 + F2 + F3)
    bytes_accessed = (2 * (w11_p.size + w12_p.size + w2x.size + w2y.size
                           + w3.size + w4.size)
                      + 4 * (vec.size + l3.size + z_p.size + lbl_p.size + B * HW))

    grid_spec = pltpu.PrefetchScalarGridSpec(
        num_scalar_prefetch=0,
        grid=(NK // tk,),
        in_specs=[
            pl.BlockSpec((B, 128), lambda j: (0, 0)),          # z (padded)
            pl.BlockSpec((B, 128), lambda j: (0, 0)),          # label (padded)
            pl.BlockSpec((128, F1), lambda j: (0, 0)),         # w11
            pl.BlockSpec((128, F1), lambda j: (0, 0)),         # w12
            pl.BlockSpec((F1, F2), lambda j: (0, 0)),          # w2 top half
            pl.BlockSpec((F1, F2), lambda j: (0, 0)),          # w2 bottom half
            pl.BlockSpec((1, vec.shape[1]), lambda j: (0, 0)),  # packed vectors
            pl.BlockSpec((F2, tk), lambda j: (0, j)),          # w3 chunk
            pl.BlockSpec((3, tk), lambda j: (0, j)),           # b3/g3/be3 chunk
            pl.BlockSpec((tk, HW), lambda j: (j, 0)),          # w4 chunk
        ],
        out_specs=pl.BlockSpec((B, HW), lambda j: (0, 0)),
        scratch_shapes=[pltpu.VMEM((B, F2), f32),              # h2
                        pltpu.VMEM((B, HW), f32)],             # fc4 accumulator
    )

    return pl.pallas_call(
        _generator_kernel,
        out_shape=jax.ShapeDtypeStruct((B, HW), f32),
        grid_spec=grid_spec,
        compiler_params=pltpu.CompilerParams(
            dimension_semantics=("arbitrary",),   # reduction axis (accumulator)
            vmem_limit_bytes=32 << 20),           # fits v5e/v6e (128M) and v7x (64M)
        cost_estimate=pl.CostEstimate(flops=flops,
                                      transcendentals=transcendentals,
                                      bytes_accessed=bytes_accessed),
    )(z_p, lbl_p, w11_p, w12_p, w2x, w2y, vec, w3, l3, w4)


def init_params(key, H, W):
    """Deterministic synthetic weights. Linear weights stored (in, out) bf16."""
    def linear(key, fan_in, fan_out):
        kw, kb = jax.random.split(key)
        bound = 1.0 / jnp.sqrt(fan_in)
        w = jax.random.uniform(kw, (fan_in, fan_out), jnp.float32, -bound, bound)
        b = jax.random.uniform(kb, (1, fan_out), jnp.float32, -bound, bound)
        return w.astype(jnp.bfloat16), b

    keys = jax.random.split(key, 13)
    p = {}
    p["w11"], p["b11"] = linear(keys[0], 100, F1)
    p["w12"], p["b12"] = linear(keys[1], 10, F1)
    p["w2"], p["b2"] = linear(keys[2], 2 * F1, F2)
    p["w3"], p["b3"] = linear(keys[3], F2, F3)
    p["w4"], p["b4"] = linear(keys[4], F3, H * W)
    # BatchNorm affine params (distinct keys for gamma / beta).
    p["g11"] = 1.0 + 0.1 * jax.random.normal(keys[5], (1, F1), jnp.float32)
    p["be11"] = 0.05 * jax.random.normal(keys[6], (1, F1), jnp.float32)
    p["g12"] = 1.0 + 0.1 * jax.random.normal(keys[7], (1, F1), jnp.float32)
    p["be12"] = 0.05 * jax.random.normal(keys[8], (1, F1), jnp.float32)
    p["g2"] = 1.0 + 0.1 * jax.random.normal(keys[9], (1, F2), jnp.float32)
    p["be2"] = 0.05 * jax.random.normal(keys[10], (1, F2), jnp.float32)
    p["g3"] = 1.0 + 0.1 * jax.random.normal(keys[11], (1, F3), jnp.float32)
    p["be3"] = 0.05 * jax.random.normal(keys[12], (1, F3), jnp.float32)
    return p


def reference_forward_bf16(z, label, p):
    """Pure-JAX reference mirroring the kernel math (bf16 matmuls, f32 BN)."""
    bf16 = jnp.bfloat16

    def dot(a, w):
        return jnp.dot(a.astype(bf16), w.astype(bf16),
                       preferred_element_type=jnp.float32)

    x = _bn_relu(dot(z, p["w11"]) + p["b11"], p["g11"], p["be11"])
    y = _bn_relu(dot(label, p["w12"]) + p["b12"], p["g12"], p["be12"])
    xy = jnp.concatenate([x, y], axis=1)
    h2 = _bn_relu(dot(xy, p["w2"]) + p["b2"], p["g2"], p["be2"])
    h3 = _bn_relu(dot(h2, p["w3"]) + p["b3"], p["g3"], p["be3"])
    return jnp.tanh(dot(h3, p["w4"]) + p["b4"])


def reference_forward_f32(z, label, p):
    """Full-f32 PyTorch-semantics reference (training-mode BN)."""
    def lbr(x, w, b, g, be):
        h = x @ w.astype(jnp.float32) + b
        mu = jnp.mean(h, axis=0, keepdims=True)
        var = jnp.mean((h - mu) ** 2, axis=0, keepdims=True)
        return jnp.maximum(((h - mu) / jnp.sqrt(var + EPS)) * g + be, 0.0)

    x = lbr(z, p["w11"], p["b11"], p["g11"], p["be11"])
    y = lbr(label, p["w12"], p["b12"], p["g12"], p["be12"])
    xy = jnp.concatenate([x, y], axis=1)
    h2 = lbr(xy, p["w2"], p["b2"], p["g2"], p["be2"])
    h3 = lbr(h2, p["w3"], p["b3"], p["g3"], p["be3"])
    return jnp.tanh(h3 @ p["w4"].astype(jnp.float32) + p["b4"])


if __name__ == "__main__":
    H, W = 16, 16
    B = 64   # larger batch amortizes the (re-streamed) weight DMA per call

    key = jax.random.PRNGKey(0)
    k_param, k_z, k_lbl = jax.random.split(key, 3)

    params = init_params(k_param, H, W)
    z = jax.random.normal(k_z, (B, 100), jnp.float32)
    cls = jax.random.randint(k_lbl, (B,), 0, 10)
    label = jax.nn.one_hot(cls, 10, dtype=jnp.float32)

    out = generator_forward(z, label, params)
    out = jax.block_until_ready(out)
    assert out.shape == (B, H * W)

    # Tight check against a pure-JAX mirror of the kernel math.
    ref_bf16 = reference_forward_bf16(z, label, params)
    assert jnp.max(jnp.abs(out - ref_bf16)) < 1e-3, "mismatch vs bf16 JAX mirror"

    # Loose check that bf16 weights preserve the module's f32 semantics.
    ref_f32 = reference_forward_f32(z, label, params)
    assert jnp.max(jnp.abs(out - ref_f32)) < 1e-1, "mismatch vs f32 reference"

    print("KERNEL_OK")
</pallas_src>

<mosaic_0001>
module attributes {stable_mosaic.version = 11 : i64} {
  func.func @_generator_kernel(%arg0: i32, %arg1: memref<64x128xf32, #tpu.memory_space<vmem>>, %arg2: memref<64x128xf32, #tpu.memory_space<vmem>>, %arg3: memref<128x256xbf16, #tpu.memory_space<vmem>>, %arg4: memref<128x256xbf16, #tpu.memory_space<vmem>>, %arg5: memref<256x512xbf16, #tpu.memory_space<vmem>>, %arg6: memref<256x512xbf16, #tpu.memory_space<vmem>>, %arg7: memref<1x3328xf32, #tpu.memory_space<vmem>>, %arg8: memref<512x256xbf16, #tpu.memory_space<vmem>>, %arg9: memref<3x256xf32, #tpu.memory_space<vmem>>, %arg10: memref<256x256xbf16, #tpu.memory_space<vmem>>, %arg11: memref<64x256xf32, #tpu.memory_space<vmem>>, %arg12: memref<64x512xf32, #tpu.memory_space<vmem>>, %arg13: memref<64x256xf32, #tpu.memory_space<vmem>>) attributes {dimension_semantics = [#tpu.dimension_semantics<arbitrary>], iteration_bounds = array<i64: 4>, scalar_prefetch = 0 : i64, scratch_operands = 2 : i64, tpu.core_type = #tpu.core_type<tc>, window_params = [{pipeline_mode = #tpu.pipeline_mode<synchronous>, transform_indices = @transform_0, window_bounds = array<i64: 64, 128>}, {pipeline_mode = #tpu.pipeline_mode<synchronous>, transform_indices = @transform_1, window_bounds = array<i64: 64, 128>}, {pipeline_mode = #tpu.pipeline_mode<synchronous>, transform_indices = @transform_2, window_bounds = array<i64: 128, 256>}, {pipeline_mode = #tpu.pipeline_mode<synchronous>, transform_indices = @transform_3, window_bounds = array<i64: 128, 256>}, {pipeline_mode = #tpu.pipeline_mode<synchronous>, transform_indices = @transform_4, window_bounds = array<i64: 256, 512>}, {pipeline_mode = #tpu.pipeline_mode<synchronous>, transform_indices = @transform_5, window_bounds = array<i64: 256, 512>}, {pipeline_mode = #tpu.pipeline_mode<synchronous>, transform_indices = @transform_6, window_bounds = array<i64: 1, 3328>}, {transform_indices = @transform_7, window_bounds = array<i64: 512, 256>}, {transform_indices = @transform_8, window_bounds = array<i64: 3, 256>}, {transform_indices = @transform_9, window_bounds = array<i64: 256, 256>}, {pipeline_mode = #tpu.pipeline_mode<synchronous>, transform_indices = @transform_10, window_bounds = array<i64: 64, 256>}]} {
    %c0_i32 = arith.constant 0 : i32
    %0 = arith.cmpi eq, %arg0, %c0_i32 : i32
    %1 = arith.extui %0 : i1 to i32
    %c0_i32_0 = arith.constant 0 : i32
    %2 = arith.cmpi ne, %1, %c0_i32_0 : i32
    scf.if %2 {
      %cst_23 = arith.constant 0.000000e+00 : f32
      %46 = vector.broadcast %cst_23 : f32 to vector<64x256xf32>
      %c0_24 = arith.constant 0 : index
      %c0_25 = arith.constant 0 : index
      %47 = vector.load %arg13[%c0_24, %c0_25] : memref<64x256xf32, #tpu.memory_space<vmem>>, vector<64x256xf32>
      tpu.vector_store %arg13[%c0_24, %c0_25], %46 {strides = array<i32>} : memref<64x256xf32, #tpu.memory_space<vmem>>, vector<64x256xf32>,
      %c0_26 = arith.constant 0 : index
      %c0_27 = arith.constant 0 : index
      %48 = vector.load %arg1[%c0_26, %c0_27] : memref<64x128xf32, #tpu.memory_space<vmem>>, vector<64x128xf32>
      %49 = arith.truncf %48 : vector<64x128xf32> to vector<64x128xbf16>
      %c0_28 = arith.constant 0 : index
      %c0_29 = arith.constant 0 : index
      %50 = vector.load %arg3[%c0_28, %c0_29] : memref<128x256xbf16, #tpu.memory_space<vmem>>, vector<128x256xbf16>
      %cst_30 = arith.constant dense<0.000000e+00> : vector<64x256xf32>
      %51 = tpu.matmul %49, %50, %cst_30 {dimension_numbers = #tpu.dot_dimension_numbers<[1], [0], [0], [1], [0, 0, 1, 1], [], []>} : vector<64x128xbf16>, vector<128x256xbf16>, vector<64x256xf32> -> vector<64x256xf32>
      %c0_31 = arith.constant 0 : index
      %c0_32 = arith.constant 0 : index
      %52 = vector.load %arg7[%c0_31, %c0_32] : memref<1x3328xf32, #tpu.memory_space<vmem>>, vector<1x256xf32>
      %53 = vector.broadcast %52 : vector<1x256xf32> to vector<64x256xf32>
      %54 = arith.addf %51, %53 : vector<64x256xf32>
      %c0_33 = arith.constant 0 : index
      %c256 = arith.constant 256 : index
      %55 = vector.load %arg7[%c0_33, %c256] : memref<1x3328xf32, #tpu.memory_space<vmem>>, vector<1x256xf32>
      %c0_34 = arith.constant 0 : index
      %c512 = arith.constant 512 : index
      %56 = vector.load %arg7[%c0_34, %c512] : memref<1x3328xf32, #tpu.memory_space<vmem>>, vector<1x256xf32>
      %cst_35 = arith.constant dense<0.000000e+00> : vector<256xf32>
      %57 = vector.multi_reduction <add>, %54, %cst_35 [0] : vector<64x256xf32> to vector<256xf32>
      %58 = vector.shape_cast %57 : vector<256xf32> to vector<1x256xf32>
      %cst_36 = arith.constant 6.400000e+01 : f32
      %59 = vector.broadcast %cst_36 : f32 to vector<1x256xf32>
      %60 = arith.divf %58, %59 : vector<1x256xf32>
      %61 = arith.mulf %54, %54 : vector<64x256xf32>
      %cst_37 = arith.constant dense<0.000000e+00> : vector<256xf32>
      %62 = vector.multi_reduction <add>, %61, %cst_37 [0] : vector<64x256xf32> to vector<256xf32>
      %63 = vector.shape_cast %62 : vector<256xf32> to vector<1x256xf32>
      %cst_38 = arith.constant 6.400000e+01 : f32
      %64 = vector.broadcast %cst_38 : f32 to vector<1x256xf32>
      %65 = arith.divf %63, %64 : vector<1x256xf32>
      %66 = arith.mulf %60, %60 : vector<1x256xf32>
      %67 = arith.subf %65, %66 : vector<1x256xf32>
      %cst_39 = arith.constant 0.000000e+00 : f32
      %68 = vector.broadcast %cst_39 : f32 to vector<1x256xf32>
      %69 = arith.maximumf %67, %68 : vector<1x256xf32>
      %cst_40 = arith.constant 9.99999974E-6 : f32
      %70 = vector.broadcast %cst_40 : f32 to vector<1x256xf32>
      %71 = arith.addf %69, %70 : vector<1x256xf32>
      %72 = math.rsqrt %71 : vector<1x256xf32>
      %73 = arith.mulf %55, %72 : vector<1x256xf32>
      %74 = arith.mulf %60, %73 : vector<1x256xf32>
      %75 = arith.subf %56, %74 : vector<1x256xf32>
      %76 = vector.broadcast %73 : vector<1x256xf32> to vector<64x256xf32>
      %77 = arith.mulf %54, %76 : vector<64x256xf32>
      %78 = vector.broadcast %75 : vector<1x256xf32> to vector<64x256xf32>
      %79 = arith.addf %77, %78 : vector<64x256xf32>
      %cst_41 = arith.constant 0.000000e+00 : f32
      %80 = vector.broadcast %cst_41 : f32 to vector<64x256xf32>
      %81 = arith.maximumf %79, %80 : vector<64x256xf32>
      %c0_42 = arith.constant 0 : index
      %c0_43 = arith.constant 0 : index
      %82 = vector.load %arg2[%c0_42, %c0_43] : memref<64x128xf32, #tpu.memory_space<vmem>>, vector<64x128xf32>
      %83 = arith.truncf %82 : vector<64x128xf32> to vector<64x128xbf16>
      %c0_44 = arith.constant 0 : index
      %c0_45 = arith.constant 0 : index
      %84 = vector.load %arg4[%c0_44, %c0_45] : memref<128x256xbf16, #tpu.memory_space<vmem>>, vector<128x256xbf16>
      %cst_46 = arith.constant dense<0.000000e+00> : vector<64x256xf32>
      %85 = tpu.matmul %83, %84, %cst_46 {dimension_numbers = #tpu.dot_dimension_numbers<[1], [0], [0], [1], [0, 0, 1, 1], [], []>} : vector<64x128xbf16>, vector<128x256xbf16>, vector<64x256xf32> -> vector<64x256xf32>
      %c0_47 = arith.constant 0 : index
      %c768 = arith.constant 768 : index
      %86 = vector.load %arg7[%c0_47, %c768] : memref<1x3328xf32, #tpu.memory_space<vmem>>, vector<1x256xf32>
      %87 = vector.broadcast %86 : vector<1x256xf32> to vector<64x256xf32>
      %88 = arith.addf %85, %87 : vector<64x256xf32>
      %c0_48 = arith.constant 0 : index
      %c1024 = arith.constant 1024 : index
      %89 = vector.load %arg7[%c0_48, %c1024] : memref<1x3328xf32, #tpu.memory_space<vmem>>, vector<1x256xf32>
      %c0_49 = arith.constant 0 : index
      %c1280 = arith.constant 1280 : index
      %90 = vector.load %arg7[%c0_49, %c1280] : memref<1x3328xf32, #tpu.memory_space<vmem>>, vector<1x256xf32>
      %cst_50 = arith.constant dense<0.000000e+00> : vector<256xf32>
      %91 = vector.multi_reduction <add>, %88, %cst_50 [0] : vector<64x256xf32> to vector<256xf32>
      %92 = vector.shape_cast %91 : vector<256xf32> to vector<1x256xf32>
      %cst_51 = arith.constant 6.400000e+01 : f32
      %93 = vector.broadcast %cst_51 : f32 to vector<1x256xf32>
      %94 = arith.divf %92, %93 : vector<1x256xf32>
      %95 = arith.mulf %88, %88 : vector<64x256xf32>
      %cst_52 = arith.constant dense<0.000000e+00> : vector<256xf32>
      %96 = vector.multi_reduction <add>, %95, %cst_52 [0] : vector<64x256xf32> to vector<256xf32>
      %97 = vector.shape_cast %96 : vector<256xf32> to vector<1x256xf32>
      %cst_53 = arith.constant 6.400000e+01 : f32
      %98 = vector.broadcast %cst_53 : f32 to vector<1x256xf32>
      %99 = arith.divf %97, %98 : vector<1x256xf32>
      %100 = arith.mulf %94, %94 : vector<1x256xf32>
      %101 = arith.subf %99, %100 : vector<1x256xf32>
      %cst_54 = arith.constant 0.000000e+00 : f32
      %102 = vector.broadcast %cst_54 : f32 to vector<1x256xf32>
      %103 = arith.maximumf %101, %102 : vector<1x256xf32>
      %cst_55 = arith.constant 9.99999974E-6 : f32
      %104 = vector.broadcast %cst_55 : f32 to vector<1x256xf32>
      %105 = arith.addf %103, %104 : vector<1x256xf32>
      %106 = math.rsqrt %105 : vector<1x256xf32>
      %107 = arith.mulf %89, %106 : vector<1x256xf32>
      %108 = arith.mulf %94, %107 : vector<1x256xf32>
      %109 = arith.subf %90, %108 : vector<1x256xf32>
      %110 = vector.broadcast %107 : vector<1x256xf32> to vector<64x256xf32>
      %111 = arith.mulf %88, %110 : vector<64x256xf32>
      %112 = vector.broadcast %109 : vector<1x256xf32> to vector<64x256xf32>
      %113 = arith.addf %111, %112 : vector<64x256xf32>
      %cst_56 = arith.constant 0.000000e+00 : f32
      %114 = vector.broadcast %cst_56 : f32 to vector<64x256xf32>
      %115 = arith.maximumf %113, %114 : vector<64x256xf32>
      %116 = arith.truncf %81 : vector<64x256xf32> to vector<64x256xbf16>
      %c0_57 = arith.constant 0 : index
      %c0_58 = arith.constant 0 : index
      %117 = vector.load %arg5[%c0_57, %c0_58] : memref<256x512xbf16, #tpu.memory_space<vmem>>, vector<256x512xbf16>
      %cst_59 = arith.constant dense<0.000000e+00> : vector<64x512xf32>
      %118 = tpu.matmul %116, %117, %cst_59 {dimension_numbers = #tpu.dot_dimension_numbers<[1], [0], [0], [1], [0, 0, 1, 1], [], []>} : vector<64x256xbf16>, vector<256x512xbf16>, vector<64x512xf32> -> vector<64x512xf32>
      %119 = arith.truncf %115 : vector<64x256xf32> to vector<64x256xbf16>
      %c0_60 = arith.constant 0 : index
      %c0_61 = arith.constant 0 : index
      %120 = vector.load %arg6[%c0_60, %c0_61] : memref<256x512xbf16, #tpu.memory_space<vmem>>, vector<256x512xbf16>
      %cst_62 = arith.constant dense<0.000000e+00> : vector<64x512xf32>
      %121 = tpu.matmul %119, %120, %cst_62 {dimension_numbers = #tpu.dot_dimension_numbers<[1], [0], [0], [1], [0, 0, 1, 1], [], []>} : vector<64x256xbf16>, vector<256x512xbf16>, vector<64x512xf32> -> vector<64x512xf32>
      %122 = arith.addf %118, %121 : vector<64x512xf32>
      %c0_63 = arith.constant 0 : index
      %c1536 = arith.constant 1536 : index
      %123 = vector.load %arg7[%c0_63, %c1536] : memref<1x3328xf32, #tpu.memory_space<vmem>>, vector<1x512xf32>
      %124 = vector.broadcast %123 : vector<1x512xf32> to vector<64x512xf32>
      %125 = arith.addf %122, %124 : vector<64x512xf32>
      %c0_64 = arith.constant 0 : index
      %c2048 = arith.constant 2048 : index
      %126 = vector.load %arg7[%c0_64, %c2048] : memref<1x3328xf32, #tpu.memory_space<vmem>>, vector<1x512xf32>
      %c0_65 = arith.constant 0 : index
      %c2560 = arith.constant 2560 : index
      %127 = vector.load %arg7[%c0_65, %c2560] : memref<1x3328xf32, #tpu.memory_space<vmem>>, vector<1x512xf32>
      %cst_66 = arith.constant dense<0.000000e+00> : vector<512xf32>
      %128 = vector.multi_reduction <add>, %125, %cst_66 [0] : vector<64x512xf32> to vector<512xf32>
      %129 = vector.shape_cast %128 : vector<512xf32> to vector<1x512xf32>
      %cst_67 = arith.constant 6.400000e+01 : f32
      %130 = vector.broadcast %cst_67 : f32 to vector<1x512xf32>
      %131 = arith.divf %129, %130 : vector<1x512xf32>
      %132 = arith.mulf %125, %125 : vector<64x512xf32>
      %cst_68 = arith.constant dense<0.000000e+00> : vector<512xf32>
      %133 = vector.multi_reduction <add>, %132, %cst_68 [0] : vector<64x512xf32> to vector<512xf32>
      %134 = vector.shape_cast %133 : vector<512xf32> to vector<1x512xf32>
      %cst_69 = arith.constant 6.400000e+01 : f32
      %135 = vector.broadcast %cst_69 : f32 to vector<1x512xf32>
      %136 = arith.divf %134, %135 : vector<1x512xf32>
      %137 = arith.mulf %131, %131 : vector<1x512xf32>
      %138 = arith.subf %136, %137 : vector<1x512xf32>
      %cst_70 = arith.constant 0.000000e+00 : f32
      %139 = vector.broadcast %cst_70 : f32 to vector<1x512xf32>
      %140 = arith.maximumf %138, %139 : vector<1x512xf32>
      %cst_71 = arith.constant 9.99999974E-6 : f32
      %141 = vector.broadcast %cst_71 : f32 to vector<1x512xf32>
      %142 = arith.addf %140, %141 : vector<1x512xf32>
      %143 = math.rsqrt %142 : vector<1x512xf32>
      %144 = arith.mulf %126, %143 : vector<1x512xf32>
      %145 = arith.mulf %131, %144 : vector<1x512xf32>
      %146 = arith.subf %127, %145 : vector<1x512xf32>
      %147 = vector.broadcast %144 : vector<1x512xf32> to vector<64x512xf32>
      %148 = arith.mulf %125, %147 : vector<64x512xf32>
      %149 = vector.broadcast %146 : vector<1x512xf32> to vector<64x512xf32>
      %150 = arith.addf %148, %149 : vector<64x512xf32>
      %cst_72 = arith.constant 0.000000e+00 : f32
      %151 = vector.broadcast %cst_72 : f32 to vector<64x512xf32>
      %152 = arith.maximumf %150, %151 : vector<64x512xf32>
      %c0_73 = arith.constant 0 : index
      %c0_74 = arith.constant 0 : index
      %153 = vector.load %arg12[%c0_73, %c0_74] : memref<64x512xf32, #tpu.memory_space<vmem>>, vector<64x512xf32>
      tpu.vector_store %arg12[%c0_73, %c0_74], %152 {strides = array<i32>} : memref<64x512xf32, #tpu.memory_space<vmem>>, vector<64x512xf32>,
    } else {
    }
    %c0 = arith.constant 0 : index
    %c0_1 = arith.constant 0 : index
    %3 = vector.load %arg12[%c0, %c0_1] : memref<64x512xf32, #tpu.memory_space<vmem>>, vector<64x512xf32>
    %4 = arith.truncf %3 : vector<64x512xf32> to vector<64x512xbf16>
    %c0_2 = arith.constant 0 : index
    %c0_3 = arith.constant 0 : index
    %5 = vector.load %arg8[%c0_2, %c0_3] : memref<512x256xbf16, #tpu.memory_space<vmem>>, vector<512x256xbf16>
    %cst = arith.constant dense<0.000000e+00> : vector<64x256xf32>
    %6 = tpu.matmul %4, %5, %cst {dimension_numbers = #tpu.dot_dimension_numbers<[1], [0], [0], [1], [0, 0, 1, 1], [], []>} : vector<64x512xbf16>, vector<512x256xbf16>, vector<64x256xf32> -> vector<64x256xf32>
    %c0_4 = arith.constant 0 : index
    %c0_5 = arith.constant 0 : index
    %7 = vector.load %arg9[%c0_4, %c0_5] : memref<3x256xf32, #tpu.memory_space<vmem>>, vector<1x256xf32>
    %8 = vector.broadcast %7 : vector<1x256xf32> to vector<64x256xf32>
    %9 = arith.addf %6, %8 : vector<64x256xf32>
    %c1 = arith.constant 1 : index
    %c0_6 = arith.constant 0 : index
    %10 = vector.load %arg9[%c1, %c0_6] : memref<3x256xf32, #tpu.memory_space<vmem>>, vector<1x256xf32>
    %c2 = arith.constant 2 : index
    %c0_7 = arith.constant 0 : index
    %11 = vector.load %arg9[%c2, %c0_7] : memref<3x256xf32, #tpu.memory_space<vmem>>, vector<1x256xf32>
    %cst_8 = arith.constant dense<0.000000e+00> : vector<256xf32>
    %12 = vector.multi_reduction <add>, %9, %cst_8 [0] : vector<64x256xf32> to vector<256xf32>
    %13 = vector.shape_cast %12 : vector<256xf32> to vector<1x256xf32>
    %cst_9 = arith.constant 6.400000e+01 : f32
    %14 = vector.broadcast %cst_9 : f32 to vector<1x256xf32>
    %15 = arith.divf %13, %14 : vector<1x256xf32>
    %16 = arith.mulf %9, %9 : vector<64x256xf32>
    %cst_10 = arith.constant dense<0.000000e+00> : vector<256xf32>
    %17 = vector.multi_reduction <add>, %16, %cst_10 [0] : vector<64x256xf32> to vector<256xf32>
    %18 = vector.shape_cast %17 : vector<256xf32> to vector<1x256xf32>
    %cst_11 = arith.constant 6.400000e+01 : f32
    %19 = vector.broadcast %cst_11 : f32 to vector<1x256xf32>
    %20 = arith.divf %18, %19 : vector<1x256xf32>
    %21 = arith.mulf %15, %15 : vector<1x256xf32>
    %22 = arith.subf %20, %21 : vector<1x256xf32>
    %cst_12 = arith.constant 0.000000e+00 : f32
    %23 = vector.broadcast %cst_12 : f32 to vector<1x256xf32>
    %24 = arith.maximumf %22, %23 : vector<1x256xf32>
    %cst_13 = arith.constant 9.99999974E-6 : f32
    %25 = vector.broadcast %cst_13 : f32 to vector<1x256xf32>
    %26 = arith.addf %24, %25 : vector<1x256xf32>
    %27 = math.rsqrt %26 : vector<1x256xf32>
    %28 = arith.mulf %10, %27 : vector<1x256xf32>
    %29 = arith.mulf %15, %28 : vector<1x256xf32>
    %30 = arith.subf %11, %29 : vector<1x256xf32>
    %31 = vector.broadcast %28 : vector<1x256xf32> to vector<64x256xf32>
    %32 = arith.mulf %9, %31 : vector<64x256xf32>
    %33 = vector.broadcast %30 : vector<1x256xf32> to vector<64x256xf32>
    %34 = arith.addf %32, %33 : vector<64x256xf32>
    %cst_14 = arith.constant 0.000000e+00 : f32
    %35 = vector.broadcast %cst_14 : f32 to vector<64x256xf32>
    %36 = arith.maximumf %34, %35 : vector<64x256xf32>
    %c0_15 = arith.constant 0 : index
    %c0_16 = arith.constant 0 : index
    %37 = vector.load %arg13[%c0_15, %c0_16] : memref<64x256xf32, #tpu.memory_space<vmem>>, vector<64x256xf32>
    %38 = arith.truncf %36 : vector<64x256xf32> to vector<64x256xbf16>
    %c0_17 = arith.constant 0 : index
    %c0_18 = arith.constant 0 : index
    %39 = vector.load %arg10[%c0_17, %c0_18] : memref<256x256xbf16, #tpu.memory_space<vmem>>, vector<256x256xbf16>
    %cst_19 = arith.constant dense<0.000000e+00> : vector<64x256xf32>
    %40 = tpu.matmul %38, %39, %cst_19 {dimension_numbers = #tpu.dot_dimension_numbers<[1], [0], [0], [1], [0, 0, 1, 1], [], []>} : vector<64x256xbf16>, vector<256x256xbf16>, vector<64x256xf32> -> vector<64x256xf32>
    %41 = arith.addf %37, %40 : vector<64x256xf32>
    %c0_20 = arith.constant 0 : index
    %c0_21 = arith.constant 0 : index
    %42 = vector.load %arg13[%c0_20, %c0_21] : memref<64x256xf32, #tpu.memory_space<vmem>>, vector<64x256xf32>
    tpu.vector_store %arg13[%c0_20, %c0_21], %41 {strides = array<i32>} : memref<64x256xf32, #tpu.memory_space<vmem>>, vector<64x256xf32>,
    %c3_i32 = arith.constant 3 : i32
    %43 = arith.cmpi eq, %arg0, %c3_i32 : i32
    %44 = arith.extui %43 : i1 to i32
    %c0_i32_22 = arith.constant 0 : i32
    %45 = arith.cmpi ne, %44, %c0_i32_22 : i32
    scf.if %45 {
      %c0_23 = arith.constant 0 : index
      %c0_24 = arith.constant 0 : index
      %46 = vector.load %arg13[%c0_23, %c0_24] : memref<64x256xf32, #tpu.memory_space<vmem>>, vector<64x256xf32>
      %c0_25 = arith.constant 0 : index
      %c3072 = arith.constant 3072 : index
      %47 = vector.load %arg7[%c0_25, %c3072] : memref<1x3328xf32, #tpu.memory_space<vmem>>, vector<1x256xf32>
      %48 = vector.broadcast %47 : vector<1x256xf32> to vector<64x256xf32>
      %49 = arith.addf %46, %48 : vector<64x256xf32>
      %50 = math.tanh %49 : vector<64x256xf32>
      %c0_26 = arith.constant 0 : index
      %c0_27 = arith.constant 0 : index
      %51 = vector.load %arg11[%c0_26, %c0_27] : memref<64x256xf32, #tpu.memory_space<vmem>>, vector<64x256xf32>
      tpu.vector_store %arg11[%c0_26, %c0_27], %50 {strides = array<i32>} : memref<64x256xf32, #tpu.memory_space<vmem>>, vector<64x256xf32>,
    } else {
    }
    return
  }
  func.func @transform_0(%arg0: i32) -> (i32, i32) {
    %c0_i32 = arith.constant 0 : i32
    %c0_i32_0 = arith.constant 0 : i32
    %c0_i32_1 = arith.constant 0 : i32
    return %c0_i32, %c0_i32_0 : i32, i32
  }
  func.func @transform_1(%arg0: i32) -> (i32, i32) {
    %c0_i32 = arith.constant 0 : i32
    %c0_i32_0 = arith.constant 0 : i32
    %c0_i32_1 = arith.constant 0 : i32
    return %c0_i32, %c0_i32_0 : i32, i32
  }
  func.func @transform_2(%arg0: i32) -> (i32, i32) {
    %c0_i32 = arith.constant 0 : i32
    %c0_i32_0 = arith.constant 0 : i32
    %c0_i32_1 = arith.constant 0 : i32
    return %c0_i32, %c0_i32_0 : i32, i32
  }
  func.func @transform_3(%arg0: i32) -> (i32, i32) {
    %c0_i32 = arith.constant 0 : i32
    %c0_i32_0 = arith.constant 0 : i32
    %c0_i32_1 = arith.constant 0 : i32
    return %c0_i32, %c0_i32_0 : i32, i32
  }
  func.func @transform_4(%arg0: i32) -> (i32, i32) {
    %c0_i32 = arith.constant 0 : i32
    %c0_i32_0 = arith.constant 0 : i32
    %c0_i32_1 = arith.constant 0 : i32
    return %c0_i32, %c0_i32_0 : i32, i32
  }
  func.func @transform_5(%arg0: i32) -> (i32, i32) {
    %c0_i32 = arith.constant 0 : i32
    %c0_i32_0 = arith.constant 0 : i32
    %c0_i32_1 = arith.constant 0 : i32
    return %c0_i32, %c0_i32_0 : i32, i32
  }
  func.func @transform_6(%arg0: i32) -> (i32, i32) {
    %c0_i32 = arith.constant 0 : i32
    %c0_i32_0 = arith.constant 0 : i32
    %c0_i32_1 = arith.constant 0 : i32
    return %c0_i32, %c0_i32_0 : i32, i32
  }
  func.func @transform_7(%arg0: i32) -> (i32, i32) {
    %c0_i32 = arith.constant 0 : i32
    %c0_i32_0 = arith.constant 0 : i32
    return %c0_i32, %arg0 : i32, i32
  }
  func.func @transform_8(%arg0: i32) -> (i32, i32) {
    %c0_i32 = arith.constant 0 : i32
    %c0_i32_0 = arith.constant 0 : i32
    return %c0_i32, %arg0 : i32, i32
  }
  func.func @transform_9(%arg0: i32) -> (i32, i32) {
    %c0_i32 = arith.constant 0 : i32
    %c0_i32_0 = arith.constant 0 : i32
    return %arg0, %c0_i32 : i32, i32
  }
  func.func @transform_10(%arg0: i32) -> (i32, i32) {
    %c0_i32 = arith.constant 0 : i32
    %c0_i32_0 = arith.constant 0 : i32
    %c0_i32_1 = arith.constant 0 : i32
    return %c0_i32, %c0_i32_0 : i32, i32
  }
}

</mosaic_0001>

<bundles_post_ra>
// kernel: tpu_custom_call.1
= control target key start
LH: loop header
LB: loop body
LE: loop exit
PB: predicated region body
PF: predicated region fallthrough
CT: control target
= control target key end

     0   :  { %s6935_s0 = inlined_call_operand.hbm [shape: f32[64,128], index: 0, kind: input, shape index: {}]   ;;  %s6936_s1 = inlined_call_operand.hbm [shape: f32[64,128], index: 1, kind: input, shape index: {}]   ;;  %s6937_s2 = inlined_call_operand.hbm [shape: bf16[128,256], index: 2, kind: input, shape index: {}]   ;;  %s6938_s3 = inlined_call_operand.hbm [shape: bf16[128,256], index: 3, kind: input, shape index: {}]   ;;  %s6939_s4 = inlined_call_operand.hbm [shape: bf16[256,512], index: 4, kind: input, shape index: {}]   ;;  %s6940_s5 = inlined_call_operand.hbm [shape: bf16[256,512], index: 5, kind: input, shape index: {}]   ;;  %s6941_s6 = inlined_call_operand.hbm [shape: f32[1,3328], index: 6, kind: input, shape index: {}]   ;;  %s6942_s7 = inlined_call_operand.hbm [shape: bf16[512,1024], index: 7, kind: input, shape index: {}]   ;;  %s6943_s8 = inlined_call_operand.hbm [shape: f32[3,1024], index: 8, kind: input, shape index: {}]   ;;  %s6944_s9 = inlined_call_operand.hbm [shape: bf16[1024,256], index: 9, kind: input, shape index: {}]   ;;  %s6945_s10 = inlined_call_operand.hbm [shape: f32[64,256], index: 10, kind: output, shape index: {}]  }
   0x1   :  { %6981 = sst [smem:[#allocation40_spill]] %s6936_s1 }
   0x2   :  { %6982 = sst [smem:[#allocation41_spill]] %s6938_s3 }
   0x3   :  { %6983 = sst [smem:[#allocation42_spill]] %s6940_s5 }
   0x4   :  { %6984 = sst [smem:[#allocation43_spill]] %s6942_s7 }
   0x5   :  { %6985 = sst [smem:[#allocation44_spill]] %s6945_s10 }
   0x6   :  { %15 = vsyncpa [#allocation5], 0 }
   0x7   :  { %16 = vsyncpa [#allocation8], 0 }
   0x8   :  { %17 = vsyncpa [#allocation11], 0 }
   0x9   :  { %18 = vsyncpa [#allocation14], 0 }
   0xa   :  { %19 = vsyncpa [#allocation17], 0 }
   0xb   :  { %21 = vsyncpa [#allocation17 + $0x1], 0 }
   0xc   :  { %22 = vsyncpa [#allocation20], 0 }
   0xd   :  { %24 = vsyncpa [#allocation20 + $0x1], 0 }
   0xe   :  { %25 = vsyncpa [#allocation6], 0  ;;  %s5616_s13 = smov 0   ;;  %s5618_s14 = smov 0  }
   0xf   :  { %s5620_s15 = smov 0   ;;  %s5622_s16 = smov 0  }
  0x10 LB: > { %6986 = sst [smem:[#allocation29_spill]] %s5533_s15  ;;  %s5637_s17 = sadd.s32 4294967295, %s5537_s16   ;;  %s5537_s16 = sphi %s5622_s16, %s7045_s16   ;;  %s5533_s15 = sphi %s5620_s15, %s7047_s15   ;;  %s5529_s14 = sphi %s5618_s14, %s7049_s14   ;;  %s5525_s13 = sphi %s5616_s13, %s7048_s13  }
  0x11   : > { %p4231_p0 = scmp.ge.s32.totalorder %s5537_s16, 1  ;;  %p6948_p1 = scmp.eq.s32.totalorder %s5637_s17, 0 }
  0x12   : > { %p282_p2 = scmp.lt.s32.totalorder %s5537_s16, 5  ;;  %s5539_s19 = smov [#allocation7]  }
  0x13   : > { %s307_s20 = sshll.u32 %s5539_s19, 4  ;;  %s5540_s21 = smov [#allocation10]   ;;  %s5647_s20 = int_to_ptr.vmem [resolvable:$true] %s307_s20 }
  0x14   : > { %p5643_p4 = pnand %p4231_p0, %p282_p2  ;;  %s333_s22 = sshll.u32 %s5540_s21, 4  ;;  %s5657_s22 = int_to_ptr.vmem [resolvable:$true] %s333_s22 }
  0x15   : > { %s5541_s24 = smov [#allocation13]   ;;  %s6990_s1 = sld [smem:[#allocation40_spill]] }
  0x16   : > { %s6987_s18 = scalar_select %p5643_p4, 1, 0 }
  0x17   : > { %p4631_p5 = pneg %p5643_p4  ;;  %s5659_s25 = sshll.u32 %s5541_s24, 4  ;;  %s360_s25 = int_to_ptr.vmem [resolvable:$true] %s5659_s25 }
  0x18   : > { %6988 = sst [smem:[#allocation30_spill]] %s6987_s18 }
  0x19   : > { %p5653_p6 = pnand %p4631_p5, %p6948_p1 }
  0x1b   : > { %s6989_s23 = scalar_select %p5653_p6, 1, 0 }
  0x1c   : > { %s5167_s28 = scalar_lea.hbm %s6990_s1, 1024  ;;  %p5669_p8 = pneg %p5653_p6 }
  0x1d   : > { %p5168_p7 = scmp.ne.s32.totalorder %s6990_s1, %s5167_s28  ;;  %p5174_p11 = scmp.lt.u32.totalorder %s5167_s28, %s6990_s1 }
  0x1e   : > { %s6991_s11 = scalar_select %p5669_p8, 1, 0 }
  0x1f   : > { %p5170_p9 = pnand %p5669_p8, %p5168_p7 }
  0x21   : > { %p5171_p10 = pneg %p5170_p9 }
  0x23   : > { %p5176_p12 = pnand %p5174_p11, %p5171_p10 }
  0x25   : > { %5179 = shalt.err (!%p5176_p12)
}
  0x26   : > { %s5180_s21 = scalar_lea.vmem %s5647_s20, 1024  ;;  %p5188_p5 = scmp.lt.s32.totalorder %s5647_s20, %s5647_s20 }
  0x27   : > { %p5181_p13 = scmp.ne.s32.totalorder %s5647_s20, %s5180_s21  ;;  %p5189_p3 = scmp.lt.s32.totalorder %s5180_s21, %s5180_s21 }
  0x29   : > { %p5183_p0 = pnand %p5181_p13, %p5669_p8  ;;  %p5190_p7 = por %p5189_p3, %p5188_p5 }
  0x2b   : > { %p5184_p2 = pneg %p5183_p0 }
  0x2d   : > { %p5191_p9 = pnand %p5190_p7, %p5184_p2 }
  0x2f   : > { %5194 = shalt.err (!%p5191_p9)
}
  0x30   : > { %s6952_s24 = smov 128   ;;  %s6954_s26 = smov 8  }
  0x31   : > { %4637 = dma.hbm_to_vmem [thread:$0]  (!%p5653_p6), %s6990_s1, 1024, %s5647_s20, [#allocation8], %s6952_s24, %s6952_s24, %s6954_s26  }
  0x32   : > { %s6992_s3 = sld [smem:[#allocation41_spill]] }
  0x38   : > { %s5195_s12 = scalar_lea.hbm %s6992_s3, 2048 }
  0x39   : > { %p5196_p3 = scmp.ne.s32.totalorder %s6992_s3, %s5195_s12  ;;  %p5202_p12 = scmp.lt.u32.totalorder %s5195_s12, %s6992_s3 }
  0x3b   : > { %p5198_p10 = pnand %p5196_p3, %p5669_p8 }
  0x3d   : > { %p5199_p11 = pneg %p5198_p10 }
  0x3f   : > { %p5204_p13 = pnand %p5202_p12, %p5199_p11 }
  0x41   : > { %5207 = shalt.err (!%p5204_p13)
}
  0x42   : > { %s5208_s20 = scalar_lea.vmem %s5657_s22, 2048  ;;  %p5216_p7 = scmp.lt.s32.totalorder %s5657_s22, %s5657_s22 }
  0x43   : > { %p5209_p0 = scmp.ne.s32.totalorder %s5657_s22, %s5208_s20  ;;  %p5217_p9 = scmp.lt.s32.totalorder %s5208_s20, %s5208_s20 }
  0x45   : > { %p5211_p2 = pnand %p5209_p0, %p5669_p8  ;;  %p5218_p3 = por %p5217_p9, %p5216_p7 }
  0x47   : > { %p5212_p5 = pneg %p5211_p2 }
  0x49   : > { %p5219_p10 = pnand %p5218_p3, %p5212_p5 }
  0x4b   : > { %5222 = shalt.err (!%p5219_p10)
}
  0x4c   : > { %4643 = dma.hbm_to_vmem [thread:$0]  (!%p5653_p6), %s6992_s3, 2048, %s5657_s22, [#allocation11], %s6952_s24, %s6952_s24, %s6954_s26  }
  0x4d   : > { %s6993_s5 = sld [smem:[#allocation42_spill]] }
  0x53   : > { %s5223_s29 = scalar_lea.hbm %s6993_s5, 8192 }
  0x54   : > { %p5224_p11 = scmp.ne.s32.totalorder %s6993_s5, %s5223_s29  ;;  %p5230_p0 = scmp.lt.u32.totalorder %s5223_s29, %s6993_s5 }
  0x56   : > { %p5226_p12 = pnand %p5224_p11, %p5669_p8 }
  0x58   : > { %p5227_p13 = pneg %p5226_p12 }
  0x5a   : > { %p5232_p2 = pnand %p5230_p0, %p5227_p13 }
  0x5c   : > { %5235 = shalt.err (!%p5232_p2)
}
  0x5d   : > { %s5236_s20 = scalar_lea.vmem %s360_s25, 8192  ;;  %p5244_p3 = scmp.lt.s32.totalorder %s360_s25, %s360_s25 }
  0x5e   : > { %p5237_p5 = scmp.ne.s32.totalorder %s360_s25, %s5236_s20  ;;  %p5245_p10 = scmp.lt.s32.totalorder %s5236_s20, %s5236_s20 }
  0x60   : > { %p5239_p7 = pnand %p5237_p5, %p5669_p8  ;;  %p5246_p1 = por %p5245_p10, %p5244_p3 }
  0x62   : > { %p5240_p9 = pneg %p5239_p7 }
  0x64   : > { %p5247_p4 = pnand %p5246_p1, %p5240_p9 }
  0x66   : > { %5250 = shalt.err (!%p5247_p4)
}
  0x67   : > { %s6950_s22 = smov 256   ;;  %s6951_s10 = smov 16  }
  0x68   : > { %4649 = dma.hbm_to_vmem [thread:$0]  (!%p5653_p6), %s6993_s5, 8192, %s360_s25, [#allocation14], %s6950_s22, %s6950_s22, %s6951_s10  }
  0x69   : > { %s5742_s28 = sadd.s32 1, %s5537_s16   ;;  %s185_s30 = sadd.s32 1, %s5533_s15 }
  0x6a   : > { %6994 = sst [smem:[#allocation31_spill]] %s5742_s28  ;;  %s182_s29 = ssub.s32 %s5537_s16, %s5742_s28 }
  0x6b   : > { %p183_p1 = scmp.eq.s32.totalorder %s182_s29, 0  ;;  %p192_p4 = scmp.ne.s32.totalorder %s5533_s15, %s5529_s14 }
  0x6c   : > { %p193_p11 = scmp.eq.s32.totalorder %s5537_s16, 0  ;;  %p198_p12 = scmp.ne.s32.totalorder %s5529_s14, %s5525_s13 }
  0x6d   : > { %s5753_s12 = scalar_select %p183_p1, %s5533_s15, %s185_s30  }
  0x6e   : > { %p194_p13 = por %p193_p11, %p192_p4  ;;  %p6996_p0 = scmp.eq.s32.totalorder %s5637_s17, 0 }
  0x6f   : > { %6995 = sst [smem:[#allocation32_spill]] %s5753_s12  ;;  %p4670_p5 = scmp.lt.s32.totalorder %s5537_s16, 4 }
  0x70   : > { %p5757_p2 = por %p6996_p0, %p198_p12  ;;  %s384_s25 = sand.u32 1, %s5537_s16  }
  0x71   : > { %s5764_s21 = sand.u32 1, %s5533_s15   ;;  %s6956_s18 = sshll.u32 %s5537_s16, 7 }
  0x72   : > { %s6997_s19 = scalar_select %p5757_p2, 1, 0 }
  0x73   : > { %s4240_s20 = sshll.u32 %s5764_s21, 9  ;;  %s6999_s7 = sld [smem:[#allocation43_spill]] }
  0x74   : > { %6998 = sst [smem:[#allocation33_spill]] %s6997_s19  ;;  %s388_s30 = scalar_lea.vmem [#allocation16], %s4240_s20 }
  0x75   : > { %s395_s22 = sshll.u32 %s388_s30, 4  ;;  %p5775_p7 = pnand %p4670_p5, %p194_p13  ;;  %s5779_s22 = int_to_ptr.vmem [resolvable:$true] %s395_s22 }
  0x76   : > { %s5781_s24 = scalar_lea.sflag [#allocation17], %s384_s25 }
  0x77   : > { %s7000_s10 = scalar_select %p5775_p7, 1, 0 }
  0x78   : > { %p5787_p3 = pneg %p5775_p7 }
  0x79   : > { %s5773_s13 = scalar_lea.hbm %s6999_s7, %s6956_s18  ;;  %s5256_s30 = scalar_lea.hbm %s6999_s7, 32768 }
  0x7a   : > { %s5251_s26 = scalar_lea.hbm %s5773_s13, 8192  ;;  %p5257_p4 = scmp.lt.u32.totalorder %s5773_s13, %s6999_s7 }
  0x7b   : > { %p5252_p9 = scmp.ne.s32.totalorder %s5773_s13, %s5251_s26  ;;  %p5258_p11 = scmp.lt.u32.totalorder %s5256_s30, %s5251_s26 }
  0x7c   : > { %s7001_s27 = scalar_select %p5787_p3, 1, 0 }
  0x7d   : > { %p5254_p10 = pnand %p5787_p3, %p5252_p9  ;;  %p5259_p12 = por %p5258_p11, %p5257_p4 }
  0x7e   : > { %p5260_p13 = scmp.lt.u32.totalorder %s5251_s26, %s5773_s13 }
  0x7f   : > { %p5255_p1 = pneg %p5254_p10 }
  0x80   : > { %p5261_p0 = por %p5260_p13, %p5259_p12 }
  0x82   : > { %p5262_p5 = pnand %p5261_p0, %p5255_p1 }
  0x84   : > { %5265 = shalt.err (!%p5262_p5)
}
  0x85   : > { %s5266_s25 = scalar_lea.vmem %s5779_s22, 8192  ;;  %s5546_s20 = smov [#allocation16]  }
  0x86   : > { %p5267_p9 = scmp.ne.s32.totalorder %s5779_s22, %s5266_s25  ;;  %s5271_s29 = sshll.u32 %s5546_s20, 4  ;;  %s5272_s29 = int_to_ptr.vmem [resolvable:$false] %s5271_s29 }
  0x87   : > { %s5273_s1 = scalar_lea.vmem %s5272_s29, 16384  ;;  %p5274_p6 = scmp.lt.s32.totalorder %s5779_s22, %s5272_s29 }
  0x88   : > { %p5269_p10 = pnand %p5267_p9, %p5787_p3  ;;  %p5275_p8 = scmp.lt.s32.totalorder %s5273_s1, %s5266_s25 }
  0x8a   : > { %p5270_p2 = pneg %p5269_p10  ;;  %p5276_p4 = por %p5275_p8, %p5274_p6 }
  0x8c   : > { %p5277_p11 = pnand %p5276_p4, %p5270_p2 }
  0x8e   : > { %5280 = shalt.err (!%p5277_p11)
}
  0x8f   : > { %s5547_s26 = smov 512   ;;  %s7002_s18 = smov 8  }
  0x90   : > { %s7003_s30 = smov 128   ;;  %s5548_s3 = smov [#allocation4]  }
  0x91   : > { %4656 = dma.hbm_to_vmem [thread:$0]  (!%p5775_p7), %s5773_s13, 8192, %s5779_s22, %s5781_s24, %s5547_s26, %s7003_s30, %s7002_s18  }
  0x92   : > { %s294_s5 = sshll.u32 %s5548_s3, 4  ;;  %s5549_s20 = smov [#allocation9]   ;;  %s295_s5 = int_to_ptr.vmem [resolvable:$true] %s294_s5 }
  0x93   : > { %s320_s7 = sshll.u32 %s5549_s20, 4  ;;  %s5281_s1 = scalar_lea.hbm %s6935_s0, 1024  ;;  %s321_s7 = int_to_ptr.vmem [resolvable:$true] %s320_s7 }
  0x94   : > { %p5282_p6 = scmp.ne.s32.totalorder %s6935_s0, %s5281_s1  ;;  %p7004_p8 = scmp.ne.s32.totalorder %s6991_s11, 0 }
  0x95   : > { %p5288_p12 = scmp.lt.u32.totalorder %s5281_s1, %s6935_s0 }
  0x96   : > { %p5284_p2 = pnand %p5282_p6, %p7004_p8 }
  0x98   : > { %p5285_p1 = pneg %p5284_p2 }
  0x9a   : > { %p5290_p13 = pnand %p5288_p12, %p5285_p1 }
  0x9c   : > { %5293 = shalt.err (!%p5290_p13)
}
  0x9d   : > { %s5294_s3 = scalar_lea.vmem %s295_s5, 1024  ;;  %p5302_p10 = scmp.lt.s32.totalorder %s295_s5, %s295_s5 }
  0x9e   : > { %p5295_p0 = scmp.ne.s32.totalorder %s295_s5, %s5294_s3  ;;  %p5303_p4 = scmp.lt.s32.totalorder %s5294_s3, %s5294_s3 }
  0xa0   : > { %p5297_p5 = pnand %p5295_p0, %p7004_p8  ;;  %p5304_p11 = por %p5303_p4, %p5302_p10 }
  0xa2   : > { %p5298_p9 = pneg %p5297_p5 }
  0xa4   : > { %p5305_p7 = pnand %p5304_p11, %p5298_p9 }
  0xa6   : > { %5308 = shalt.err (!%p5305_p7)
}
  0xa7   : > { %p7005_p6 = scmp.ne.s32.totalorder %s6989_s23, 0  ;;  %s5309_s19 = scalar_lea.hbm %s6937_s2, 2048 }
  0xa8   : > { %p5310_p2 = scmp.ne.s32.totalorder %s6937_s2, %s5309_s19  ;;  %p5316_p12 = scmp.lt.u32.totalorder %s5309_s19, %s6937_s2 }
  0xa9   : > { %4634 = dma.hbm_to_vmem [thread:$0]  (!%p7005_p6), %s6935_s0, 1024, %s295_s5, [#allocation5], %s7003_s30, %s7003_s30, %s7002_s18  }
  0xaa   : > { %p5312_p7 = pnand %p5310_p2, %p7004_p8 }
  0xac   : > { %p5313_p1 = pneg %p5312_p7 }
  0xae   : > { %p5318_p13 = pnand %p5316_p12, %p5313_p1 }
  0xb0   : > { %5321 = shalt.err (!%p5318_p13)
}
  0xb1   : > { %s5322_s25 = scalar_lea.vmem %s321_s7, 2048  ;;  %p5330_p10 = scmp.lt.s32.totalorder %s321_s7, %s321_s7 }
  0xb2   : > { %p5323_p0 = scmp.ne.s32.totalorder %s321_s7, %s5322_s25  ;;  %p5331_p4 = scmp.lt.s32.totalorder %s5322_s25, %s5322_s25 }
  0xb4   : > { %p5325_p5 = pnand %p5323_p0, %p7004_p8  ;;  %p5332_p11 = por %p5331_p4, %p5330_p10 }
  0xb6   : > { %p5326_p9 = pneg %p5325_p5 }
  0xb8   : > { %p5333_p3 = pnand %p5332_p11, %p5326_p9 }
  0xba   : > { %5336 = shalt.err (!%p5333_p3)
}
  0xbb   : > { %4640 = dma.hbm_to_vmem [thread:$0]  (!%p7005_p6), %s6937_s2, 2048, %s321_s7, [#allocation8], %s7003_s30, %s7003_s30, %s7002_s18  }
  0xbc   : > { %s5550_s3 = smov [#allocation12]   ;;  %s5551_s22 = smov [#allocation15]  }
  0xbd   : > { %s346_s15 = sshll.u32 %s5550_s3, 4  ;;  %s373_s28 = sshll.u32 %s5551_s22, 4  ;;  %s347_s15 = int_to_ptr.vmem [resolvable:$true] %s346_s15  ;;  %s374_s28 = int_to_ptr.vmem [resolvable:$true] %s373_s28 }
  0xbe   : > { %s5337_s13 = scalar_lea.hbm %s6939_s4, 8192 }
  0xbf   : > { %p5338_p3 = scmp.ne.s32.totalorder %s6939_s4, %s5337_s13  ;;  %p5344_p1 = scmp.lt.u32.totalorder %s5337_s13, %s6939_s4 }
  0xc1   : > { %p5340_p2 = pnand %p5338_p3, %p7004_p8 }
  0xc3   : > { %p5341_p7 = pneg %p5340_p2 }
  0xc5   : > { %p5346_p12 = pnand %p5344_p1, %p5341_p7 }
  0xc7   : > { %5349 = shalt.err (!%p5346_p12)
}
  0xc8   : > { %s5350_s7 = scalar_lea.vmem %s347_s15, 8192  ;;  %p5358_p9 = scmp.lt.s32.totalorder %s347_s15, %s347_s15 }
  0xc9   : > { %p5351_p13 = scmp.ne.s32.totalorder %s347_s15, %s5350_s7  ;;  %p5359_p10 = scmp.lt.s32.totalorder %s5350_s7, %s5350_s7 }
  0xcb   : > { %p5353_p0 = pnand %p5351_p13, %p7004_p8  ;;  %p5360_p4 = por %p5359_p10, %p5358_p9 }
  0xcd   : > { %p5354_p5 = pneg %p5353_p0 }
  0xcf   : > { %p5361_p11 = pnand %p5360_p4, %p5354_p5 }
  0xd1   : > { %5364 = shalt.err (!%p5361_p11)
}
  0xd2   : > { %s7006_s5 = smov 16   ;;  %s7007_s1 = smov 256  }
  0xd3   : > { %4646 = dma.hbm_to_vmem [thread:$0]  (!%p7005_p6), %s6939_s4, 8192, %s347_s15, [#allocation11], %s7007_s1, %s7007_s1, %s7006_s5  }
  0xd4   : > { %s4243_s12 = sshll.u32 %s5764_s21, 3  ;;  %s5365_s26 = scalar_lea.hbm %s6941_s6, 416 }
  0xd5   : > { %p5366_p3 = scmp.ne.s32.totalorder %s6941_s6, %s5365_s26  ;;  %p5372_p1 = scmp.lt.u32.totalorder %s5365_s26, %s6941_s6 }
  0xd7   : > { %p5368_p2 = pnand %p5366_p3, %p7004_p8 }
  0xd9   : > { %p5369_p7 = pneg %p5368_p2 }
  0xdb   : > { %p5374_p12 = pnand %p5372_p1, %p5369_p7 }
  0xdd   : > { %5377 = shalt.err (!%p5374_p12)
}
  0xde   : > { %s5378_s15 = scalar_lea.vmem %s374_s28, 416  ;;  %p5386_p9 = scmp.lt.s32.totalorder %s374_s28, %s374_s28 }
  0xdf   : > { %p5379_p13 = scmp.ne.s32.totalorder %s374_s28, %s5378_s15  ;;  %p5387_p10 = scmp.lt.s32.totalorder %s5378_s15, %s5378_s15 }
  0xe1   : > { %p5381_p0 = pnand %p5379_p13, %p7004_p8  ;;  %p5388_p4 = por %p5387_p10, %p5386_p9 }
  0xe3   : > { %p5382_p5 = pneg %p5381_p0 }
  0xe5   : > { %p5389_p11 = pnand %p5388_p4, %p5382_p5 }
  0xe7   : > { %5392 = shalt.err (!%p5389_p11)
}
  0xe8   : > { %4652 = dma.hbm_to_vmem [thread:$0]  (!%p7005_p6), %s6941_s6, 416, %s374_s28, [#allocation14]  }
  0xe9   : > { %s7008_s3 = sshll.u32 %s5537_s16, 7  ;;  %s409_s13 = scalar_lea.vmem [#allocation18], %s4243_s12 }
  0xea   : > { %s5900_s11 = scalar_lea.hbm %s6943_s8, %s7008_s3  ;;  %s417_s26 = sshll.u32 %s409_s13, 4  ;;  %s418_s26 = int_to_ptr.vmem [resolvable:$true] %s417_s26 }
  0xeb   : > { %s4246_s23 = sshll.u32 %s5764_s21, 8  ;;  %s5393_s20 = scalar_lea.hbm %s5900_s11, 128 }
  0xec   : > { %p5394_p8 = scmp.ne.s32.totalorder %s5900_s11, %s5393_s20  ;;  %p7009_p3 = scmp.ne.s32.totalorder %s7001_s27, 0 }
  0xed   : > { %s5398_s25 = scalar_lea.hbm %s6943_s8, 512  ;;  %p5399_p6 = scmp.lt.u32.totalorder %s5900_s11, %s6943_s8 }
  0xee   : > { %p5396_p2 = pnand %p5394_p8, %p7009_p3  ;;  %p5400_p1 = scmp.lt.u32.totalorder %s5398_s25, %s5393_s20 }
  0xef   : > { %p5402_p13 = scmp.lt.u32.totalorder %s5393_s20, %s5900_s11 }
  0xf0   : > { %p5397_p7 = pneg %p5396_p2  ;;  %p5401_p12 = por %p5400_p1, %p5399_p6 }
  0xf2   : > { %p5403_p0 = por %p5402_p13, %p5401_p12 }
  0xf4   : > { %p5404_p5 = pnand %p5403_p0, %p5397_p7 }
  0xf6   : > { %5407 = shalt.err (!%p5404_p5)
}
  0xf7   : > { %s5408_s12 = scalar_lea.vmem %s418_s26, 128  ;;  %s5552_s5 = smov [#allocation18]  }
  0xf8   : > { %p5409_p9 = scmp.ne.s32.totalorder %s418_s26, %s5408_s12  ;;  %s5413_s1 = sshll.u32 %s5552_s5, 4  ;;  %s5414_s1 = int_to_ptr.vmem [resolvable:$false] %s5413_s1 }
  0xf9   : > { %s5415_s3 = scalar_lea.vmem %s5414_s1, 256  ;;  %p5416_p11 = scmp.lt.s32.totalorder %s418_s26, %s5414_s1 }
  0xfa   : > { %p5411_p10 = pnand %p5409_p9, %p7009_p3  ;;  %p5417_p8 = scmp.lt.s32.totalorder %s5415_s3, %s5408_s12 }
  0xfc   : > { %p5412_p4 = pneg %p5411_p10  ;;  %p5418_p2 = por %p5417_p8, %p5416_p11 }
  0xfe   : > { %p5419_p1 = pnand %p5418_p2, %p5412_p4 }
 0x100   : > { %5422 = shalt.err (!%p5419_p1)
}
 0x101   : > { %p7010_p6 = scmp.ne.s32.totalorder %s7000_s10, 0  ;;  %s4528_s22 = sshll.u32 %s5537_s16, 12 }
 0x102   : > { %s5925_s20 = scalar_lea.hbm %s6944_s9, %s4528_s22  ;;  %s428_s28 = scalar_lea.vmem [#allocation19], %s4246_s23 }
 0x103   : > { %4659 = dma.hbm_to_vmem [thread:$0]  (!%p7010_p6), %s5900_s11, 128, %s418_s26, %s5781_s24  }
 0x104   : > { %s436_s29 = sshll.u32 %s428_s28, 4  ;;  %s425_s25 = scalar_lea.sflag [#allocation20], %s5764_s21  ;;  %s5929_s29 = int_to_ptr.vmem [resolvable:$true] %s436_s29 }
 0x105   : > { %s5423_s7 = scalar_lea.hbm %s5925_s20, 4096  ;;  %s5428_s11 = scalar_lea.hbm %s6944_s9, 16384 }
 0x106   : > { %p5424_p7 = scmp.ne.s32.totalorder %s5925_s20, %s5423_s7  ;;  %p5429_p0 = scmp.lt.u32.totalorder %s5925_s20, %s6944_s9 }
 0x107   : > { %p5430_p5 = scmp.lt.u32.totalorder %s5428_s11, %s5423_s7  ;;  %p5432_p10 = scmp.lt.u32.totalorder %s5423_s7, %s5925_s20 }
 0x108   : > { %p5426_p12 = pnand %p5424_p7, %p7009_p3 }
 0x109   : > { %p5431_p9 = por %p5430_p5, %p5429_p0 }
 0x10a   : > { %p5427_p13 = pneg %p5426_p12 }
 0x10b   : > { %p5433_p4 = por %p5432_p10, %p5431_p9 }
 0x10d   : > { %p5434_p11 = pnand %p5433_p4, %p5427_p13 }
 0x10f   : > { %5437 = shalt.err (!%p5434_p11)
}
 0x110   : > { %s5438_s23 = scalar_lea.vmem %s5929_s29, 4096  ;;  %s5553_s12 = smov [#allocation19]  }
 0x111   : > { %p5439_p8 = scmp.ne.s32.totalorder %s5929_s29, %s5438_s23  ;;  %s5443_s5 = sshll.u32 %s5553_s12, 4  ;;  %s5444_s5 = int_to_ptr.vmem [resolvable:$false] %s5443_s5 }
 0x112   : > { %s5445_s1 = scalar_lea.vmem %s5444_s5, 8192  ;;  %p5446_p7 = scmp.lt.s32.totalorder %s5929_s29, %s5444_s5 }
 0x113   : > { %p5441_p2 = pnand %p5439_p8, %p7009_p3  ;;  %p5447_p12 = scmp.lt.s32.totalorder %s5445_s1, %s5438_s23 }
 0x115   : > { %p5442_p1 = pneg %p5441_p2  ;;  %p5448_p0 = por %p5447_p12, %p5446_p7 }
 0x117   : > { %p5449_p5 = pnand %p5448_p0, %p5442_p1 }
 0x119   : > { %5452 = shalt.err (!%p5449_p5)
}
 0x11a   : > { %4662 = dma.hbm_to_vmem [thread:$0]  (!%p7010_p6), %s5925_s20, 4096, %s5929_s29, %s425_s25, %s7003_s30, %s7003_s30, %s7002_s18  }
 0x11b   : > { %s7011_s27 = sld [smem:[#allocation30_spill]] }
 0x121   : > { %p7012_p3 = scmp.ne.s32.totalorder %s7011_s27, 0 }
 0x122   : > { %p7013_p13 = scmp.eq.s32.totalorder (!%p7012_p3), %s5637_s17, 0 }
 0x123   : > { %448 = sbr.rel (%p7012_p3) target bundleno = 1800 (0x708), region = 60 }
 0x12a   : > { %5496 = dma.done.wait (%p7013_p13), [#allocation5], 1024   ;;  %p7014_p9 = pmov %p7013_p13 }
 0x12c   : > { %5498 = vsyncadd (%p7014_p9), [#allocation5], 4294966272  ;;  %p7015_p10 = pmov %p7014_p9 }
 0x12d   : > { %p7016_p4 = pmov %p7014_p9 }
 0x12e   : > { %5500 = dma.done.wait (%p7015_p10), [#allocation8], 3072  }
 0x12f   : > { %5502 = vsyncadd (%p7016_p4), [#allocation8], 4294964224  ;;  %p7017_p11 = pmov %p7016_p4 }
 0x130   : > { %p7018_p6 = pmov %p7016_p4 }
 0x131   : > { %5504 = dma.done.wait (%p7017_p11), [#allocation11], 10240  }
 0x132   : > { %5506 = vsyncadd (%p7018_p6), [#allocation11], 4294957056  ;;  %p7019_p8 = pmov %p7016_p4 }
 0x133   : > { %p7020_p2 = pmov %p7016_p4 }
 0x134   : > { %5508 = dma.done.wait (%p7019_p8), [#allocation14], 8608  }
 0x135   : > { %5510 = vsyncadd (%p7020_p2), [#allocation14], 4294958688  ;;  %s7021_s10 = sld [smem:[#allocation33_spill]]  ;;  %s478_s21 = sand.u32 1, %s5637_s17  }
 0x136   : > { %s480_s18 = sand.u32 1, %s5529_s14   ;;  %s479_s3 = scalar_lea.sflag [#allocation17], %s478_s21 }
 0x137   : > { %s4258_s30 = sshll.u32 %s480_s18, 9 }
 0x138   : > { %s5978_s22 = scalar_lea.vmem [#allocation16], %s4258_s30 }
 0x13b   : > { %p7022_p1 = scmp.ne.s32.totalorder %s7021_s10, 0 }
 0x13d   : > { %5512 = dma.done.wait (%p7022_p1), %s479_s3, 8320  }
 0x13e   : > { %5514 = vsyncadd (%p7022_p1), %s479_s3, 4294958976  ;;  %s4259_s19 = sshll.u32 %s480_s18, 3  ;;  %s4260_s13 = sshll.u32 %s480_s18, 8 }
 0x13f   : > { %s5984_s20 = scalar_lea.vmem [#allocation18], %s4259_s19  ;;  %s497_s28 = scalar_lea.sflag [#allocation20], %s480_s18 }
 0x140   : > { %s5986_s29 = scalar_lea.vmem [#allocation19], %s4260_s13 }
 0x141   : > { %5516 = dma.done.wait (%p7022_p1), %s497_s28, 4096  }
 0x142   : > { %5518 = vsyncadd (%p7022_p1), %s497_s28, 4294963200  ;;  %p7023_p7 = scmp.ne.s32.totalorder %s5637_s17, 0 }
 0x144   : > { %549 = sbr.rel (%p7023_p7) target bundleno = 1071 (0x42f), region = 104 }
 0x14b   : > { %v4731_v0 = vld [vmem:[#allocation9 + $0x4] ss:$8 sps:$4 sm:$0xff]   ;;  %v5554_v1 = vmov 0.0   ;;  %v5555_v3 = vmov 0   ;;  %v4735_v4 = vld [vmem:[#allocation9] ss:$8 sps:$4 sm:$0xff]  }
 0x14c   : > { %550 = vst [vmem:[#allocation3] sm:$0xff] %v5554_v1  ;;  %551 = vst [vmem:[#allocation3 + $0x8] sm:$0xff] %v5554_v1  ;;  %v4733_v2 = vld [vmem:[#allocation10 + $0x4] ss:$8 sps:$4 sm:$0xff]   ;;  %718 = vmatprep.mubr.bf16.mxu0 %v5555_v3  ;;  %1106 = vmatprep.mubr.bf16.mxu1 %v5555_v3  ;;  %v4736_v5 = vld [vmem:[#allocation10] ss:$8 sps:$4 sm:$0xff]  }
 0x14d   : > { %552 = vst [vmem:[#allocation3 + $0x10] sm:$0xff] %v5554_v1  ;;  %553 = vst [vmem:[#allocation3 + $0x18] sm:$0xff] %v5554_v1  ;;  %686 = vmatprep.subr.bf16.mxu0 %v4731_v0  ;;  %1074 = vmatprep.subr.bf16.mxu1 %v4733_v2  ;;  %v4737_v6 = vld [vmem:[#allocation9 + $0x14] ss:$8 sps:$4 sm:$0xff]   ;;  %v4741_v8 = vld [vmem:[#allocation9 + $0x10] ss:$8 sps:$4 sm:$0xff]  }
 0x14e   : > { %554 = vst [vmem:[#allocation3 + $0x20] sm:$0xff] %v5554_v1  ;;  %555 = vst [vmem:[#allocation3 + $0x28] sm:$0xff] %v5554_v1  ;;  %687 = vmatpush1.bf16.msra.mxu0 %v4735_v4  ;;  %1075 = vmatpush1.bf16.msra.mxu1 %v4736_v5  ;;  %v4739_v7 = vld [vmem:[#allocation10 + $0x14] ss:$8 sps:$4 sm:$0xff]   ;;  %v4742_v9 = vld [vmem:[#allocation10 + $0x10] ss:$8 sps:$4 sm:$0xff]  }
 0x14f   : > { %556 = vst [vmem:[#allocation3 + $0x30] sm:$0xff] %v5554_v1  ;;  %557 = vst [vmem:[#allocation3 + $0x38] sm:$0xff] %v5554_v1  ;;  %688 = vmatprep.subr.bf16.mxu0 %v4737_v6  ;;  %1076 = vmatprep.subr.bf16.mxu1 %v4739_v7  ;;  %v4743_v10 = vld [vmem:[#allocation9 + $0x24] ss:$8 sps:$4 sm:$0xff]   ;;  %v4747_v12 = vld [vmem:[#allocation9 + $0x20] ss:$8 sps:$4 sm:$0xff]  }
 0x150   : > { %558 = vst [vmem:[#allocation3 + $0x40] sm:$0xff] %v5554_v1  ;;  %559 = vst [vmem:[#allocation3 + $0x48] sm:$0xff] %v5554_v1  ;;  %v4745_v11 = vld [vmem:[#allocation10 + $0x24] ss:$8 sps:$4 sm:$0xff]   ;;  %v4748_v13 = vld [vmem:[#allocation10 + $0x20] ss:$8 sps:$4 sm:$0xff]  }
 0x151   : > { %560 = vst [vmem:[#allocation3 + $0x50] sm:$0xff] %v5554_v1  ;;  %561 = vst [vmem:[#allocation3 + $0x58] sm:$0xff] %v5554_v1  ;;  %v4749_v14 = vld [vmem:[#allocation9 + $0x34] ss:$8 sps:$4 sm:$0xff]   ;;  %v4753_v16 = vld [vmem:[#allocation9 + $0x30] ss:$8 sps:$4 sm:$0xff]  }
 0x152   : > { %562 = vst [vmem:[#allocation3 + $0x60] sm:$0xff] %v5554_v1  ;;  %563 = vst [vmem:[#allocation3 + $0x68] sm:$0xff] %v5554_v1  ;;  %689 = vmatpush1.bf16.msra.mxu0 %v4741_v8  ;;  %1077 = vmatpush1.bf16.msra.mxu1 %v4742_v9  ;;  %v4751_v15 = vld [vmem:[#allocation10 + $0x34] ss:$8 sps:$4 sm:$0xff]   ;;  %v4754_v17 = vld [vmem:[#allocation10 + $0x30] ss:$8 sps:$4 sm:$0xff]  }
 0x153   : > { %564 = vst [vmem:[#allocation3 + $0x70] sm:$0xff] %v5554_v1  ;;  %565 = vst [vmem:[#allocation3 + $0x78] sm:$0xff] %v5554_v1  ;;  %690 = vmatprep.subr.bf16.mxu0 %v4743_v10  ;;  %1078 = vmatprep.subr.bf16.mxu1 %v4745_v11  ;;  %v4755_v18 = vld [vmem:[#allocation9 + $0x44] ss:$8 sps:$4 sm:$0xff]   ;;  %v4759_v20 = vld [vmem:[#allocation9 + $0x40] ss:$8 sps:$4 sm:$0xff]  }
 0x154   : > { %v4757_v19 = vld [vmem:[#allocation10 + $0x44] ss:$8 sps:$4 sm:$0xff]   ;;  %v4760_v21 = vld [vmem:[#allocation10 + $0x40] ss:$8 sps:$4 sm:$0xff]   ;;  %v4761_v22 = vld [vmem:[#allocation9 + $0x54] ss:$8 sps:$4 sm:$0xff]  }
 0x155   : > { %v4763_v23 = vld [vmem:[#allocation10 + $0x54] ss:$8 sps:$4 sm:$0xff]   ;;  %v4765_v24 = vld [vmem:[#allocation9 + $0x50] ss:$8 sps:$4 sm:$0xff]   ;;  %v4767_v26 = vld [vmem:[#allocation9 + $0x64] ss:$8 sps:$4 sm:$0xff]  }
 0x156   : > { %691 = vmatpush1.bf16.msra.mxu0 %v4747_v12  ;;  %1079 = vmatpush1.bf16.msra.mxu1 %v4748_v13  ;;  %v4766_v25 = vld [vmem:[#allocation10 + $0x50] ss:$8 sps:$4 sm:$0xff]   ;;  %v4769_v27 = vld [vmem:[#allocation10 + $0x64] ss:$8 sps:$4 sm:$0xff]   ;;  %v4771_v28 = vld [vmem:[#allocation9 + $0x60] ss:$8 sps:$4 sm:$0xff]  }
 0x157   : > { %692 = vmatprep.subr.bf16.mxu0 %v4749_v14  ;;  %1080 = vmatprep.subr.bf16.mxu1 %v4751_v15  ;;  %v4772_v29 = vld [vmem:[#allocation10 + $0x60] ss:$8 sps:$4 sm:$0xff]   ;;  %v4773_v30 = vld [vmem:[#allocation9 + $0x74] ss:$8 sps:$4 sm:$0xff]   ;;  %v4777_v32 = vld [vmem:[#allocation9 + $0x70] ss:$8 sps:$4 sm:$0xff]  }
 0x158   : > { %v4775_v31 = vld [vmem:[#allocation10 + $0x74] ss:$8 sps:$4 sm:$0xff]   ;;  %v4778_v33 = vld [vmem:[#allocation10 + $0x70] ss:$8 sps:$4 sm:$0xff]   ;;  %v566_v34 = vld [vmem:[#allocation4] sm:$0xff] }
 0x159   : > { %v567_v35 = vld [vmem:[#allocation4 + $0x8] sm:$0xff]  ;;  %v954_v36 = vld [vmem:[#allocation7] sm:$0xff]  ;;  %v568_v40 = vld [vmem:[#allocation4 + $0x10] sm:$0xff] }
 0x15a   : > { %693 = vmatpush1.bf16.msra.mxu0 %v4753_v16  ;;  %1081 = vmatpush1.bf16.msra.mxu1 %v4754_v17  ;;  %v955_v37 = vld [vmem:[#allocation7 + $0x8] sm:$0xff]  ;;  %v574_v38 = vpack.c.bf16 %v567_v35, %v566_v34  ;;  %v569_v41 = vld [vmem:[#allocation4 + $0x18] sm:$0xff]  ;;  %v956_v42 = vld [vmem:[#allocation7 + $0x10] sm:$0xff] }
 0x15b   : > { %694 = vmatprep.subr.bf16.mxu0 %v4755_v18  ;;  %1082 = vmatprep.subr.bf16.mxu1 %v4757_v19  ;;  %v962_v39 = vpack.c.bf16 %v955_v37, %v954_v36  ;;  %v957_v43 = vld [vmem:[#allocation7 + $0x18] sm:$0xff]  ;;  %v575_v44 = vpack.c.bf16 %v569_v41, %v568_v40  ;;  %v570_v46 = vld [vmem:[#allocation4 + $0x20] sm:$0xff]  ;;  %v571_v47 = vld [vmem:[#allocation4 + $0x28] sm:$0xff] }
 0x15c   : > { %v963_v45 = vpack.c.bf16 %v957_v43, %v956_v42  ;;  %v958_v48 = vld [vmem:[#allocation7 + $0x20] sm:$0xff]  ;;  %v959_v49 = vld [vmem:[#allocation7 + $0x28] sm:$0xff]  ;;  %v576_v50 = vpack.c.bf16 %v571_v47, %v570_v46  ;;  %v572_v52 = vld [vmem:[#allocation4 + $0x30] sm:$0xff] }
 0x15d   : > { %v964_v51 = vpack.c.bf16 %v959_v49, %v958_v48  ;;  %v573_v53 = vld [vmem:[#allocation4 + $0x38] sm:$0xff]  ;;  %v960_v54 = vld [vmem:[#allocation7 + $0x30] sm:$0xff] }
 0x15e   : > { %695 = vmatpush1.bf16.msra.mxu0 %v4759_v20  ;;  %1083 = vmatpush1.bf16.msra.mxu1 %v4760_v21  ;;  %v961_v55 = vld [vmem:[#allocation7 + $0x38] sm:$0xff]  ;;  %v577_v56 = vpack.c.bf16 %v573_v53, %v572_v52  ;;  %v4781_v58 = vld [vmem:[#allocation13 + $0x4] ss:$16 sps:$4 sm:$0xff]   ;;  %v4779_v60 = vld [vmem:[#allocation13] ss:$16 sps:$4 sm:$0xff]  }
 0x15f   : > { %696 = vmatprep.subr.bf16.mxu0 %v4761_v22  ;;  %1084 = vmatprep.subr.bf16.mxu1 %v4763_v23  ;;  %v965_v57 = vpack.c.bf16 %v961_v55, %v960_v54  ;;  %v4784_v59 = vld [vmem:[#allocation13 + $0xc] ss:$16 sps:$4 sm:$0xff]   ;;  %v4782_v61 = vld [vmem:[#allocation13 + $0x8] ss:$16 sps:$4 sm:$0xff]   ;;  %v4787_v62 = vld [vmem:[#allocation13 + $0x24] ss:$16 sps:$4 sm:$0xff]  }
 0x160   : > { %v4790_v63 = vld [vmem:[#allocation13 + $0x2c] ss:$16 sps:$4 sm:$0xff]   ;;  %v4785_v0 = vld [vmem:[#allocation13 + $0x20] ss:$16 sps:$4 sm:$0xff]   ;;  %v4788_v1 = vld [vmem:[#allocation13 + $0x28] ss:$16 sps:$4 sm:$0xff]  }
 0x161   : > { %v4793_v2 = vld [vmem:[#allocation13 + $0x44] ss:$16 sps:$4 sm:$0xff]   ;;  %v4791_v4 = vld [vmem:[#allocation13 + $0x40] ss:$16 sps:$4 sm:$0xff]   ;;  %v4794_v5 = vld [vmem:[#allocation13 + $0x48] ss:$16 sps:$4 sm:$0xff]  }
 0x162   : > { %697 = vmatpush1.bf16.msra.mxu0 %v4765_v24  ;;  %1085 = vmatpush1.bf16.msra.mxu1 %v4766_v25  ;;  %v4799_v6 = vld [vmem:[#allocation13 + $0x64] ss:$16 sps:$4 sm:$0xff]   ;;  %v4802_v7 = vld [vmem:[#allocation13 + $0x6c] ss:$16 sps:$4 sm:$0xff]   ;;  %v4797_v8 = vld [vmem:[#allocation13 + $0x60] ss:$16 sps:$4 sm:$0xff]  }
 0x163   : > { %698 = vmatprep.subr.bf16.mxu0 %v4767_v26  ;;  %1086 = vmatprep.subr.bf16.mxu1 %v4769_v27  ;;  %v4800_v9 = vld [vmem:[#allocation13 + $0x68] ss:$16 sps:$4 sm:$0xff]   ;;  %v4805_v10 = vld [vmem:[#allocation13 + $0x84] ss:$16 sps:$4 sm:$0xff]   ;;  %v4808_v11 = vld [vmem:[#allocation13 + $0x8c] ss:$16 sps:$4 sm:$0xff]  }
 0x164   : > { %v4803_v12 = vld [vmem:[#allocation13 + $0x80] ss:$16 sps:$4 sm:$0xff]   ;;  %v4806_v13 = vld [vmem:[#allocation13 + $0x88] ss:$16 sps:$4 sm:$0xff]   ;;  %v4811_v14 = vld [vmem:[#allocation13 + $0xa4] ss:$16 sps:$4 sm:$0xff]  }
 0x165   : > { %v4814_v15 = vld [vmem:[#allocation13 + $0xac] ss:$16 sps:$4 sm:$0xff]   ;;  %v4809_v16 = vld [vmem:[#allocation13 + $0xa0] ss:$16 sps:$4 sm:$0xff]   ;;  %v4812_v17 = vld [vmem:[#allocation13 + $0xa8] ss:$16 sps:$4 sm:$0xff]  }
 0x166   : > { %699 = vmatpush1.bf16.msra.mxu0 %v4771_v28  ;;  %1087 = vmatpush1.bf16.msra.mxu1 %v4772_v29  ;;  %v4817_v18 = vld [vmem:[#allocation13 + $0xc4] ss:$16 sps:$4 sm:$0xff]   ;;  %v4820_v19 = vld [vmem:[#allocation13 + $0xcc] ss:$16 sps:$4 sm:$0xff]   ;;  %v4815_v20 = vld [vmem:[#allocation13 + $0xc0] ss:$16 sps:$4 sm:$0xff]  }
 0x167   : > { %700 = vmatprep.subr.bf16.mxu0 %v4773_v30  ;;  %1088 = vmatprep.subr.bf16.mxu1 %v4775_v31  ;;  %v4818_v21 = vld [vmem:[#allocation13 + $0xc8] ss:$16 sps:$4 sm:$0xff]   ;;  %v4823_v22 = vld [vmem:[#allocation13 + $0xe4] ss:$16 sps:$4 sm:$0xff]   ;;  %v4826_v23 = vld [vmem:[#allocation13 + $0xec] ss:$16 sps:$4 sm:$0xff]  }
 0x168   : > { %v4821_v24 = vld [vmem:[#allocation13 + $0xe0] ss:$16 sps:$4 sm:$0xff]   ;;  %v4824_v25 = vld [vmem:[#allocation13 + $0xe8] ss:$16 sps:$4 sm:$0xff]   ;;  %v4829_v26 = vld [vmem:[#allocation13 + $0x104] ss:$16 sps:$4 sm:$0xff]  }
 0x169   : > { %v4832_v27 = vld [vmem:[#allocation13 + $0x10c] ss:$16 sps:$4 sm:$0xff]   ;;  %v4827_v28 = vld [vmem:[#allocation13 + $0x100] ss:$16 sps:$4 sm:$0xff]   ;;  %v4830_v29 = vld [vmem:[#allocation13 + $0x108] ss:$16 sps:$4 sm:$0xff]  }
 0x16a   : > { %701 = vmatpush1.bf16.msra.mxu0 %v4777_v32  ;;  %1089 = vmatpush1.bf16.msra.mxu1 %v4778_v33  ;;  %v4835_v30 = vld [vmem:[#allocation13 + $0x124] ss:$16 sps:$4 sm:$0xff]   ;;  %v4838_v31 = vld [vmem:[#allocation13 + $0x12c] ss:$16 sps:$4 sm:$0xff]   ;;  %v4833_v32 = vld [vmem:[#allocation13 + $0x120] ss:$16 sps:$4 sm:$0xff]  }
 0x16b   : > { %1805 = vmatprep.subr.bf16.mxu0 %v4781_v58  ;;  %1878 = vmatprep.subr.bf16.mxu1 %v4784_v59  ;;  %v4836_v33 = vld [vmem:[#allocation13 + $0x128] ss:$16 sps:$4 sm:$0xff]   ;;  %v4841_v34 = vld [vmem:[#allocation13 + $0x144] ss:$16 sps:$4 sm:$0xff]   ;;  %v4844_v35 = vld [vmem:[#allocation13 + $0x14c] ss:$16 sps:$4 sm:$0xff]  }
 0x16c   : > { %v4839_v36 = vld [vmem:[#allocation13 + $0x140] ss:$16 sps:$4 sm:$0xff]   ;;  %v4842_v37 = vld [vmem:[#allocation13 + $0x148] ss:$16 sps:$4 sm:$0xff]   ;;  %v4853_v42 = vld [vmem:[#allocation13 + $0x184] ss:$16 sps:$4 sm:$0xff]  }
 0x16d   : > { %719 = vmatmul.mubr.bf16.vlgmr.msra.gmra.mrb[0].mxu0 %v574_v38  ;;  %1107 = vmatmul.mubr.bf16.vlgmr.msra.gmra.mrb[0].mxu1 %v962_v39  ;;  %v4847_v38 = vld [vmem:[#allocation13 + $0x164] ss:$16 sps:$4 sm:$0xff]   ;;  %v4850_v39 = vld [vmem:[#allocation13 + $0x16c] ss:$16 sps:$4 sm:$0xff]   ;;  %v4845_v40 = vld [vmem:[#allocation13 + $0x160] ss:$16 sps:$4 sm:$0xff]  }
 0x16e   : > { %728 = vmatprep.mubr.bf16.mxu0 %v5555_v3  ;;  %1116 = vmatprep.mubr.bf16.mxu1 %v5555_v3  ;;  %v4848_v41 = vld [vmem:[#allocation13 + $0x168] ss:$16 sps:$4 sm:$0xff]   ;;  %v4856_v43 = vld [vmem:[#allocation13 + $0x18c] ss:$16 sps:$4 sm:$0xff]   ;;  %v4859_v46 = vld [vmem:[#allocation13 + $0x1a4] ss:$16 sps:$4 sm:$0xff]  }
 0x16f   : > { %1806 = vmatpush1.bf16.msra.mxu0 %v4779_v60  ;;  %1879 = vmatpush1.bf16.msra.mxu1 %v4782_v61  ;;  %v4862_v47 = vld [vmem:[#allocation13 + $0x1ac] ss:$16 sps:$4 sm:$0xff]   ;;  %v4857_v48 = vld [vmem:[#allocation13 + $0x1a0] ss:$16 sps:$4 sm:$0xff]   ;;  %v4860_v49 = vld [vmem:[#allocation13 + $0x1a8] ss:$16 sps:$4 sm:$0xff]   ;;  %v596_v60 = vlaneseq }
 0x170   : > { %1807 = vmatprep.subr.bf16.mxu0 %v4787_v62  ;;  %1880 = vmatprep.subr.bf16.mxu1 %v4790_v63  ;;  %v4863_v52 = vld [vmem:[#allocation13 + $0x1c0] ss:$16 sps:$4 sm:$0xff]   ;;  %v4866_v53 = vld [vmem:[#allocation13 + $0x1c8] ss:$16 sps:$4 sm:$0xff]   ;;  %v4871_v54 = vld [vmem:[#allocation13 + $0x1e4] ss:$16 sps:$4 sm:$0xff]  }
 0x171   : > { %v4869_v55 = vld [vmem:[#allocation13 + $0x1e0] ss:$16 sps:$4 sm:$0xff]   ;;  %v4877_v58 = vld [vmem:[#allocation12 + $0x4] ss:$16 sps:$4 sm:$0xff]   ;;  %v4880_v59 = vld [vmem:[#allocation12 + $0xc] ss:$16 sps:$4 sm:$0xff]  }
 0x172   : > { %v6002_v61 = vshrl.u32 %v596_v60, 7 }
 0x173   : > { %1808 = vmatpush1.bf16.msra.mxu0 %v4785_v0  ;;  %1881 = vmatpush1.bf16.msra.mxu1 %v4788_v1  ;;  %v594_v0 = vld [vmem:[#allocation15] sm:$0x3]  ;;  %v982_v1 = vld [vmem:[#allocation15 + $0x6] sm:$0x3] }
 0x174   : > { %1809 = vmatprep.subr.bf16.mxu0 %v4793_v2  ;;  %v6005_v62 = vsub.s32 0, %v6002_v61  ;;  %v6008_v63 = vsub.s32 1, %v6002_v61 }
 0x175   : > { %729 = vmatmul.mubr.bf16.gmra.mrb[4].mxu0 %v575_v44  ;;  %1117 = vmatmul.mubr.bf16.gmra.mrb[4].mxu1 %v963_v45  ;;  %v4851_v44 = vld [vmem:[#allocation13 + $0x180] ss:$16 sps:$4 sm:$0xff]   ;;  %v4854_v45 = vld [vmem:[#allocation13 + $0x188] ss:$16 sps:$4 sm:$0xff]  }
 0x176   : > { %738 = vmatprep.mubr.bf16.mxu0 %v5555_v3  ;;  %1126 = vmatprep.mubr.bf16.mxu1 %v5555_v3  ;;  %v6011_v2 = vrot.slane %v594_v0, %v6005_v62 }
 0x177   : > { %1810 = vmatpush1.bf16.msra.mxu0 %v4791_v4  ;;  %v6017_v4 = vrot.slane %v982_v1, %v6008_v63 }
 0x178   : > { %1811 = vmatprep.subr.bf16.mxu0 %v4799_v6 }
 0x17b   : > { %1812 = vmatpush1.bf16.msra.mxu0 %v4797_v8 }
 0x17c   : > { %1813 = vmatprep.subr.bf16.mxu0 %v4805_v10 }
 0x17d   : > { %739 = vmatmul.mubr.bf16.gmra.mrb[8].mxu0 %v576_v50  ;;  %1127 = vmatmul.mubr.bf16.gmra.mrb[8].mxu1 %v964_v51  ;;  %v4865_v50 = vld [vmem:[#allocation13 + $0x1c4] ss:$16 sps:$4 sm:$0xff]   ;;  %v4868_v51 = vld [vmem:[#allocation13 + $0x1cc] ss:$16 sps:$4 sm:$0xff]  }
 0x17e   : > { %748 = vmatprep.mubr.bf16.mxu0 %v5555_v3  ;;  %1136 = vmatprep.mubr.bf16.mxu1 %v5555_v3  ;;  %v4796_v3 = vld [vmem:[#allocation13 + $0x4c] ss:$16 sps:$4 sm:$0xff]  }
 0x17f   : > { %1882 = vmatprep.subr.bf16.mxu1 %v4796_v3  ;;  %1814 = vmatpush1.bf16.msra.mxu0 %v4803_v12  ;;  %v6014_v3 = vrot.slane %v982_v1, %v6005_v62 }
 0x180   : > { %1883 = vmatpush1.bf16.msra.mxu1 %v4794_v5  ;;  %1815 = vmatprep.subr.bf16.mxu0 %v4811_v14 }
 0x181   : > { %1884 = vmatprep.subr.bf16.mxu1 %v4802_v7  ;;  %v6020_v7 = vrot.slane %v594_v0, %v6008_v63 }
 0x183   : > { %1816 = vmatpush1.bf16.msra.mxu0 %v4809_v16 }
 0x184   : > { %1885 = vmatpush1.bf16.msra.mxu1 %v4800_v9  ;;  %1817 = vmatprep.subr.bf16.mxu0 %v4817_v18 }
 0x185   : > { %749 = vmatmul.mubr.bf16.gmra.mrb[12].mxu0 %v577_v56  ;;  %1137 = vmatmul.mubr.bf16.gmra.mrb[12].mxu1 %v965_v57  ;;  %v4874_v56 = vld [vmem:[#allocation13 + $0x1ec] ss:$16 sps:$4 sm:$0xff]   ;;  %v4872_v57 = vld [vmem:[#allocation13 + $0x1e8] ss:$16 sps:$4 sm:$0xff]  }
 0x186   : > { %1886 = vmatprep.subr.bf16.mxu1 %v4808_v11 }
 0x187   : > { %1818 = vmatpush1.bf16.msra.mxu0 %v4815_v20 }
 0x188   : > { %1887 = vmatpush1.bf16.msra.mxu1 %v4806_v13  ;;  %1819 = vmatprep.subr.bf16.mxu0 %v4823_v22 }
 0x189   : > { %1888 = vmatprep.subr.bf16.mxu1 %v4814_v15 }
 0x18b   : > { %1820 = vmatpush1.bf16.msra.mxu0 %v4821_v24 }
 0x18c   : > { %1889 = vmatpush1.bf16.msra.mxu1 %v4812_v17  ;;  %1821 = vmatprep.subr.bf16.mxu0 %v4829_v26 }
 0x18d   : > { %1890 = vmatprep.subr.bf16.mxu1 %v4820_v19 }
 0x18f   : > { %1822 = vmatpush1.bf16.msra.mxu0 %v4827_v28 }
 0x190   : > { %1891 = vmatpush1.bf16.msra.mxu1 %v4818_v21  ;;  %1823 = vmatprep.subr.bf16.mxu0 %v4835_v30 }
 0x191   : > { %1892 = vmatprep.subr.bf16.mxu1 %v4826_v23 }
 0x193   : > { %1824 = vmatpush1.bf16.msra.mxu0 %v4833_v32 }
 0x194   : > { %1893 = vmatpush1.bf16.msra.mxu1 %v4824_v25  ;;  %1825 = vmatprep.subr.bf16.mxu0 %v4841_v34 }
 0x195   : > { %1894 = vmatprep.subr.bf16.mxu1 %v4832_v27 }
 0x197   : > { %1826 = vmatpush1.bf16.msra.mxu0 %v4839_v36 }
 0x198   : > { %1895 = vmatpush1.bf16.msra.mxu1 %v4830_v29  ;;  %1827 = vmatprep.subr.bf16.mxu0 %v4847_v38 }
 0x199   : > { %1896 = vmatprep.subr.bf16.mxu1 %v4838_v31 }
 0x19b   : > { %1828 = vmatpush1.bf16.msra.mxu0 %v4845_v40 }
 0x19c   : > { %1897 = vmatpush1.bf16.msra.mxu1 %v4836_v33  ;;  %1829 = vmatprep.subr.bf16.mxu0 %v4853_v42 }
 0x19d   : > { %1898 = vmatprep.subr.bf16.mxu1 %v4844_v35 }
 0x19f   : > { %1830 = vmatpush1.bf16.msra.mxu0 %v4851_v44 }
 0x1a0   : > { %1899 = vmatpush1.bf16.msra.mxu1 %v4842_v37  ;;  %1831 = vmatprep.subr.bf16.mxu0 %v4859_v46 }
 0x1a1   : > { %1900 = vmatprep.subr.bf16.mxu1 %v4850_v39 }
 0x1a3   : > { %1832 = vmatpush1.bf16.msra.mxu0 %v4857_v48 }
 0x1a4   : > { %1901 = vmatpush1.bf16.msra.mxu1 %v4848_v41  ;;  %1833 = vmatprep.subr.bf16.mxu0 %v4865_v50 }
 0x1a5   : > { %1902 = vmatprep.subr.bf16.mxu1 %v4856_v43 }
 0x1a7   : > { %1834 = vmatpush1.bf16.msra.mxu0 %v4863_v52 }
 0x1a8   : > { %1903 = vmatpush1.bf16.msra.mxu1 %v4854_v45  ;;  %1835 = vmatprep.subr.bf16.mxu0 %v4871_v54 }
 0x1a9   : > { %1904 = vmatprep.subr.bf16.mxu1 %v4862_v47 }
 0x1ab   : > { %1836 = vmatpush1.bf16.msra.mxu0 %v4869_v55 }
 0x1ac   : > { %1905 = vmatpush1.bf16.msra.mxu1 %v4860_v49  ;;  %2271 = vmatprep.subr.bf16.mxu0 %v4877_v58 }
 0x1ad   : > { %1906 = vmatprep.subr.bf16.mxu1 %v4868_v51 }
 0x1b0   : > { %1907 = vmatpush1.bf16.msra.mxu1 %v4866_v53 }
 0x1b1   : > { %1908 = vmatprep.subr.bf16.mxu1 %v4874_v56 }
 0x1b4   : > { %1909 = vmatpush1.bf16.msra.mxu1 %v4872_v57 }
 0x1b5   : > { %2344 = vmatprep.subr.bf16.mxu1 %v4880_v59 }
 0x240   : > { %v1108_v5 = vpop.f32.mrb[0].mxu1  ;;  %v720_v6 = vpop.f32.mrb[0].mxu0 }
 0x241   : > { %v1110_v8 = vpop.f32.mrb[1].mxu1  ;;  %v722_v9 = vpop.f32.mrb[1].mxu0  ;;  %v6023_v11 = vadd.f32 %v720_v6, %v6011_v2  ;;  %v6026_v13 = vadd.f32 %v1108_v5, %v6014_v3 }
 0x242   : > { %v1112_v10 = vpop.f32.mrb[2].mxu1  ;;  %v724_v12 = vpop.f32.mrb[2].mxu0  ;;  %v6029_v14 = vadd.f32 %v1110_v8, %v6017_v4  ;;  %v6041_v20 = vadd.f32 %v722_v9, %v6020_v7 }
 0x243   : > { %v6032_v15 = vadd.f32 %v1112_v10, %v6014_v3  ;;  %v1114_v16 = vpop.f32.mrb[3].mxu1  ;;  %v6035_v17 = vadd.f32 %v724_v12, %v6011_v2  ;;  %v726_v18 = vpop.f32.mrb[3].mxu0  ;;  %v790_v24 = vmul.f32 %v6023_v11, %v6023_v11  ;;  %v1177_v26 = vmul.f32 %v6026_v13, %v6026_v13 }
 0x244   : > { %v6038_v19 = vadd.f32 %v1114_v16, %v6017_v4  ;;  %v6044_v21 = vadd.f32 %v726_v18, %v6020_v7  ;;  %v1178_v27 = vmul.f32 %v6029_v14, %v6029_v14  ;;  %v791_v31 = vmul.f32 %v6041_v20, %v6041_v20 }
 0x245   : > { %v1179_v22 = vmul.f32 %v6032_v15, %v6032_v15  ;;  %v792_v25 = vmul.f32 %v6035_v17, %v6035_v17  ;;  %v1149_v28 = vadd.f32 %v6032_v15, %v6026_v13  ;;  %v761_v32 = vadd.f32 %v6035_v17, %v6023_v11 }
 0x246   : > { %v1180_v23 = vmul.f32 %v6038_v19, %v6038_v19  ;;  %v1162_v29 = vadd.f32 %v6038_v19, %v6029_v14  ;;  %v774_v36 = vadd.f32 %v6044_v21, %v6041_v20  ;;  %v793_v37 = vmul.f32 %v6044_v21, %v6044_v21 }
 0x247   : > { %v1193_v40 = vadd.f32 %v1179_v22, %v1177_v26  ;;  %v806_v44 = vadd.f32 %v792_v25, %v790_v24 }
 0x248   : > { %v1118_v30 = vpop.f32.mrb[4].mxu1  ;;  %v730_v33 = vpop.f32.mrb[4].mxu0  ;;  %v1206_v41 = vadd.f32 %v1180_v23, %v1178_v27  ;;  %v819_v0 = vadd.f32 %v793_v37, %v791_v31 }
 0x249   : > { %v6067_v34 = vadd.f32 %v1118_v30, %v6014_v3  ;;  %v1120_v35 = vpop.f32.mrb[5].mxu1  ;;  %v6074_v38 = vadd.f32 %v730_v33, %v6011_v2  ;;  %v732_v39 = vpop.f32.mrb[5].mxu0 }
 0x24a   : > { %v6077_v42 = vadd.f32 %v1120_v35, %v6017_v4  ;;  %v1122_v43 = vpop.f32.mrb[6].mxu1  ;;  %v734_v45 = vpop.f32.mrb[6].mxu0  ;;  %v6086_v50 = vadd.f32 %v732_v39, %v6020_v7 }
 0x24b   : > { %v1150_v46 = vadd.f32 %v1149_v28, %v6067_v34  ;;  %v1181_v47 = vmul.f32 %v6067_v34, %v6067_v34  ;;  %v6083_v48 = vadd.f32 %v1122_v43, %v6014_v3  ;;  %v1124_v49 = vpop.f32.mrb[7].mxu1  ;;  %v736_v51 = vpop.f32.mrb[7].mxu0  ;;  %v794_v55 = vmul.f32 %v6074_v38, %v6074_v38 }
 0x24c   : > { %v1163_v52 = vadd.f32 %v1162_v29, %v6077_v42  ;;  %v1182_v53 = vmul.f32 %v6077_v42, %v6077_v42  ;;  %v6092_v54 = vadd.f32 %v1124_v49, %v6017_v4  ;;  %v762_v58 = vadd.f32 %v761_v32, %v6074_v38 }
 0x24d   : > { %v1194_v56 = vadd.f32 %v1193_v40, %v1181_v47  ;;  %v1183_v57 = vmul.f32 %v6083_v48, %v6083_v48  ;;  %v795_v1 = vmul.f32 %v6086_v50, %v6086_v50  ;;  %v6104_v5 = vadd.f32 %v734_v45, %v6011_v2 }
 0x24e   : > { %v1207_v59 = vadd.f32 %v1206_v41, %v1182_v53  ;;  %v1184_v60 = vmul.f32 %v6092_v54, %v6092_v54  ;;  %v6107_v6 = vadd.f32 %v736_v51, %v6020_v7  ;;  %v1151_v8 = vadd.f32 %v1150_v46, %v6083_v48 }
 0x24f   : > { %v1164_v9 = vadd.f32 %v1163_v52, %v6092_v54  ;;  %v807_v10 = vadd.f32 %v806_v44, %v794_v55  ;;  %v775_v16 = vadd.f32 %v774_v36, %v6086_v50  ;;  %v1195_v22 = vadd.f32 %v1194_v56, %v1183_v57 }
 0x250   : > { %v1128_v12 = vpop.f32.mrb[8].mxu1  ;;  %v740_v18 = vpop.f32.mrb[8].mxu0  ;;  %v763_v25 = vadd.f32 %v762_v58, %v6104_v5  ;;  %v796_v26 = vmul.f32 %v6104_v5, %v6104_v5  ;;  %v1208_v28 = vadd.f32 %v1207_v59, %v1184_v60  ;;  %v820_v29 = vadd.f32 %v819_v0, %v795_v1 }
 0x251   : > { %v6113_v23 = vadd.f32 %v1128_v12, %v6014_v3  ;;  %v1130_v24 = vpop.f32.mrb[9].mxu1  ;;  %v742_v27 = vpop.f32.mrb[9].mxu0  ;;  %v6122_v32 = vadd.f32 %v740_v18, %v6011_v2  ;;  %v797_v39 = vmul.f32 %v6107_v6, %v6107_v6  ;;  %v776_v51 = vadd.f32 %v775_v16, %v6107_v6 }
 0x252   : > { %v6119_v30 = vadd.f32 %v1130_v24, %v6017_v4  ;;  %v1132_v31 = vpop.f32.mrb[10].mxu1  ;;  %v744_v33 = vpop.f32.mrb[10].mxu0  ;;  %v808_v45 = vadd.f32 %v807_v10, %v796_v26  ;;  %v6148_v59 = vadd.f32 %v742_v27, %v6020_v7 }
 0x253   : > { %v1152_v35 = vadd.f32 %v1151_v8, %v6113_v23  ;;  %v1185_v36 = vmul.f32 %v6113_v23, %v6113_v23  ;;  %v6128_v37 = vadd.f32 %v1132_v31, %v6014_v3  ;;  %v1134_v40 = vpop.f32.mrb[11].mxu1  ;;  %v746_v41 = vpop.f32.mrb[11].mxu0  ;;  %v764_v52 = vadd.f32 %v763_v25, %v6122_v32 }
 0x254   : > { %v1165_v43 = vadd.f32 %v1164_v9, %v6119_v30  ;;  %v1186_v44 = vmul.f32 %v6119_v30, %v6119_v30  ;;  %v6136_v46 = vadd.f32 %v1134_v40, %v6017_v4  ;;  %v798_v57 = vmul.f32 %v6122_v32, %v6122_v32 }
 0x255   : > { %v1196_v47 = vadd.f32 %v1195_v22, %v1185_v36  ;;  %v1187_v49 = vmul.f32 %v6128_v37, %v6128_v37  ;;  %v821_v58 = vadd.f32 %v820_v29, %v797_v39  ;;  %v6151_v60 = vadd.f32 %v744_v33, %v6011_v2 }
 0x256   : > { %v1209_v53 = vadd.f32 %v1208_v28, %v1186_v44  ;;  %v1166_v55 = vadd.f32 %v1165_v43, %v6136_v46  ;;  %v1188_v56 = vmul.f32 %v6136_v46, %v6136_v46  ;;  %v6154_v0 = vadd.f32 %v746_v41, %v6020_v7 }
 0x257   : > { %7024 = vst [vmem:[#allocation34_spill] sm:$0xff] %v6151_v60  ;;  %v1153_v1 = vadd.f32 %v1152_v35, %v6128_v37  ;;  %v1197_v8 = vadd.f32 %v1196_v47, %v1187_v49  ;;  %v809_v10 = vadd.f32 %v808_v45, %v798_v57  ;;  %v777_v18 = vadd.f32 %v776_v51, %v6148_v59 }
 0x258   : > { %v1210_v9 = vadd.f32 %v1209_v53, %v1188_v56  ;;  %v750_v12 = vpop.f32.mrb[12].mxu0  ;;  %v1138_v16 = vpop.f32.mrb[12].mxu1  ;;  %v799_v22 = vmul.f32 %v6148_v59, %v6148_v59  ;;  %v765_v24 = vadd.f32 %v764_v52, %v6151_v60  ;;  %v800_v25 = vmul.f32 %v6151_v60, %v6151_v60 }
 0x259   : > { %v752_v26 = vpop.f32.mrb[13].mxu0  ;;  %v1140_v27 = vpop.f32.mrb[13].mxu1  ;;  %v801_v28 = vmul.f32 %v6154_v0, %v6154_v0  ;;  %v6166_v29 = vadd.f32 %v750_v12, %v6011_v2  ;;  %v6169_v31 = vadd.f32 %v1138_v16, %v6014_v3  ;;  %v778_v41 = vadd.f32 %v777_v18, %v6154_v0 }
 0x25a   : > { %v6172_v33 = vadd.f32 %v752_v26, %v6020_v7  ;;  %v754_v35 = vpop.f32.mrb[14].mxu0  ;;  %v1142_v36 = vpop.f32.mrb[14].mxu1  ;;  %v822_v39 = vadd.f32 %v821_v58, %v799_v22  ;;  %v810_v40 = vadd.f32 %v809_v10, %v800_v25  ;;  %v6176_v43 = vadd.f32 %v1140_v27, %v6017_v4 }
 0x25b   : > { %7025 = vst [vmem:[#allocation35_spill] sm:$0xff] %v6166_v29  ;;  %v756_v44 = vpop.f32.mrb[15].mxu0  ;;  %v1144_v45 = vpop.f32.mrb[15].mxu1  ;;  %v766_v47 = vadd.f32 %v765_v24, %v6166_v29  ;;  %v802_v49 = vmul.f32 %v6166_v29, %v6166_v29  ;;  %v1154_v51 = vadd.f32 %v1153_v1, %v6169_v31  ;;  %v1189_v52 = vmul.f32 %v6169_v31, %v6169_v31 }
 0x25c   : > { %7026 = vst [vmem:[#allocation36_spill] sm:$0xff] %v6172_v33  ;;  %v823_v53 = vadd.f32 %v822_v39, %v801_v28  ;;  %v779_v56 = vadd.f32 %v778_v41, %v6172_v33  ;;  %v803_v57 = vmul.f32 %v6172_v33, %v6172_v33  ;;  %v1167_v58 = vadd.f32 %v1166_v55, %v6176_v43 }
 0x25d   : > { %v811_v10 = vadd.f32 %v810_v40, %v802_v49  ;;  %v1198_v12 = vadd.f32 %v1197_v8, %v1189_v52  ;;  %v1190_v16 = vmul.f32 %v6176_v43, %v6176_v43  ;;  %v6191_v18 = vadd.f32 %v754_v35, %v6011_v2 }
 0x25e   : > { %v824_v1 = vadd.f32 %v823_v53, %v803_v57  ;;  %v6194_v22 = vadd.f32 %v1142_v36, %v6014_v3  ;;  %v6197_v24 = vadd.f32 %v756_v44, %v6020_v7  ;;  %v6200_v25 = vadd.f32 %v1144_v45, %v6017_v4 }
 0x25f   : > { %7027 = vst [vmem:[#allocation37_spill] sm:$0xff] %v6191_v18  ;;  %v1211_v26 = vadd.f32 %v1210_v9, %v1190_v16  ;;  %v767_v55 = vadd.f32 %v766_v47, %v6191_v18  ;;  %v804_v8 = vmul.f32 %v6191_v18, %v6191_v18 }
 0x260   : > { %v1155_v27 = vadd.f32 %v1154_v51, %v6194_v22  ;;  %v1191_v2 = vmul.f32 %v6194_v22, %v6194_v22  ;;  %v780_v3 = vadd.f32 %v779_v56, %v6197_v24  ;;  %v805_v7 = vmul.f32 %v6197_v24, %v6197_v24 }
 0x261   : > { %v768_v28 = vrot.slane %v767_v55, 4  ;;  %v812_v35 = vadd.f32 %v811_v10, %v804_v8  ;;  %v1168_v4 = vadd.f32 %v1167_v58, %v6200_v25  ;;  %v1192_v9 = vmul.f32 %v6200_v25, %v6200_v25 }
 0x262   : > { %v1156_v36 = vrot.slane %v1155_v27, 4  ;;  %v1199_v39 = vadd.f32 %v1198_v12, %v1191_v2  ;;  %v781_v40 = vrot.slane %v780_v3, 4  ;;  %v825_v41 = vadd.f32 %v824_v1, %v805_v7 }
 0x263   : > { %v769_v44 = vadd.f32 %v768_v28, %v767_v55  ;;  %v813_v45 = vrot.slane %v812_v35, 4  ;;  %v1169_v47 = vrot.slane %v1168_v4, 4  ;;  %v1212_v49 = vadd.f32 %v1211_v26, %v1192_v9 }
 0x264   : > { %v1157_v51 = vadd.f32 %v1156_v36, %v1155_v27  ;;  %v1200_v52 = vrot.slane %v1199_v39, 4  ;;  %v782_v53 = vadd.f32 %v781_v40, %v780_v3  ;;  %v826_v56 = vrot.slane %v825_v41, 4 }
 0x265   : > { %v770_v57 = vrot.slane %v769_v44, 2  ;;  %v814_v16 = vadd.f32 %v813_v45, %v812_v35  ;;  %v1170_v10 = vadd.f32 %v1169_v47, %v1168_v4  ;;  %v1213_v8 = vrot.slane %v1212_v49, 4 }
 0x266   : > { %v1158_v58 = vrot.slane %v1157_v51, 2  ;;  %v1201_v18 = vadd.f32 %v1200_v52, %v1199_v39  ;;  %v783_v29 = vrot.slane %v782_v53, 2  ;;  %v827_v33 = vadd.f32 %v826_v56, %v825_v41 }
 0x267   : > { %v771_v60 = vadd.f32 %v770_v57, %v769_v44  ;;  %v815_v12 = vrot.slane %v814_v16, 2  ;;  %v1171_v2 = vrot.slane %v1170_v10, 2  ;;  %v1214_v1 = vadd.f32 %v1213_v8, %v1212_v49 }
 0x268   : > { %v1159_v55 = vadd.f32 %v1158_v58, %v1157_v51  ;;  %v1202_v7 = vrot.slane %v1201_v18, 2  ;;  %v784_v28 = vadd.f32 %v783_v29, %v782_v53  ;;  %v828_v26 = vrot.slane %v827_v33, 2 }
 0x269   : > { %v772_v27 = vrot.slane %v771_v60, 1  ;;  %v816_v9 = vadd.f32 %v815_v12, %v814_v16  ;;  %v1172_v3 = vadd.f32 %v1171_v2, %v1170_v10  ;;  %v1215_v36 = vrot.slane %v1214_v1, 2 }
 0x26a   : > { %v1160_v40 = vrot.slane %v1159_v55, 1  ;;  %v1203_v35 = vadd.f32 %v1202_v7, %v1201_v18  ;;  %v785_v4 = vrot.slane %v784_v28, 1  ;;  %v829_v45 = vadd.f32 %v828_v26, %v827_v33 }
 0x26b   : > { %v773_v47 = vadd.f32 %v772_v27, %v771_v60  ;;  %v817_v39 = vrot.slane %v816_v9, 1  ;;  %v1173_v52 = vrot.slane %v1172_v3, 1  ;;  %v1216_v41 = vadd.f32 %v1215_v36, %v1214_v1 }
 0x26c   : > { %v1161_v44 = vadd.f32 %v1160_v40, %v1159_v55  ;;  %v1204_v56 = vrot.slane %v1203_v35, 1  ;;  %v786_v57 = vadd.f32 %v785_v4, %v784_v28  ;;  %v830_v49 = vrot.slane %v829_v45, 1 }
 0x26d   : > { %v788_v51 = vmul.f32 0.015625, %v773_v47  ;;  %v818_v8 = vadd.f32 %v817_v39, %v816_v9  ;;  %v1174_v29 = vadd.f32 %v1173_v52, %v1172_v3  ;;  %v1217_v53 = vrot.slane %v1216_v41, 1 }
 0x26e   : > { %v1175_v58 = vmul.f32 0.015625, %v1161_v44  ;;  %v1205_v16 = vadd.f32 %v1204_v56, %v1203_v35  ;;  %v789_v10 = vmul.f32 0.015625, %v786_v57  ;;  %v831_v12 = vadd.f32 %v830_v49, %v829_v45 }
 0x26f   : > { %v832_v2 = vmul.f32 0.015625, %v818_v8  ;;  %v834_v18 = vmul.f32 %v788_v51, %v788_v51  ;;  %v1176_v7 = vmul.f32 0.015625, %v1174_v29  ;;  %v1218_v33 = vadd.f32 %v1217_v53, %v1216_v41 }
 0x270   : > { %v1219_v60 = vmul.f32 0.015625, %v1205_v16  ;;  %v1221_v26 = vmul.f32 %v1175_v58, %v1175_v58  ;;  %v833_v27 = vmul.f32 0.015625, %v831_v12  ;;  %v835_v1 = vmul.f32 %v789_v10, %v789_v10 }
 0x271   : > { %v836_v55 = vsub.f32 %v832_v2, %v834_v18  ;;  %v1220_v36 = vmul.f32 0.015625, %v1218_v33  ;;  %v1222_v28 = vmul.f32 %v1176_v7, %v1176_v7  ;;  %v5556_v41 = vmov 1966171168  }
 0x272   : > { %v1223_v40 = vsub.f32 %v1219_v60, %v1221_v26  ;;  %v837_v4 = vsub.f32 %v833_v27, %v835_v1  ;;  %v848_v57 = vunpack.c.l.s4 %v5556_v41  ;;  %v759_v60 = vld [vmem:[#allocation15 + $0x2] sm:$0x3]  ;;  %v1147_v1 = vld [vmem:[#allocation15 + $0x8] sm:$0x3] }
 0x273   : > { %v838_v9 = vmax.f32 %v836_v55, 0.0  ;;  %v1224_v3 = vsub.f32 %v1220_v36, %v1222_v28 }
 0x274   : > { %v1225_v47 = vmax.f32 %v1223_v40, 0.0  ;;  %v839_v39 = vmax.f32 %v837_v4, 0.0  ;;  %v849_v49 = vunpack.c.0.s8 %v848_v57 }
 0x275   : > { %v840_v35 = vadd.f32 1e-05, %v838_v9  ;;  %v1226_v52 = vmax.f32 %v1224_v3, 0.0 }
 0x276   : > { %v1227_v45 = vadd.f32 1e-05, %v1225_v47  ;;  %v841_v44 = vadd.f32 1e-05, %v839_v39  ;;  %v6215_v53 = vsub.s32 %v849_v49, %v6002_v61 }
 0x277   : > { %4971 = vrsqrt.f32 %v840_v35  ;;  %v1228_v56 = vadd.f32 1e-05, %v1226_v52 }
 0x278   : > { %4973 = vrsqrt.f32 %v1227_v45 }
 0x279   : > { %4975 = vrsqrt.f32 %v841_v44 }
 0x27a   : > { %4977 = vrsqrt.f32 %v1228_v56 }
 0x281   : > { %v4972_v8 = vpop.eup %4971 }
 0x282   : > { %v4974_v29 = vpop.eup %4973 }
 0x283   : > { %v4976_v16 = vpop.eup %4975 }
 0x284   : > { %v4978_v12 = vpop.eup %4977  ;;  %v846_v2 = vcombine.low %v4972_v8, %v4976_v16 }
 0x285   : > { %v1233_v18 = vcombine.low %v4974_v29, %v4978_v12 }
 0x286   : > { %v853_v33 = vrot.slane %v846_v2, %v6215_v53 }
 0x287   : > { %v1240_v26 = vrot.slane %v1233_v18, %v6215_v53 }
 0x288   : > { %v860_v27 = vrot.slane %v853_v33, %v6215_v53 }
 0x289   : > { %v1247_v55 = vrot.slane %v1240_v26, %v6215_v53 }
 0x28a   : > { %v862_v36 = vmul.f32 %v860_v27, %v759_v60  ;;  %v7030_v27 = vld [vmem:[#allocation35_spill] sm:$0xff] }
 0x28b   : > { %v1249_v28 = vmul.f32 %v1247_v55, %v1147_v1 }
 0x28c   : > { %v867_v40 = vrot.slane %v862_v36, %v6005_v62  ;;  %v871_v4 = vrot.slane %v862_v36, %v6008_v63 }
 0x28d   : > { %v1254_v9 = vrot.slane %v1249_v28, %v6005_v62  ;;  %v1258_v3 = vrot.slane %v1249_v28, %v6008_v63 }
 0x28e   : > { %v874_v47 = vmul.f32 %v867_v40, %v788_v51  ;;  %v875_v39 = vmul.f32 %v871_v4, %v789_v10  ;;  %v6226_v35 = vmul.f32 %v871_v4, %v6197_v24  ;;  %v896_v52 = vmul.f32 %v871_v4, %v6041_v20 }
 0x28f   : > { %v1261_v45 = vmul.f32 %v1254_v9, %v1175_v58  ;;  %v1262_v44 = vmul.f32 %v1258_v3, %v1176_v7  ;;  %v6230_v56 = vmul.f32 %v1258_v3, %v6200_v25  ;;  %v1283_v41 = vmul.f32 %v1258_v3, %v6029_v14 }
 0x290   : > { %v878_v57 = vcombine.low %v874_v47, %v875_v39  ;;  %v1285_v49 = vmul.f32 %v1258_v3, %v6038_v19  ;;  %v1282_v8 = vmul.f32 %v1254_v9, %v6026_v13  ;;  %v1284_v51 = vmul.f32 %v1254_v9, %v6032_v15  ;;  %v760_v19 = vld [vmem:[#allocation15 + $0x4] sm:$0x3] }
 0x291   : > { %v1265_v10 = vcombine.low %v1261_v45, %v1262_v44  ;;  %v1287_v24 = vmul.f32 %v1258_v3, %v6077_v42  ;;  %v1289_v29 = vmul.f32 %v1258_v3, %v6092_v54  ;;  %v1286_v20 = vmul.f32 %v1254_v9, %v6067_v34  ;;  %v1148_v34 = vld [vmem:[#allocation15 + $0xa] sm:$0x3] }
 0x292   : > { %v885_v58 = vrot.slane %v878_v57, %v6215_v53  ;;  %v1288_v25 = vmul.f32 %v1254_v9, %v6083_v48  ;;  %v1291_v14 = vmul.f32 %v1258_v3, %v6119_v30  ;;  %v1293_v7 = vmul.f32 %v1258_v3, %v6136_v46 }
 0x293   : > { %v1272_v13 = vrot.slane %v1265_v10, %v6215_v53  ;;  %v1290_v15 = vmul.f32 %v1254_v9, %v6113_v23  ;;  %v1292_v16 = vmul.f32 %v1254_v9, %v6128_v37  ;;  %v1295_v42 = vmul.f32 %v1258_v3, %v6176_v43 }
 0x294   : > { %v892_v54 = vrot.slane %v885_v58, %v6215_v53  ;;  %v6249_v12 = vmul.f32 %v1254_v9, %v6169_v31  ;;  %v6252_v48 = vmul.f32 %v1254_v9, %v6194_v22  ;;  %v898_v30 = vmul.f32 %v871_v4, %v6044_v21 }
 0x295   : > { %v1279_v46 = vrot.slane %v1272_v13, %v6215_v53  ;;  %v895_v2 = vmul.f32 %v867_v40, %v6023_v11  ;;  %v897_v23 = vmul.f32 %v867_v40, %v6035_v17  ;;  %v6259_v37 = vmul.f32 %v871_v4, %v6086_v50 }
 0x296   : > { %v894_v43 = vsub.f32 %v760_v19, %v892_v54  ;;  %v6262_v18 = vmul.f32 %v871_v4, %v6107_v6  ;;  %v6265_v31 = vmul.f32 %v867_v40, %v6074_v38  ;;  %v6268_v22 = vmul.f32 %v867_v40, %v6104_v5  ;;  %v7028_v38 = vld [vmem:[#allocation34_spill] sm:$0xff]  ;;  %v7029_v5 = vld [vmem:[#allocation36_spill] sm:$0xff] }
 0x297   : > { %v1281_v21 = vsub.f32 %v1148_v34, %v1279_v46  ;;  %v6271_v33 = vmul.f32 %v871_v4, %v6148_v59  ;;  %v6274_v11 = vmul.f32 %v871_v4, %v6154_v0  ;;  %v6277_v17 = vmul.f32 %v867_v40, %v6122_v32  ;;  %v7031_v32 = vld [vmem:[#allocation37_spill] sm:$0xff] }
 0x298   : > { %v6280_v50 = vrot.slane %v894_v43, %v6005_v62  ;;  %v6283_v6 = vrot.slane %v894_v43, %v6008_v63  ;;  %v6286_v60 = vmul.f32 %v867_v40, %v7028_v38  ;;  %v6289_v26 = vmul.f32 %v871_v4, %v7029_v5  ;;  %v4875_v43 = vld [vmem:[#allocation12] ss:$16 sps:$4 sm:$0xff]  }
 0x299   : > { %v1302_v59 = vrot.slane %v1281_v21, %v6005_v62  ;;  %v1306_v0 = vrot.slane %v1281_v21, %v6008_v63  ;;  %v6294_v1 = vmul.f32 %v867_v40, %v7030_v27  ;;  %v6297_v55 = vmul.f32 %v867_v40, %v7031_v32 }
 0x29a   : > { %v6300_v36 = vadd.f32 %v6283_v6, %v896_v52  ;;  %v6303_v28 = vadd.f32 %v6283_v6, %v898_v30  ;;  %v6306_v9 = vadd.f32 %v6280_v50, %v895_v2  ;;  %v6309_v4 = vadd.f32 %v6280_v50, %v897_v23  ;;  %v4878_v23 = vld [vmem:[#allocation12 + $0x8] ss:$16 sps:$4 sm:$0xff]  }
 0x29b   : > { %v1310_v3 = vadd.f32 %v1306_v0, %v1283_v41  ;;  %v1312_v47 = vadd.f32 %v1306_v0, %v1285_v49  ;;  %v1309_v39 = vadd.f32 %v1302_v59, %v1282_v8  ;;  %v1311_v45 = vadd.f32 %v1302_v59, %v1284_v51 }
 0x29c   : > { %v1314_v44 = vadd.f32 %v1306_v0, %v1287_v24  ;;  %v1316_v57 = vadd.f32 %v1306_v0, %v1289_v29  ;;  %v1313_v40 = vadd.f32 %v1302_v59, %v1286_v20  ;;  %v1315_v10 = vadd.f32 %v1302_v59, %v1288_v25  ;;  %v4883_v20 = vld [vmem:[#allocation12 + $0x24] ss:$16 sps:$4 sm:$0xff]   ;;  %v4886_v25 = vld [vmem:[#allocation12 + $0x2c] ss:$16 sps:$4 sm:$0xff]  }
 0x29d   : > { %v1326_v58 = vmax.f32 %v1310_v3, 0.0  ;;  %v1328_v52 = vmax.f32 %v1312_v47, 0.0  ;;  %v1325_v19 = vmax.f32 %v1309_v39, 0.0  ;;  %v1327_v13 = vmax.f32 %v1311_v45, 0.0  ;;  %v4881_v3 = vld [vmem:[#allocation12 + $0x20] ss:$16 sps:$4 sm:$0xff]  }
 0x29e   : > { %v1330_v54 = vmax.f32 %v1314_v44, 0.0  ;;  %v1332_v34 = vmax.f32 %v1316_v57, 0.0  ;;  %v1329_v30 = vmax.f32 %v1313_v40, 0.0  ;;  %v1331_v46 = vmax.f32 %v1315_v10, 0.0  ;;  %v4884_v47 = vld [vmem:[#allocation12 + $0x28] ss:$16 sps:$4 sm:$0xff]  }
 0x29f   : > { %v1414_v2 = vpack.c.bf16 %v1328_v52, %v1326_v58  ;;  %v1413_v21 = vpack.c.bf16 %v1327_v13, %v1325_v19  ;;  %v1318_v41 = vadd.f32 %v1306_v0, %v1291_v14  ;;  %v1320_v49 = vadd.f32 %v1306_v0, %v1293_v7 }
 0x2a0   : > { %v1416_v8 = vpack.c.bf16 %v1332_v34, %v1330_v54  ;;  %v6311_v51 = vpack.c.bf16 %v1331_v46, %v1329_v30  ;;  %v1317_v24 = vadd.f32 %v1302_v59, %v1290_v15  ;;  %v1319_v29 = vadd.f32 %v1302_v59, %v1292_v16  ;;  %v4889_v16 = vld [vmem:[#allocation12 + $0x44] ss:$16 sps:$4 sm:$0xff]   ;;  %v4887_v54 = vld [vmem:[#allocation12 + $0x40] ss:$16 sps:$4 sm:$0xff]   ;;  %v4890_v34 = vld [vmem:[#allocation12 + $0x48] ss:$16 sps:$4 sm:$0xff]  }
 0x2a1   : > { %1837 = vmatprep.mubr.bf16.mxu0 %v1414_v2  ;;  %1910 = vmatprep.mubr.bf16.mxu1 %v1414_v2  ;;  %v1334_v38 = vmax.f32 %v1318_v41, 0.0  ;;  %v1336_v5 = vmax.f32 %v1320_v49, 0.0  ;;  %v1322_v27 = vadd.f32 %v1306_v0, %v1295_v42  ;;  %v1324_v32 = vadd.f32 %v1306_v0, %v6230_v56  ;;  %v4892_v56 = vld [vmem:[#allocation12 + $0x4c] ss:$16 sps:$4 sm:$0xff]  }
 0x2a2   : > { %1838 = vmatmul.mubr.bf16.vlgmr.msra.gmra.mrb[16].mxu0 %v1413_v21  ;;  %1911 = vmatmul.mubr.bf16.vlgmr.msra.gmra.mrb[16].mxu1 %v1413_v21  ;;  %v1333_v14 = vmax.f32 %v1317_v24, 0.0  ;;  %v1335_v7 = vmax.f32 %v1319_v29, 0.0  ;;  %v1321_v39 = vadd.f32 %v1302_v59, %v6249_v12  ;;  %v1323_v15 = vadd.f32 %v1302_v59, %v6252_v48  ;;  %v4893_v24 = vld [vmem:[#allocation12 + $0x60] ss:$16 sps:$4 sm:$0xff]   ;;  %v4896_v29 = vld [vmem:[#allocation12 + $0x68] ss:$16 sps:$4 sm:$0xff]  }
 0x2a3   : > { %2272 = vmatpush1.bf16.msra.mxu0 %v4875_v43  ;;  %2345 = vmatpush1.bf16.msra.mxu1 %v4878_v23  ;;  %v1418_v45 = vpack.c.bf16 %v1336_v5, %v1334_v38  ;;  %v1338_v44 = vmax.f32 %v1322_v27, 0.0  ;;  %v1340_v57 = vmax.f32 %v1324_v32, 0.0  ;;  %v939_v42 = vmax.f32 %v6300_v36, 0.0  ;;  %v4895_v43 = vld [vmem:[#allocation12 + $0x64] ss:$16 sps:$4 sm:$0xff]  }
 0x2a4   : > { %1847 = vmatprep.mubr.bf16.mxu0 %v1416_v8  ;;  %1920 = vmatprep.mubr.bf16.mxu1 %v1416_v8  ;;  %v6317_v0 = vpack.c.bf16 %v1335_v7, %v1333_v14  ;;  %v1337_v40 = vmax.f32 %v1321_v39, 0.0  ;;  %v1339_v10 = vmax.f32 %v1323_v15, 0.0  ;;  %v941_v58 = vmax.f32 %v6303_v28, 0.0  ;;  %v4898_v23 = vld [vmem:[#allocation12 + $0x6c] ss:$16 sps:$4 sm:$0xff]  }
 0x2a5   : > { %2273 = vmatprep.subr.bf16.mxu0 %v4883_v20  ;;  %2346 = vmatprep.subr.bf16.mxu1 %v4886_v25  ;;  %v6320_v12 = vpack.c.bf16 %v1340_v57, %v1338_v44  ;;  %v938_v48 = vmax.f32 %v6306_v9, 0.0  ;;  %v940_v59 = vmax.f32 %v6309_v4, 0.0  ;;  %v927_v36 = vadd.f32 %v6283_v6, %v6259_v37  ;;  %v4904_v38 = vld [vmem:[#allocation12 + $0x8c] ss:$16 sps:$4 sm:$0xff]   ;;  %v4902_v14 = vld [vmem:[#allocation12 + $0x88] ss:$16 sps:$4 sm:$0xff]  }
 0x2a6   : > { %v6326_v52 = vpack.c.bf16 %v1339_v10, %v1337_v40  ;;  %v6328_v19 = vpack.c.bf16 %v941_v58, %v939_v42  ;;  %v929_v13 = vadd.f32 %v6283_v6, %v6262_v18  ;;  %v926_v28 = vadd.f32 %v6280_v50, %v6265_v31  ;;  %v4907_v39 = vld [vmem:[#allocation12 + $0xa4] ss:$16 sps:$4 sm:$0xff]   ;;  %v4910_v15 = vld [vmem:[#allocation12 + $0xac] ss:$16 sps:$4 sm:$0xff]   ;;  %v4911_v44 = vld [vmem:[#allocation12 + $0xc0] ss:$16 sps:$4 sm:$0xff]  }
 0x2a7   : > { %2274 = vmatpush1.bf16.msra.mxu0 %v4881_v3  ;;  %2347 = vmatpush1.bf16.msra.mxu1 %v4884_v47  ;;  %v6334_v9 = vpack.c.bf16 %v940_v59, %v938_v48  ;;  %v943_v4 = vmax.f32 %v927_v36, 0.0  ;;  %v928_v37 = vadd.f32 %v6280_v50, %v6268_v22  ;;  %v931_v30 = vadd.f32 %v6283_v6, %v6271_v33  ;;  %v4914_v57 = vld [vmem:[#allocation12 + $0xc8] ss:$16 sps:$4 sm:$0xff]   ;;  %v4919_v42 = vld [vmem:[#allocation12 + $0xe4] ss:$16 sps:$4 sm:$0xff]  }
 0x2a8   : > { %2275 = vmatprep.subr.bf16.mxu0 %v4889_v16  ;;  %2348 = vmatprep.subr.bf16.mxu1 %v4892_v56  ;;  %v945_v46 = vmax.f32 %v929_v13, 0.0  ;;  %v942_v18 = vmax.f32 %v926_v28, 0.0  ;;  %v933_v31 = vadd.f32 %v6283_v6, %v6274_v11  ;;  %v930_v2 = vadd.f32 %v6280_v50, %v6277_v17  ;;  %v4913_v16 = vld [vmem:[#allocation12 + $0xc4] ss:$16 sps:$4 sm:$0xff]   ;;  %v4922_v56 = vld [vmem:[#allocation12 + $0xec] ss:$16 sps:$4 sm:$0xff]  }
 0x2a9   : > { %v944_v21 = vmax.f32 %v928_v37, 0.0  ;;  %v947_v41 = vmax.f32 %v931_v30, 0.0  ;;  %v932_v22 = vadd.f32 %v6280_v50, %v6286_v60  ;;  %v935_v33 = vadd.f32 %v6283_v6, %v6289_v26  ;;  %v4920_v40 = vld [vmem:[#allocation12 + $0xe8] ss:$16 sps:$4 sm:$0xff]   ;;  %v4925_v10 = vld [vmem:[#allocation12 + $0x104] ss:$16 sps:$4 sm:$0xff]  }
 0x2aa   : > { %1848 = vmatmul.mubr.bf16.gmra.mrb[20].mxu0 %v6311_v51  ;;  %1921 = vmatmul.mubr.bf16.gmra.mrb[20].mxu1 %v6311_v51  ;;  %v6350_v49 = vpack.c.bf16 %v945_v46, %v943_v4  ;;  %v949_v11 = vmax.f32 %v933_v31, 0.0  ;;  %v946_v8 = vmax.f32 %v930_v2, 0.0  ;;  %v937_v17 = vadd.f32 %v6283_v6, %v6226_v35  ;;  %v4901_v51 = vld [vmem:[#allocation12 + $0x84] ss:$16 sps:$4 sm:$0xff]   ;;  %v4928_v58 = vld [vmem:[#allocation12 + $0x10c] ss:$16 sps:$4 sm:$0xff]  }
 0x2ab   : > { %2276 = vmatpush1.bf16.msra.mxu0 %v4887_v54  ;;  %2349 = vmatpush1.bf16.msra.mxu1 %v4890_v34  ;;  %v6354_v20 = vpack.c.bf16 %v944_v21, %v942_v18  ;;  %v948_v60 = vmax.f32 %v932_v22, 0.0  ;;  %v951_v25 = vmax.f32 %v935_v33, 0.0  ;;  %v934_v26 = vadd.f32 %v6280_v50, %v6294_v1  ;;  %v4899_v1 = vld [vmem:[#allocation12 + $0x80] ss:$16 sps:$4 sm:$0xff]   ;;  %v4926_v48 = vld [vmem:[#allocation12 + $0x108] ss:$16 sps:$4 sm:$0xff]  }
 0x2ac   : > { %1857 = vmatprep.mubr.bf16.mxu0 %v1418_v45  ;;  %1930 = vmatprep.mubr.bf16.mxu1 %v1418_v45  ;;  %v6358_v5 = vpack.c.bf16 %v949_v11, %v947_v41  ;;  %v953_v27 = vmax.f32 %v937_v17, 0.0  ;;  %v936_v35 = vadd.f32 %v6280_v50, %v6297_v55  ;;  %v4905_v50 = vld [vmem:[#allocation12 + $0xa0] ss:$16 sps:$4 sm:$0xff]   ;;  %v4908_v55 = vld [vmem:[#allocation12 + $0xa8] ss:$16 sps:$4 sm:$0xff]  }
 0x2ad   : > { %2277 = vmatprep.subr.bf16.mxu0 %v4895_v43  ;;  %2350 = vmatprep.subr.bf16.mxu1 %v4898_v23  ;;  %v6362_v6 = vpack.c.bf16 %v948_v60, %v946_v8  ;;  %v950_v32 = vmax.f32 %v934_v26, 0.0  ;;  %v4916_v45 = vld [vmem:[#allocation12 + $0xcc] ss:$16 sps:$4 sm:$0xff]   ;;  %v4931_v59 = vld [vmem:[#allocation12 + $0x124] ss:$16 sps:$4 sm:$0xff]  }
 0x2ae   : > { %v6364_v3 = vpack.c.bf16 %v953_v27, %v951_v25  ;;  %v952_v47 = vmax.f32 %v936_v35, 0.0  ;;  %v4934_v36 = vld [vmem:[#allocation12 + $0x12c] ss:$16 sps:$4 sm:$0xff]   ;;  %v4932_v13 = vld [vmem:[#allocation12 + $0x128] ss:$16 sps:$4 sm:$0xff]  }
 0x2af   : > { %2278 = vmatpush1.bf16.msra.mxu0 %v4893_v24  ;;  %2351 = vmatpush1.bf16.msra.mxu1 %v4896_v29  ;;  %v4937_v28 = vld [vmem:[#allocation12 + $0x144] ss:$16 sps:$4 sm:$0xff]   ;;  %v4935_v54 = vld [vmem:[#allocation12 + $0x140] ss:$16 sps:$4 sm:$0xff]   ;;  %v4938_v34 = vld [vmem:[#allocation12 + $0x148] ss:$16 sps:$4 sm:$0xff]  }
 0x2b0   : > { %2279 = vmatprep.subr.bf16.mxu0 %v4901_v51  ;;  %2352 = vmatprep.subr.bf16.mxu1 %v4904_v38  ;;  %v6366_v7 = vpack.c.bf16 %v952_v47, %v950_v32  ;;  %v4943_v4 = vld [vmem:[#allocation12 + $0x164] ss:$16 sps:$4 sm:$0xff]   ;;  %v4946_v37 = vld [vmem:[#allocation12 + $0x16c] ss:$16 sps:$4 sm:$0xff]   ;;  %v4941_v30 = vld [vmem:[#allocation12 + $0x160] ss:$16 sps:$4 sm:$0xff]  }
 0x2b1   : > { %v4944_v46 = vld [vmem:[#allocation12 + $0x168] ss:$16 sps:$4 sm:$0xff]   ;;  %v4949_v18 = vld [vmem:[#allocation12 + $0x184] ss:$16 sps:$4 sm:$0xff]   ;;  %v4952_v31 = vld [vmem:[#allocation12 + $0x18c] ss:$16 sps:$4 sm:$0xff]  }
 0x2b2   : > { %1858 = vmatmul.mubr.bf16.gmra.mrb[24].mxu0 %v6317_v0  ;;  %1931 = vmatmul.mubr.bf16.gmra.mrb[24].mxu1 %v6317_v0  ;;  %v4917_v0 = vld [vmem:[#allocation12 + $0xe0] ss:$16 sps:$4 sm:$0xff]   ;;  %v4950_v43 = vld [vmem:[#allocation12 + $0x188] ss:$16 sps:$4 sm:$0xff]   ;;  %v4955_v23 = vld [vmem:[#allocation12 + $0x1a4] ss:$16 sps:$4 sm:$0xff]  }
 0x2b3   : > { %2280 = vmatpush1.bf16.msra.mxu0 %v4899_v1  ;;  %2353 = vmatpush1.bf16.msra.mxu1 %v4902_v14  ;;  %v4947_v2 = vld [vmem:[#allocation12 + $0x180] ss:$16 sps:$4 sm:$0xff]   ;;  %v4958_v21 = vld [vmem:[#allocation12 + $0x1ac] ss:$16 sps:$4 sm:$0xff]   ;;  %v4956_v22 = vld [vmem:[#allocation12 + $0x1a8] ss:$16 sps:$4 sm:$0xff]  }
 0x2b4   : > { %1867 = vmatprep.mubr.bf16.mxu0 %v6320_v12  ;;  %1940 = vmatprep.mubr.bf16.mxu1 %v6320_v12  ;;  %v4923_v12 = vld [vmem:[#allocation12 + $0x100] ss:$16 sps:$4 sm:$0xff]   ;;  %v4961_v33 = vld [vmem:[#allocation12 + $0x1c4] ss:$16 sps:$4 sm:$0xff]   ;;  %v4964_v11 = vld [vmem:[#allocation12 + $0x1cc] ss:$16 sps:$4 sm:$0xff]  }
 0x2b5   : > { %2281 = vmatprep.subr.bf16.mxu0 %v4907_v39  ;;  %2354 = vmatprep.subr.bf16.mxu1 %v4910_v15  ;;  %v4953_v41 = vld [vmem:[#allocation12 + $0x1a0] ss:$16 sps:$4 sm:$0xff]   ;;  %v4962_v17 = vld [vmem:[#allocation12 + $0x1c8] ss:$16 sps:$4 sm:$0xff]   ;;  %v4967_v24 = vld [vmem:[#allocation12 + $0x1e4] ss:$16 sps:$4 sm:$0xff]  }
 0x2b6   : > { %v4959_v8 = vld [vmem:[#allocation12 + $0x1c0] ss:$16 sps:$4 sm:$0xff]   ;;  %v4970_v29 = vld [vmem:[#allocation12 + $0x1ec] ss:$16 sps:$4 sm:$0xff]   ;;  %v4968_v25 = vld [vmem:[#allocation12 + $0x1e8] ss:$16 sps:$4 sm:$0xff]  }
 0x2b7   : > { %2282 = vmatpush1.bf16.msra.mxu0 %v4905_v50  ;;  %2355 = vmatpush1.bf16.msra.mxu1 %v4908_v55  ;;  %v4965_v60 = vld [vmem:[#allocation12 + $0x1e0] ss:$16 sps:$4 sm:$0xff]  }
 0x2b8   : > { %2283 = vmatprep.subr.bf16.mxu0 %v4913_v16  ;;  %2356 = vmatprep.subr.bf16.mxu1 %v4916_v45 }
 0x2ba   : > { %1868 = vmatmul.mubr.bf16.gmra.mrb[28].mxu0 %v6326_v52  ;;  %1941 = vmatmul.mubr.bf16.gmra.mrb[28].mxu1 %v6326_v52  ;;  %v4929_v52 = vld [vmem:[#allocation12 + $0x120] ss:$16 sps:$4 sm:$0xff]  }
 0x2bb   : > { %2284 = vmatpush1.bf16.msra.mxu0 %v4911_v44  ;;  %2357 = vmatpush1.bf16.msra.mxu1 %v4914_v57 }
 0x2bc   : > { %2303 = vmatprep.mubr.bf16.mxu0 %v6328_v19  ;;  %2376 = vmatprep.mubr.bf16.mxu1 %v6328_v19  ;;  %v4940_v19 = vld [vmem:[#allocation12 + $0x14c] ss:$16 sps:$4 sm:$0xff]  }
 0x2bd   : > { %2285 = vmatprep.subr.bf16.mxu0 %v4919_v42  ;;  %2358 = vmatprep.subr.bf16.mxu1 %v4922_v56 }
 0x2bf   : > { %2286 = vmatpush1.bf16.msra.mxu0 %v4917_v0  ;;  %2359 = vmatpush1.bf16.msra.mxu1 %v4920_v40 }
 0x2c0   : > { %2287 = vmatprep.subr.bf16.mxu0 %v4925_v10  ;;  %2360 = vmatprep.subr.bf16.mxu1 %v4928_v58 }
 0x2c3   : > { %2288 = vmatpush1.bf16.msra.mxu0 %v4923_v12  ;;  %2361 = vmatpush1.bf16.msra.mxu1 %v4926_v48 }
 0x2c4   : > { %2289 = vmatprep.subr.bf16.mxu0 %v4931_v59  ;;  %2362 = vmatprep.subr.bf16.mxu1 %v4934_v36 }
 0x2c7   : > { %2290 = vmatpush1.bf16.msra.mxu0 %v4929_v52  ;;  %2363 = vmatpush1.bf16.msra.mxu1 %v4932_v13 }
 0x2c8   : > { %2291 = vmatprep.subr.bf16.mxu0 %v4937_v28  ;;  %2364 = vmatprep.subr.bf16.mxu1 %v4940_v19 }
 0x2cb   : > { %2292 = vmatpush1.bf16.msra.mxu0 %v4935_v54  ;;  %2365 = vmatpush1.bf16.msra.mxu1 %v4938_v34 }
 0x2cc   : > { %2293 = vmatprep.subr.bf16.mxu0 %v4943_v4  ;;  %2366 = vmatprep.subr.bf16.mxu1 %v4946_v37 }
 0x2cf   : > { %2294 = vmatpush1.bf16.msra.mxu0 %v4941_v30  ;;  %2367 = vmatpush1.bf16.msra.mxu1 %v4944_v46 }
 0x2d0   : > { %2295 = vmatprep.subr.bf16.mxu0 %v4949_v18  ;;  %2368 = vmatprep.subr.bf16.mxu1 %v4952_v31 }
 0x2d3   : > { %2296 = vmatpush1.bf16.msra.mxu0 %v4947_v2  ;;  %2369 = vmatpush1.bf16.msra.mxu1 %v4950_v43 }
 0x2d4   : > { %2297 = vmatprep.subr.bf16.mxu0 %v4955_v23  ;;  %2370 = vmatprep.subr.bf16.mxu1 %v4958_v21 }
 0x2d7   : > { %2298 = vmatpush1.bf16.msra.mxu0 %v4953_v41  ;;  %2371 = vmatpush1.bf16.msra.mxu1 %v4956_v22 }
 0x2d8   : > { %2299 = vmatprep.subr.bf16.mxu0 %v4961_v33  ;;  %2372 = vmatprep.subr.bf16.mxu1 %v4964_v11 }
 0x2db   : > { %2300 = vmatpush1.bf16.msra.mxu0 %v4959_v8  ;;  %2373 = vmatpush1.bf16.msra.mxu1 %v4962_v17 }
 0x2dc   : > { %2301 = vmatprep.subr.bf16.mxu0 %v4967_v24  ;;  %2374 = vmatprep.subr.bf16.mxu1 %v4970_v29 }
 0x2df   : > { %2302 = vmatpush1.bf16.msra.mxu0 %v4965_v60  ;;  %2375 = vmatpush1.bf16.msra.mxu1 %v4968_v25 }
 0x2e2   : > { %2304 = vmatmul.mubr.bf16.vlgmr.msra.gmra.mrb[16].mxu0 %v6334_v9  ;;  %2377 = vmatmul.mubr.bf16.vlgmr.msra.gmra.mrb[16].mxu1 %v6334_v9  ;;  %v6391_v9 = vsub.s32 2, %v6002_v61 }
 0x2e3   : > { %2313 = vmatprep.mubr.bf16.mxu0 %v6350_v49  ;;  %2386 = vmatprep.mubr.bf16.mxu1 %v6350_v49  ;;  %v2417_v49 = vld [vmem:[#allocation15 + $0xc] sm:$0xf] }
 0x2e4   : > { %v6397_v26 = vrot.slane %v2417_v49, %v6005_v62  ;;  %v6400_v51 = vrot.slane %v2417_v49, %v6391_v9  ;;  %v6403_v38 = vrot.slane %v2417_v49, %v6008_v63 }
 0x2ea   : > { %2314 = vmatmul.mubr.bf16.gmra.mrb[20].mxu0 %v6354_v20  ;;  %2387 = vmatmul.mubr.bf16.gmra.mrb[20].mxu1 %v6354_v20  ;;  %v6394_v20 = vsub.s32 3, %v6002_v61 }
 0x2eb   : > { %2323 = vmatprep.mubr.bf16.mxu0 %v6358_v5  ;;  %2396 = vmatprep.mubr.bf16.mxu1 %v6358_v5 }
 0x2ec   : > { %v6406_v5 = vrot.slane %v2417_v49, %v6394_v20 }
 0x2f2   : > { %2324 = vmatmul.mubr.bf16.gmra.mrb[24].mxu0 %v6362_v6  ;;  %2397 = vmatmul.mubr.bf16.gmra.mrb[24].mxu1 %v6362_v6 }
 0x2f3   : > { %2333 = vmatprep.mubr.bf16.mxu0 %v6364_v3  ;;  %2406 = vmatprep.mubr.bf16.mxu1 %v6364_v3 }
 0x2fa   : > { %2334 = vmatmul.mubr.bf16.gmra.mrb[28].mxu0 %v6366_v7  ;;  %2407 = vmatmul.mubr.bf16.gmra.mrb[28].mxu1 %v6366_v7 }
 0x3b5   : > { %v2305_v27 = vpop.f32.mrb[16].mxu0  ;;  %v2378_v35 = vpop.f32.mrb[16].mxu1 }
 0x3b6   : > { %v2307_v6 = vpop.f32.mrb[17].mxu0  ;;  %v2380_v32 = vpop.f32.mrb[17].mxu1  ;;  %v6409_v3 = vadd.f32 %v6397_v26, %v2305_v27  ;;  %v6412_v61 = vadd.f32 %v6400_v51, %v2378_v35 }
 0x3b7   : > { %v2309_v47 = vpop.f32.mrb[18].mxu0  ;;  %v2382_v1 = vpop.f32.mrb[18].mxu1  ;;  %v6415_v14 = vadd.f32 %v6403_v38, %v2307_v6  ;;  %v6418_v7 = vadd.f32 %v6406_v5, %v2380_v32 }
 0x3b8   : > { %v6421_v39 = vadd.f32 %v6397_v26, %v2309_v47  ;;  %v6424_v15 = vadd.f32 %v6400_v51, %v2382_v1  ;;  %v2311_v50 = vpop.f32.mrb[19].mxu0  ;;  %v2384_v55 = vpop.f32.mrb[19].mxu1  ;;  %v2529_v0 = vmul.f32 %v6409_v3, %v6409_v3  ;;  %v2531_v40 = vmul.f32 %v6412_v61, %v6412_v61 }
 0x3b9   : > { %v6427_v16 = vadd.f32 %v6403_v38, %v2311_v50  ;;  %v6430_v45 = vadd.f32 %v6406_v5, %v2384_v55  ;;  %v2530_v10 = vmul.f32 %v6415_v14, %v6415_v14  ;;  %v2532_v58 = vmul.f32 %v6418_v7, %v6418_v7 }
 0x3ba   : > { %v2533_v44 = vmul.f32 %v6421_v39, %v6421_v39  ;;  %v2535_v57 = vmul.f32 %v6424_v15, %v6424_v15  ;;  %v2473_v12 = vadd.f32 %v6421_v39, %v6409_v3  ;;  %v2499_v48 = vadd.f32 %v6424_v15, %v6412_v61 }
 0x3bb   : > { %v2534_v42 = vmul.f32 %v6427_v16, %v6427_v16  ;;  %v2536_v56 = vmul.f32 %v6430_v45, %v6430_v45  ;;  %v2486_v59 = vadd.f32 %v6427_v16, %v6415_v14  ;;  %v2512_v36 = vadd.f32 %v6430_v45, %v6418_v7 }
 0x3bc   : > { %v2561_v28 = vadd.f32 %v2533_v44, %v2529_v0  ;;  %v2587_v19 = vadd.f32 %v2535_v57, %v2531_v40 }
 0x3bd   : > { %v2315_v52 = vpop.f32.mrb[20].mxu0  ;;  %v2388_v13 = vpop.f32.mrb[20].mxu1  ;;  %v2574_v30 = vadd.f32 %v2534_v42, %v2530_v10  ;;  %v2600_v46 = vadd.f32 %v2536_v56, %v2532_v58 }
 0x3be   : > { %v6457_v54 = vadd.f32 %v6397_v26, %v2315_v52  ;;  %v6460_v34 = vadd.f32 %v6400_v51, %v2388_v13  ;;  %v2317_v4 = vpop.f32.mrb[21].mxu0  ;;  %v2390_v37 = vpop.f32.mrb[21].mxu1 }
 0x3bf   : > { %v6463_v18 = vadd.f32 %v6403_v38, %v2317_v4  ;;  %v6466_v31 = vadd.f32 %v6406_v5, %v2390_v37  ;;  %v2319_v2 = vpop.f32.mrb[22].mxu0  ;;  %v2392_v43 = vpop.f32.mrb[22].mxu1 }
 0x3c0   : > { %v2474_v23 = vadd.f32 %v2473_v12, %v6457_v54  ;;  %v2537_v21 = vmul.f32 %v6457_v54, %v6457_v54  ;;  %v2500_v41 = vadd.f32 %v2499_v48, %v6460_v34  ;;  %v2539_v22 = vmul.f32 %v6460_v34, %v6460_v34  ;;  %v2321_v33 = vpop.f32.mrb[23].mxu0  ;;  %v2394_v11 = vpop.f32.mrb[23].mxu1 }
 0x3c1   : > { %v2487_v8 = vadd.f32 %v2486_v59, %v6463_v18  ;;  %v2538_v17 = vmul.f32 %v6463_v18, %v6463_v18  ;;  %v2513_v24 = vadd.f32 %v2512_v36, %v6466_v31  ;;  %v2540_v29 = vmul.f32 %v6466_v31, %v6466_v31 }
 0x3c2   : > { %v2562_v60 = vadd.f32 %v2561_v28, %v2537_v21  ;;  %v2588_v25 = vadd.f32 %v2587_v19, %v2539_v22  ;;  %v6481_v49 = vadd.f32 %v6397_v26, %v2319_v2  ;;  %v6484_v27 = vadd.f32 %v6400_v51, %v2392_v43 }
 0x3c3   : > { %v2575_v35 = vadd.f32 %v2574_v30, %v2538_v17  ;;  %v2601_v6 = vadd.f32 %v2600_v46, %v2540_v29  ;;  %v6487_v32 = vadd.f32 %v6403_v38, %v2321_v33  ;;  %v6490_v47 = vadd.f32 %v6406_v5, %v2394_v11 }
 0x3c4   : > { %v2475_v1 = vadd.f32 %v2474_v23, %v6481_v49  ;;  %v2541_v50 = vmul.f32 %v6481_v49, %v6481_v49  ;;  %v2501_v55 = vadd.f32 %v2500_v41, %v6484_v27  ;;  %v2543_v44 = vmul.f32 %v6484_v27, %v6484_v27 }
 0x3c5   : > { %v2488_v57 = vadd.f32 %v2487_v8, %v6487_v32  ;;  %v2542_v42 = vmul.f32 %v6487_v32, %v6487_v32  ;;  %v2514_v56 = vadd.f32 %v2513_v24, %v6490_v47  ;;  %v2544_v0 = vmul.f32 %v6490_v47, %v6490_v47  ;;  %v2325_v40 = vpop.f32.mrb[24].mxu0  ;;  %v2398_v10 = vpop.f32.mrb[24].mxu1 }
 0x3c6   : > { %v2563_v58 = vadd.f32 %v2562_v60, %v2541_v50  ;;  %v2589_v12 = vadd.f32 %v2588_v25, %v2543_v44  ;;  %v6505_v48 = vadd.f32 %v6397_v26, %v2325_v40  ;;  %v6508_v59 = vadd.f32 %v6400_v51, %v2398_v10  ;;  %v2327_v36 = vpop.f32.mrb[25].mxu0  ;;  %v2400_v52 = vpop.f32.mrb[25].mxu1 }
 0x3c7   : > { %v2576_v13 = vadd.f32 %v2575_v35, %v2542_v42  ;;  %v2602_v28 = vadd.f32 %v2601_v6, %v2544_v0  ;;  %v6511_v19 = vadd.f32 %v6403_v38, %v2327_v36  ;;  %v6514_v4 = vadd.f32 %v6406_v5, %v2400_v52  ;;  %v2329_v37 = vpop.f32.mrb[26].mxu0  ;;  %v2402_v30 = vpop.f32.mrb[26].mxu1 }
 0x3c8   : > { %7032 = vst [vmem:[#allocation34_spill] sm:$0xff] %v6508_v59  ;;  %v2476_v46 = vadd.f32 %v2475_v1, %v6505_v48  ;;  %v2545_v2 = vmul.f32 %v6505_v48, %v6505_v48  ;;  %v2502_v43 = vadd.f32 %v2501_v55, %v6508_v59  ;;  %v2547_v23 = vmul.f32 %v6508_v59, %v6508_v59  ;;  %v2331_v21 = vpop.f32.mrb[27].mxu0  ;;  %v2404_v41 = vpop.f32.mrb[27].mxu1 }
 0x3c9   : > { %7033 = vst [vmem:[#allocation36_spill] sm:$0xff] %v6511_v19  ;;  %7034 = vst [vmem:[#allocation35_spill] sm:$0xff] %v6514_v4  ;;  %v2489_v22 = vadd.f32 %v2488_v57, %v6511_v19  ;;  %v2546_v33 = vmul.f32 %v6511_v19, %v6511_v19  ;;  %v2515_v11 = vadd.f32 %v2514_v56, %v6514_v4 }
 0x3ca   : > { %v2548_v8 = vmul.f32 %v6514_v4, %v6514_v4  ;;  %v2564_v17 = vadd.f32 %v2563_v58, %v2545_v2  ;;  %v2590_v24 = vadd.f32 %v2589_v12, %v2547_v23  ;;  %v6529_v29 = vadd.f32 %v6397_v26, %v2329_v37 }
 0x3cb   : > { %v6532_v60 = vadd.f32 %v6400_v51, %v2402_v30  ;;  %v2577_v25 = vadd.f32 %v2576_v13, %v2546_v33  ;;  %v6535_v6 = vadd.f32 %v6403_v38, %v2331_v21  ;;  %v6538_v1 = vadd.f32 %v6406_v5, %v2404_v41 }
 0x3cc   : > { %7035 = vst [vmem:[#allocation37_spill] sm:$0xff] %v6529_v29  ;;  %v2603_v35 = vadd.f32 %v2602_v28, %v2548_v8  ;;  %v2477_v50 = vadd.f32 %v2476_v46, %v6529_v29  ;;  %v2549_v55 = vmul.f32 %v6529_v29, %v6529_v29 }
 0x3cd   : > { %7036 = vst [vmem:[#allocation38_spill] sm:$0xff] %v6532_v60  ;;  %7037 = vst [vmem:[#allocation39_spill] sm:$0xff] %v6538_v1  ;;  %v2503_v44 = vadd.f32 %v2502_v43, %v6532_v60  ;;  %v2551_v57 = vmul.f32 %v6532_v60, %v6532_v60  ;;  %v2490_v42 = vadd.f32 %v2489_v22, %v6535_v6  ;;  %v2335_v10 = vpop.f32.mrb[28].mxu0  ;;  %v2408_v58 = vpop.f32.mrb[28].mxu1 }
 0x3ce   : > { %v2550_v56 = vmul.f32 %v6535_v6, %v6535_v6  ;;  %v2516_v0 = vadd.f32 %v2515_v11, %v6538_v1  ;;  %v2552_v40 = vmul.f32 %v6538_v1, %v6538_v1  ;;  %v2565_v12 = vadd.f32 %v2564_v17, %v2549_v55  ;;  %v2337_v28 = vpop.f32.mrb[29].mxu0  ;;  %v2410_v37 = vpop.f32.mrb[29].mxu1 }
 0x3cf   : > { %v2591_v36 = vadd.f32 %v2590_v24, %v2551_v57  ;;  %v6553_v52 = vadd.f32 %v6397_v26, %v2335_v10  ;;  %v6556_v13 = vadd.f32 %v6400_v51, %v2408_v58  ;;  %v6559_v2 = vadd.f32 %v6403_v38, %v2337_v28  ;;  %v2339_v23 = vpop.f32.mrb[30].mxu0  ;;  %v2412_v21 = vpop.f32.mrb[30].mxu1 }
 0x3d0   : > { %v2578_v30 = vadd.f32 %v2577_v25, %v2550_v56  ;;  %v2604_v46 = vadd.f32 %v2603_v35, %v2552_v40  ;;  %v6562_v43 = vadd.f32 %v6406_v5, %v2410_v37  ;;  %v2341_v8 = vpop.f32.mrb[31].mxu0  ;;  %v2414_v17 = vpop.f32.mrb[31].mxu1  ;;  %v6577_v56 = vadd.f32 %v6397_v26, %v2339_v23 }
 0x3d1   : > { %v2478_v41 = vadd.f32 %v2477_v50, %v6553_v52  ;;  %v2553_v22 = vmul.f32 %v6553_v52, %v6553_v52  ;;  %v2504_v33 = vadd.f32 %v2503_v44, %v6556_v13  ;;  %v2555_v11 = vmul.f32 %v6556_v13, %v6556_v13 }
 0x3d2   : > { %v2491_v24 = vadd.f32 %v2490_v42, %v6559_v2  ;;  %v2554_v25 = vmul.f32 %v6559_v2, %v6559_v2  ;;  %v2517_v35 = vadd.f32 %v2516_v0, %v6562_v43  ;;  %v2556_v50 = vmul.f32 %v6562_v43, %v6562_v43 }
 0x3d3   : > { %v2566_v55 = vadd.f32 %v2565_v12, %v2553_v22  ;;  %v2592_v57 = vadd.f32 %v2591_v36, %v2555_v11  ;;  %v6580_v44 = vadd.f32 %v6400_v51, %v2412_v21  ;;  %v6583_v42 = vadd.f32 %v6403_v38, %v2341_v8 }
 0x3d4   : > { %v2579_v40 = vadd.f32 %v2578_v30, %v2554_v25  ;;  %v2605_v10 = vadd.f32 %v2604_v46, %v2556_v50  ;;  %v6586_v58 = vadd.f32 %v6406_v5, %v2414_v17  ;;  %v2479_v0 = vadd.f32 %v2478_v41, %v6577_v56 }
 0x3d5   : > { %v2557_v12 = vmul.f32 %v6577_v56, %v6577_v56  ;;  %v2505_v36 = vadd.f32 %v2504_v33, %v6580_v44  ;;  %v2559_v26 = vmul.f32 %v6580_v44, %v6580_v44  ;;  %v2492_v51 = vadd.f32 %v2491_v24, %v6583_v42 }
 0x3d6   : > { %v2558_v28 = vmul.f32 %v6583_v42, %v6583_v42  ;;  %v2518_v38 = vadd.f32 %v2517_v35, %v6586_v58  ;;  %v2560_v5 = vmul.f32 %v6586_v58, %v6586_v58  ;;  %v2480_v37 = vrot.slane %v2479_v0, 4 }
 0x3d7   : > { %v2567_v30 = vadd.f32 %v2566_v55, %v2557_v12  ;;  %v2506_v46 = vrot.slane %v2505_v36, 4  ;;  %v2593_v23 = vadd.f32 %v2592_v57, %v2559_v26  ;;  %v2493_v21 = vrot.slane %v2492_v51, 4 }
 0x3d8   : > { %v2580_v41 = vadd.f32 %v2579_v40, %v2558_v28  ;;  %v2519_v22 = vrot.slane %v2518_v38, 4  ;;  %v2606_v33 = vadd.f32 %v2605_v10, %v2560_v5  ;;  %v2481_v11 = vadd.f32 %v2480_v37, %v2479_v0 }
 0x3d9   : > { %v2568_v8 = vrot.slane %v2567_v30, 4  ;;  %v2507_v17 = vadd.f32 %v2506_v46, %v2505_v36  ;;  %v2594_v24 = vrot.slane %v2593_v23, 4  ;;  %v2494_v25 = vadd.f32 %v2493_v21, %v2492_v51 }
 0x3da   : > { %v2581_v50 = vrot.slane %v2580_v41, 4  ;;  %v2520_v1 = vadd.f32 %v2519_v22, %v2518_v38  ;;  %v2607_v60 = vrot.slane %v2606_v33, 4  ;;  %v2482_v35 = vrot.slane %v2481_v11, 2 }
 0x3db   : > { %v2569_v29 = vadd.f32 %v2568_v8, %v2567_v30  ;;  %v2508_v4 = vrot.slane %v2507_v17, 2  ;;  %v2595_v59 = vadd.f32 %v2594_v24, %v2593_v23  ;;  %v2495_v19 = vrot.slane %v2494_v25, 2 }
 0x3dc   : > { %v2582_v55 = vadd.f32 %v2581_v50, %v2580_v41  ;;  %v2521_v12 = vrot.slane %v2520_v1, 2  ;;  %v2608_v57 = vadd.f32 %v2607_v60, %v2606_v33  ;;  %v2483_v26 = vadd.f32 %v2482_v35, %v2481_v11 }
 0x3dd   : > { %v2570_v40 = vrot.slane %v2569_v29, 2  ;;  %v2509_v28 = vadd.f32 %v2508_v4, %v2507_v17  ;;  %v2596_v10 = vrot.slane %v2595_v59, 2  ;;  %v2496_v0 = vadd.f32 %v2495_v19, %v2494_v25 }
 0x3de   : > { %v2583_v5 = vrot.slane %v2582_v55, 2  ;;  %v2522_v36 = vadd.f32 %v2521_v12, %v2520_v1  ;;  %v2609_v37 = vrot.slane %v2608_v57, 2  ;;  %v2484_v51 = vrot.slane %v2483_v26, 1 }
 0x3df   : > { %v2571_v46 = vadd.f32 %v2570_v40, %v2569_v29  ;;  %v2510_v38 = vrot.slane %v2509_v28, 1  ;;  %v2597_v21 = vadd.f32 %v2596_v10, %v2595_v59  ;;  %v2497_v22 = vrot.slane %v2496_v0, 1 }
 0x3e0   : > { %v2584_v30 = vadd.f32 %v2583_v5, %v2582_v55  ;;  %v2523_v8 = vrot.slane %v2522_v36, 1  ;;  %v2610_v23 = vadd.f32 %v2609_v37, %v2608_v57  ;;  %v2485_v24 = vadd.f32 %v2484_v51, %v2483_v26 }
 0x3e1   : > { %v2572_v41 = vrot.slane %v2571_v46, 1  ;;  %v2511_v50 = vadd.f32 %v2510_v38, %v2509_v28  ;;  %v2598_v60 = vrot.slane %v2597_v21, 1  ;;  %v2498_v33 = vadd.f32 %v2497_v22, %v2496_v0 }
 0x3e2   : > { %v2585_v11 = vrot.slane %v2584_v30, 1  ;;  %v2524_v4 = vadd.f32 %v2523_v8, %v2522_v36  ;;  %v2611_v17 = vrot.slane %v2610_v23, 1  ;;  %v2525_v19 = vmul.f32 0.015625, %v2485_v24 }
 0x3e3   : > { %v2573_v25 = vadd.f32 %v2572_v41, %v2571_v46  ;;  %v2527_v1 = vmul.f32 0.015625, %v2511_v50  ;;  %v2599_v35 = vadd.f32 %v2598_v60, %v2597_v21  ;;  %v2526_v12 = vmul.f32 0.015625, %v2498_v33 }
 0x3e4   : > { %v2586_v29 = vadd.f32 %v2585_v11, %v2584_v30  ;;  %v2528_v40 = vmul.f32 0.015625, %v2524_v4  ;;  %v2612_v59 = vadd.f32 %v2611_v17, %v2610_v23  ;;  %v2617_v55 = vmul.f32 %v2525_v19, %v2525_v19 }
 0x3e5   : > { %v2613_v10 = vmul.f32 0.015625, %v2573_v25  ;;  %v2615_v5 = vmul.f32 0.015625, %v2599_v35  ;;  %v2619_v57 = vmul.f32 %v2527_v1, %v2527_v1  ;;  %v2618_v37 = vmul.f32 %v2526_v12, %v2526_v12 }
 0x3e6   : > { %v2614_v26 = vmul.f32 0.015625, %v2586_v29  ;;  %v2616_v28 = vmul.f32 0.015625, %v2612_v59  ;;  %v2620_v51 = vmul.f32 %v2528_v40, %v2528_v40 }
 0x3e7   : > { %v2621_v0 = vsub.f32 %v2613_v10, %v2617_v55  ;;  %v2623_v38 = vsub.f32 %v2615_v5, %v2619_v57  ;;  %v2471_v10 = vld [vmem:[#allocation15 + $0x10] sm:$0xf] }
 0x3e8   : > { %v2622_v36 = vsub.f32 %v2614_v26, %v2618_v37  ;;  %v2624_v22 = vsub.f32 %v2616_v28, %v2620_v51 }
 0x3e9   : > { %v2625_v8 = vmax.f32 %v2621_v0, 0.0  ;;  %v2627_v46 = vmax.f32 %v2623_v38, 0.0 }
 0x3ea   : > { %v2626_v24 = vmax.f32 %v2622_v36, 0.0  ;;  %v2628_v21 = vmax.f32 %v2624_v22, 0.0 }
 0x3eb   : > { %v2629_v41 = vadd.f32 1e-05, %v2625_v8  ;;  %v2631_v30 = vadd.f32 1e-05, %v2627_v46 }
 0x3ec   : > { %v2630_v50 = vadd.f32 1e-05, %v2626_v24  ;;  %v2632_v23 = vadd.f32 1e-05, %v2628_v21 }
 0x3ed   : > { %4979 = vrsqrt.f32 %v2629_v41 }
 0x3ee   : > { %4981 = vrsqrt.f32 %v2631_v30 }
 0x3ef   : > { %4983 = vrsqrt.f32 %v2630_v50 }
 0x3f0   : > { %4985 = vrsqrt.f32 %v2632_v23 }
 0x3f7   : > { %v4980_v60 = vpop.eup %4979 }
 0x3f8   : > { %v4982_v33 = vpop.eup %4981 }
 0x3f9   : > { %v4984_v11 = vpop.eup %4983 }
 0x3fa   : > { %v4986_v4 = vpop.eup %4985  ;;  %v2641_v17 = vcombine.low %v4980_v60, %v4984_v11 }
 0x3fb   : > { %v2642_v25 = vcombine.low %v4982_v33, %v4986_v4  ;;  %v2472_v33 = vld [vmem:[#allocation15 + $0x14] sm:$0xf] }
 0x3fc   : > { %v2649_v35 = vrot.slane %v2641_v17, %v6215_v53 }
 0x3fd   : > { %v2656_v29 = vrot.slane %v2642_v25, %v6215_v53 }
 0x3ff   : > { %v2657_v59 = vcombine.low %v2649_v35, %v2656_v29  ;;  %v7040_v35 = vld [vmem:[#allocation35_spill] sm:$0xff]  ;;  %v7041_v29 = vld [vmem:[#allocation37_spill] sm:$0xff] }
 0x401   : > { %v2664_v55 = vrot.slane %v2657_v59, %v6215_v53  ;;  %v7042_v59 = vld [vmem:[#allocation38_spill] sm:$0xff] }
 0x403   : > { %v2666_v5 = vmul.f32 %v2664_v55, %v2471_v10  ;;  %v7043_v10 = vld [vmem:[#allocation39_spill] sm:$0xff] }
 0x405   : > { %v2671_v57 = vrot.slane %v2666_v5, %v6005_v62  ;;  %v2675_v26 = vrot.slane %v2666_v5, %v6008_v63  ;;  %v2679_v37 = vrot.slane %v2666_v5, %v6391_v9  ;;  %v2683_v28 = vrot.slane %v2666_v5, %v6394_v20 }
 0x407   : > { %v2688_v51 = vmul.f32 %v2671_v57, %v2525_v19  ;;  %v2689_v0 = vmul.f32 %v2675_v26, %v2526_v12  ;;  %v2690_v38 = vmul.f32 %v2679_v37, %v2527_v1  ;;  %v2691_v36 = vmul.f32 %v2683_v28, %v2528_v40 }
 0x408   : > { %v2722_v46 = vmul.f32 %v2671_v57, %v6409_v3  ;;  %v2723_v41 = vmul.f32 %v2675_v26, %v6415_v14  ;;  %v2724_v30 = vmul.f32 %v2679_v37, %v6412_v61  ;;  %v2725_v50 = vmul.f32 %v2683_v28, %v6418_v7 }
 0x409   : > { %v2696_v22 = vcombine.low %v2688_v51, %v2689_v0  ;;  %v2697_v8 = vcombine.low %v2690_v38, %v2691_v36  ;;  %v2726_v23 = vmul.f32 %v2671_v57, %v6421_v39  ;;  %v2727_v19 = vmul.f32 %v2675_v26, %v6427_v16 }
 0x40a   : > { %v2728_v1 = vmul.f32 %v2679_v37, %v6424_v15  ;;  %v2729_v40 = vmul.f32 %v2683_v28, %v6430_v45  ;;  %v2730_v3 = vmul.f32 %v2671_v57, %v6457_v54  ;;  %v2731_v60 = vmul.f32 %v2675_v26, %v6463_v18 }
 0x40b   : > { %v2704_v24 = vrot.slane %v2696_v22, %v6215_v53  ;;  %v2711_v21 = vrot.slane %v2697_v8, %v6215_v53  ;;  %v2732_v14 = vmul.f32 %v2679_v37, %v6460_v34  ;;  %v2733_v61 = vmul.f32 %v2683_v28, %v6466_v31 }
 0x40c   : > { %v2734_v7 = vmul.f32 %v2671_v57, %v6481_v49  ;;  %v2743_v39 = vmul.f32 %v2675_v26, %v6535_v6  ;;  %v2735_v15 = vmul.f32 %v2675_v26, %v6487_v32  ;;  %v2746_v11 = vmul.f32 %v2671_v57, %v6553_v52 }
 0x40d   : > { %v2712_v12 = vcombine.low %v2704_v24, %v2711_v21  ;;  %v2747_v45 = vmul.f32 %v2675_v26, %v6559_v2  ;;  %v2748_v54 = vmul.f32 %v2679_v37, %v6556_v13  ;;  %v2749_v18 = vmul.f32 %v2683_v28, %v6562_v43  ;;  %v7038_v2 = vld [vmem:[#allocation36_spill] sm:$0xff]  ;;  %v7039_v13 = vld [vmem:[#allocation34_spill] sm:$0xff] }
 0x40e   : > { %v2750_v34 = vmul.f32 %v2671_v57, %v6577_v56  ;;  %v2751_v31 = vmul.f32 %v2675_v26, %v6583_v42  ;;  %v2736_v49 = vmul.f32 %v2679_v37, %v6484_v27  ;;  %v2752_v6 = vmul.f32 %v2679_v37, %v6580_v44 }
 0x40f   : > { %v2719_v16 = vrot.slane %v2712_v12, %v6215_v53  ;;  %v2753_v53 = vmul.f32 %v2683_v28, %v6586_v58  ;;  %v2737_v32 = vmul.f32 %v2683_v28, %v6490_v47  ;;  %v2738_v52 = vmul.f32 %v2671_v57, %v6505_v48 }
 0x410   : > { %v2739_v17 = vmul.f32 %v2675_v26, %v7038_v2  ;;  %v2740_v25 = vmul.f32 %v2679_v37, %v7039_v13  ;;  %v2741_v44 = vmul.f32 %v2683_v28, %v7040_v35  ;;  %v2742_v58 = vmul.f32 %v2671_v57, %v7041_v29 }
 0x411   : > { %v2721_v4 = vsub.f32 %v2472_v33, %v2719_v16  ;;  %v2744_v47 = vmul.f32 %v2679_v37, %v7042_v59  ;;  %v2745_v48 = vmul.f32 %v2683_v28, %v7043_v10 }
 0x413   : > { %v2758_v43 = vrot.slane %v2721_v4, %v6005_v62  ;;  %v2762_v56 = vrot.slane %v2721_v4, %v6008_v63  ;;  %v2766_v42 = vrot.slane %v2721_v4, %v6391_v9  ;;  %v2770_v27 = vrot.slane %v2721_v4, %v6394_v20 }
 0x415   : > { %v2775_v55 = vadd.f32 %v2758_v43, %v2722_v46  ;;  %v2776_v5 = vadd.f32 %v2762_v56, %v2723_v41  ;;  %v2777_v26 = vadd.f32 %v2766_v42, %v2724_v30  ;;  %v2778_v51 = vadd.f32 %v2770_v27, %v2725_v50 }
 0x416   : > { %v2779_v0 = vadd.f32 %v2758_v43, %v2726_v23  ;;  %v2780_v62 = vadd.f32 %v2762_v56, %v2727_v19  ;;  %v2781_v38 = vadd.f32 %v2766_v42, %v2728_v1  ;;  %v2782_v63 = vadd.f32 %v2770_v27, %v2729_v40 }
 0x417   : > { %v2783_v36 = vadd.f32 %v2758_v43, %v2730_v3  ;;  %v2784_v9 = vadd.f32 %v2762_v56, %v2731_v60  ;;  %v2785_v22 = vadd.f32 %v2766_v42, %v2732_v14  ;;  %v2786_v20 = vadd.f32 %v2770_v27, %v2733_v61 }
 0x418   : > { %v2787_v8 = vadd.f32 %v2758_v43, %v2734_v7  ;;  %v2788_v24 = vadd.f32 %v2762_v56, %v2735_v15  ;;  %v2789_v21 = vadd.f32 %v2766_v42, %v2736_v49  ;;  %v2790_v57 = vadd.f32 %v2770_v27, %v2737_v32 }
 0x419   : > { %v2791_v12 = vadd.f32 %v2758_v43, %v2738_v52  ;;  %v2792_v37 = vadd.f32 %v2762_v56, %v2739_v17  ;;  %v2793_v33 = vadd.f32 %v2766_v42, %v2740_v25  ;;  %v2794_v28 = vadd.f32 %v2770_v27, %v2741_v44 }
 0x41a   : > { %v6646_v46 = vadd.f32 %v2758_v43, %v2742_v58  ;;  %v6648_v41 = vadd.f32 %v2762_v56, %v2743_v39  ;;  %v6650_v30 = vadd.f32 %v2766_v42, %v2744_v47  ;;  %v6652_v50 = vadd.f32 %v2770_v27, %v2745_v48 }
 0x41b   : > { %v6654_v23 = vadd.f32 %v2758_v43, %v2746_v11  ;;  %v6656_v19 = vadd.f32 %v2762_v56, %v2747_v45  ;;  %v6658_v1 = vadd.f32 %v2766_v42, %v2748_v54  ;;  %v6660_v40 = vadd.f32 %v2770_v27, %v2749_v18 }
 0x41c   : > { %v6662_v3 = vadd.f32 %v2758_v43, %v2750_v34  ;;  %v6664_v60 = vadd.f32 %v2762_v56, %v2751_v31  ;;  %v6666_v14 = vadd.f32 %v2766_v42, %v2752_v6  ;;  %v6668_v61 = vadd.f32 %v2770_v27, %v2753_v53 }
 0x41d   : > { %v2807_v7 = vmax.f32 %v2775_v55, 0.0  ;;  %v2808_v39 = vmax.f32 %v2776_v5, 0.0  ;;  %v2809_v16 = vmax.f32 %v2777_v26, 0.0  ;;  %v2810_v15 = vmax.f32 %v2778_v51, 0.0 }
 0x41e   : > { %v2811_v11 = vmax.f32 %v2779_v0, 0.0  ;;  %v2812_v4 = vmax.f32 %v2780_v62, 0.0  ;;  %v2813_v45 = vmax.f32 %v2781_v38, 0.0  ;;  %v2814_v49 = vmax.f32 %v2782_v63, 0.0 }
 0x41f   : > { %v2815_v54 = vmax.f32 %v2783_v36, 0.0  ;;  %v2816_v32 = vmax.f32 %v2784_v9, 0.0  ;;  %v2817_v18 = vmax.f32 %v2785_v22, 0.0  ;;  %v2818_v52 = vmax.f32 %v2786_v20, 0.0  ;;  %2839 = vst [vmem:[#allocation2] sm:$0xff] %v2807_v7  ;;  %2840 = vst [vmem:[#allocation2 + $0x8] sm:$0xff] %v2808_v39 }
 0x420   : > { %2841 = vst [vmem:[#allocation2 + $0x10] sm:$0xff] %v2809_v16  ;;  %2842 = vst [vmem:[#allocation2 + $0x18] sm:$0xff] %v2810_v15  ;;  %v2819_v34 = vmax.f32 %v2787_v8, 0.0  ;;  %v2820_v31 = vmax.f32 %v2788_v24, 0.0  ;;  %v2821_v6 = vmax.f32 %v2789_v21, 0.0  ;;  %v2822_v53 = vmax.f32 %v2790_v57, 0.0 }
 0x421   : > { %2843 = vst [vmem:[#allocation2 + $0x20] sm:$0xff] %v2811_v11  ;;  %2844 = vst [vmem:[#allocation2 + $0x28] sm:$0xff] %v2812_v4  ;;  %v2823_v2 = vmax.f32 %v2791_v12, 0.0  ;;  %v2824_v17 = vmax.f32 %v2792_v37, 0.0  ;;  %v2825_v13 = vmax.f32 %v2793_v33, 0.0  ;;  %v2826_v25 = vmax.f32 %v2794_v28, 0.0 }
 0x422   : > { %2845 = vst [vmem:[#allocation2 + $0x30] sm:$0xff] %v2813_v45  ;;  %2846 = vst [vmem:[#allocation2 + $0x38] sm:$0xff] %v2814_v49  ;;  %v2827_v43 = vmax.f32 %v6646_v46, 0.0  ;;  %v2828_v56 = vmax.f32 %v6648_v41, 0.0  ;;  %v2829_v42 = vmax.f32 %v6650_v30, 0.0  ;;  %v2830_v27 = vmax.f32 %v6652_v50, 0.0 }
 0x423   : > { %2847 = vst [vmem:[#allocation2 + $0x40] sm:$0xff] %v2815_v54  ;;  %2848 = vst [vmem:[#allocation2 + $0x48] sm:$0xff] %v2816_v32  ;;  %v2831_v35 = vmax.f32 %v6654_v23, 0.0  ;;  %v2832_v44 = vmax.f32 %v6656_v19, 0.0  ;;  %v2833_v29 = vmax.f32 %v6658_v1, 0.0  ;;  %v2834_v58 = vmax.f32 %v6660_v40, 0.0 }
 0x424   : > { %2849 = vst [vmem:[#allocation2 + $0x50] sm:$0xff] %v2817_v18  ;;  %2850 = vst [vmem:[#allocation2 + $0x58] sm:$0xff] %v2818_v52  ;;  %v2835_v59 = vmax.f32 %v6662_v3, 0.0  ;;  %v2836_v47 = vmax.f32 %v6664_v60, 0.0  ;;  %v2837_v10 = vmax.f32 %v6666_v14, 0.0  ;;  %v2838_v48 = vmax.f32 %v6668_v61, 0.0 }
 0x425   : > { %2851 = vst [vmem:[#allocation2 + $0x60] sm:$0xff] %v2819_v34  ;;  %2852 = vst [vmem:[#allocation2 + $0x68] sm:$0xff] %v2820_v31 }
 0x426   : > { %2853 = vst [vmem:[#allocation2 + $0x70] sm:$0xff] %v2821_v6  ;;  %2854 = vst [vmem:[#allocation2 + $0x78] sm:$0xff] %v2822_v53 }
 0x427   : > { %2855 = vst [vmem:[#allocation2 + $0x80] sm:$0xff] %v2823_v2  ;;  %2856 = vst [vmem:[#allocation2 + $0x88] sm:$0xff] %v2824_v17 }
 0x428   : > { %2857 = vst [vmem:[#allocation2 + $0x90] sm:$0xff] %v2825_v13  ;;  %2858 = vst [vmem:[#allocation2 + $0x98] sm:$0xff] %v2826_v25 }
 0x429   : > { %2859 = vst [vmem:[#allocation2 + $0xa0] sm:$0xff] %v2827_v43  ;;  %2860 = vst [vmem:[#allocation2 + $0xa8] sm:$0xff] %v2828_v56 }
 0x42a   : > { %2861 = vst [vmem:[#allocation2 + $0xb0] sm:$0xff] %v2829_v42  ;;  %2862 = vst [vmem:[#allocation2 + $0xb8] sm:$0xff] %v2830_v27 }
 0x42b   : > { %2863 = vst [vmem:[#allocation2 + $0xc0] sm:$0xff] %v2831_v35  ;;  %2864 = vst [vmem:[#allocation2 + $0xc8] sm:$0xff] %v2832_v44 }
 0x42c   : > { %2865 = vst [vmem:[#allocation2 + $0xd0] sm:$0xff] %v2833_v29  ;;  %2866 = vst [vmem:[#allocation2 + $0xd8] sm:$0xff] %v2834_v58 }
 0x42d   : > { %2867 = vst [vmem:[#allocation2 + $0xe0] sm:$0xff] %v2835_v59  ;;  %2868 = vst [vmem:[#allocation2 + $0xe8] sm:$0xff] %v2836_v47 }
 0x42e   : > { %2869 = vst [vmem:[#allocation2 + $0xf0] sm:$0xff] %v2837_v10  ;;  %2870 = vst [vmem:[#allocation2 + $0xf8] sm:$0xff] %v2838_v48 }
 0x42f PF: > { %v4987_v55 = vld [vmem:[%s5978_s22 + $0x4] ss:$8 sps:$4 sm:$0xff]   ;;  %v4989_v5 = vld [vmem:[%s5978_s22] ss:$8 sps:$4 sm:$0xff]   ;;  %v4990_v26 = vld [vmem:[%s5978_s22 + $0x14] ss:$8 sps:$4 sm:$0xff]  }
 0x430   : > { %3315 = vmatprep.subr.bf16.mxu0 %v4987_v55  ;;  %v4992_v51 = vld [vmem:[%s5978_s22 + $0x10] ss:$8 sps:$4 sm:$0xff]   ;;  %v4993_v0 = vld [vmem:[%s5978_s22 + $0x24] ss:$8 sps:$4 sm:$0xff]   ;;  %v4995_v62 = vld [vmem:[%s5978_s22 + $0x20] ss:$8 sps:$4 sm:$0xff]  }
 0x431   : > { %3316 = vmatpush1.bf16.msra.mxu0 %v4989_v5  ;;  %v4996_v38 = vld [vmem:[%s5978_s22 + $0x34] ss:$8 sps:$4 sm:$0xff]   ;;  %v4998_v63 = vld [vmem:[%s5978_s22 + $0x30] ss:$8 sps:$4 sm:$0xff]   ;;  %v4999_v36 = vld [vmem:[%s5978_s22 + $0x44] ss:$8 sps:$4 sm:$0xff]  }
 0x432   : > { %3317 = vmatprep.subr.bf16.mxu0 %v4990_v26  ;;  %v5001_v9 = vld [vmem:[%s5978_s22 + $0x40] ss:$8 sps:$4 sm:$0xff]   ;;  %v5002_v22 = vld [vmem:[%s5978_s22 + $0x54] ss:$8 sps:$4 sm:$0xff]   ;;  %v5004_v20 = vld [vmem:[%s5978_s22 + $0x50] ss:$8 sps:$4 sm:$0xff]  }
 0x433   : > { %v5005_v8 = vld [vmem:[%s5978_s22 + $0x64] ss:$8 sps:$4 sm:$0xff]   ;;  %v5007_v12 = vld [vmem:[%s5978_s22 + $0x60] ss:$8 sps:$4 sm:$0xff]   ;;  %v5008_v37 = vld [vmem:[%s5978_s22 + $0x74] ss:$8 sps:$4 sm:$0xff]  }
 0x434   : > { %v2872_v24 = vld [vmem:[#allocation2 + $0x8] sm:$0xff]  ;;  %v5013_v46 = vld [vmem:[%s5978_s22 + $0x80] ss:$8 sps:$4 sm:$0xff]   ;;  %p4520_p12 = scmp.ne.s32.totalorder %s5637_s17, 3 }
 0x435   : > { %3318 = vmatpush1.bf16.msra.mxu0 %v4992_v51  ;;  %v2876_v21 = vld [vmem:[#allocation2 + $0x28] sm:$0xff]  ;;  %v5019_v23 = vld [vmem:[%s5978_s22 + $0xa0] ss:$8 sps:$4 sm:$0xff]  }
 0x436   : > { %3319 = vmatprep.subr.bf16.mxu0 %v4993_v0  ;;  %v2904_v57 = vpack.c.bf16 %v2876_v21, %v2872_v24  ;;  %v5010_v33 = vld [vmem:[%s5978_s22 + $0x70] ss:$8 sps:$4 sm:$0xff]   ;;  %v5011_v28 = vld [vmem:[%s5978_s22 + $0x84] ss:$8 sps:$4 sm:$0xff]   ;;  %v5014_v41 = vld [vmem:[%s5978_s22 + $0x94] ss:$8 sps:$4 sm:$0xff]  }
 0x437   : > { %v5016_v30 = vld [vmem:[%s5978_s22 + $0x90] ss:$8 sps:$4 sm:$0xff]   ;;  %v5017_v50 = vld [vmem:[%s5978_s22 + $0xa4] ss:$8 sps:$4 sm:$0xff]   ;;  %v5020_v19 = vld [vmem:[%s5978_s22 + $0xb4] ss:$8 sps:$4 sm:$0xff]  }
 0x438   : > { %3347 = vmatprep.mubr.bf16.mxu0 %v2904_v57  ;;  %v5022_v1 = vld [vmem:[%s5978_s22 + $0xb0] ss:$8 sps:$4 sm:$0xff]   ;;  %v5023_v40 = vld [vmem:[%s5978_s22 + $0xc4] ss:$8 sps:$4 sm:$0xff]   ;;  %v5025_v3 = vld [vmem:[%s5978_s22 + $0xc0] ss:$8 sps:$4 sm:$0xff]  }
 0x439   : > { %3320 = vmatpush1.bf16.msra.mxu0 %v4995_v62  ;;  %v5026_v60 = vld [vmem:[%s5978_s22 + $0xd4] ss:$8 sps:$4 sm:$0xff]   ;;  %v5028_v14 = vld [vmem:[%s5978_s22 + $0xd0] ss:$8 sps:$4 sm:$0xff]   ;;  %v5029_v61 = vld [vmem:[%s5978_s22 + $0xe4] ss:$8 sps:$4 sm:$0xff]  }
 0x43a   : > { %3321 = vmatprep.subr.bf16.mxu0 %v4996_v38  ;;  %v5031_v7 = vld [vmem:[%s5978_s22 + $0xe0] ss:$8 sps:$4 sm:$0xff]   ;;  %v5032_v39 = vld [vmem:[%s5978_s22 + $0xf4] ss:$8 sps:$4 sm:$0xff]   ;;  %v5034_v16 = vld [vmem:[%s5978_s22 + $0xf0] ss:$8 sps:$4 sm:$0xff]  }
 0x43b   : > { %v2871_v15 = vld [vmem:[#allocation2] sm:$0xff]  ;;  %v2880_v45 = vld [vmem:[#allocation2 + $0x48] sm:$0xff]  ;;  %v2874_v0 = vld [vmem:[#allocation2 + $0x18] sm:$0xff] }
 0x43c   : > { %v2875_v11 = vld [vmem:[#allocation2 + $0x20] sm:$0xff]  ;;  %v2884_v49 = vld [vmem:[#allocation2 + $0x68] sm:$0xff]  ;;  %v2878_v62 = vld [vmem:[#allocation2 + $0x38] sm:$0xff] }
 0x43d   : > { %3322 = vmatpush1.bf16.msra.mxu0 %v4998_v63  ;;  %v5037_v4 = vld [vmem:[%s5978_s22 + $0x104] ss:$8 sps:$4 sm:$0xff]   ;;  %v5035_v54 = vld [vmem:[%s5978_s22 + $0x100] ss:$8 sps:$4 sm:$0xff]   ;;  %v2903_v32 = vpack.c.bf16 %v2875_v11, %v2871_v15  ;;  %v2908_v18 = vpack.c.bf16 %v2884_v49, %v2880_v45  ;;  %v5040_v52 = vld [vmem:[%s5978_s22 + $0x114] ss:$8 sps:$4 sm:$0xff]  }
 0x43e   : > { %3323 = vmatprep.subr.bf16.mxu0 %v4999_v36  ;;  %v5038_v34 = vld [vmem:[%s5978_s22 + $0x110] ss:$8 sps:$4 sm:$0xff]   ;;  %v2879_v31 = vld [vmem:[#allocation2 + $0x40] sm:$0xff]  ;;  %v5046_v56 = vld [vmem:[%s5978_s22 + $0x134] ss:$8 sps:$4 sm:$0xff]   ;;  %v2906_v36 = vpack.c.bf16 %v2878_v62, %v2874_v0 }
 0x43f   : > { %v2883_v6 = vld [vmem:[#allocation2 + $0x60] sm:$0xff]  ;;  %v2888_v2 = vld [vmem:[#allocation2 + $0x88] sm:$0xff]  ;;  %v2890_v15 = vld [vmem:[#allocation2 + $0x98] sm:$0xff] }
 0x440   : > { %v5043_v53 = vld [vmem:[%s5978_s22 + $0x124] ss:$8 sps:$4 sm:$0xff]   ;;  %v2907_v13 = vpack.c.bf16 %v2883_v6, %v2879_v31  ;;  %v5041_v25 = vld [vmem:[%s5978_s22 + $0x120] ss:$8 sps:$4 sm:$0xff]   ;;  %v5044_v42 = vld [vmem:[%s5978_s22 + $0x130] ss:$8 sps:$4 sm:$0xff]  }
 0x441   : > { %3324 = vmatpush1.bf16.msra.mxu0 %v5001_v9  ;;  %v2892_v17 = vld [vmem:[#allocation2 + $0xa8] sm:$0xff]  ;;  %v2887_v27 = vld [vmem:[#allocation2 + $0x80] sm:$0xff]  ;;  %v2894_v11 = vld [vmem:[#allocation2 + $0xb8] sm:$0xff] }
 0x442   : > { %3325 = vmatprep.subr.bf16.mxu0 %v5002_v22  ;;  %v2912_v43 = vpack.c.bf16 %v2892_v17, %v2888_v2  ;;  %v2891_v35 = vld [vmem:[#allocation2 + $0xa0] sm:$0xff]  ;;  %v2896_v29 = vld [vmem:[#allocation2 + $0xc8] sm:$0xff]  ;;  %v2914_v45 = vpack.c.bf16 %v2894_v11, %v2890_v15  ;;  %v2889_v49 = vld [vmem:[#allocation2 + $0x90] sm:$0xff] }
 0x443   : > { %v5049_v44 = vld [vmem:[%s5978_s22 + $0x144] ss:$8 sps:$4 sm:$0xff]   ;;  %v2911_v59 = vpack.c.bf16 %v2891_v35, %v2887_v27  ;;  %v5047_v47 = vld [vmem:[%s5978_s22 + $0x140] ss:$8 sps:$4 sm:$0xff]   ;;  %v5052_v48 = vld [vmem:[%s5978_s22 + $0x154] ss:$8 sps:$4 sm:$0xff]  }
 0x444   : > { %v2900_v58 = vld [vmem:[#allocation2 + $0xe8] sm:$0xff]  ;;  %v2895_v5 = vld [vmem:[#allocation2 + $0xc0] sm:$0xff]  ;;  %v2897_v31 = vld [vmem:[#allocation2 + $0xd0] sm:$0xff] }
 0x445   : > { %3326 = vmatpush1.bf16.msra.mxu0 %v5004_v20  ;;  %v2916_v10 = vpack.c.bf16 %v2900_v58, %v2896_v29  ;;  %v5050_v55 = vld [vmem:[%s5978_s22 + $0x150] ss:$8 sps:$4 sm:$0xff]   ;;  %v2899_v26 = vld [vmem:[#allocation2 + $0xe0] sm:$0xff]  ;;  %v5058_v9 = vld [vmem:[%s5978_s22 + $0x174] ss:$8 sps:$4 sm:$0xff]  }
 0x446   : > { %3327 = vmatprep.subr.bf16.mxu0 %v5005_v8  ;;  %v5055_v51 = vld [vmem:[%s5978_s22 + $0x164] ss:$8 sps:$4 sm:$0xff]   ;;  %v2915_v38 = vpack.c.bf16 %v2899_v26, %v2895_v5  ;;  %v5053_v63 = vld [vmem:[%s5978_s22 + $0x160] ss:$8 sps:$4 sm:$0xff]   ;;  %v5056_v22 = vld [vmem:[%s5978_s22 + $0x170] ss:$8 sps:$4 sm:$0xff]  }
 0x447   : > { %v5061_v20 = vld [vmem:[%s5978_s22 + $0x184] ss:$8 sps:$4 sm:$0xff]   ;;  %v5059_v8 = vld [vmem:[%s5978_s22 + $0x180] ss:$8 sps:$4 sm:$0xff]   ;;  %v5064_v24 = vld [vmem:[%s5978_s22 + $0x194] ss:$8 sps:$4 sm:$0xff]  }
 0x448   : > { %v5062_v21 = vld [vmem:[%s5978_s22 + $0x190] ss:$8 sps:$4 sm:$0xff]   ;;  %v5067_v57 = vld [vmem:[%s5978_s22 + $0x1a4] ss:$8 sps:$4 sm:$0xff]   ;;  %v5083_v2 = vld [vmem:[%s5986_s29 + $0x4] ss:$8 sps:$4 sm:$0xff]  }
 0x449   : > { %3328 = vmatpush1.bf16.msra.mxu0 %v5007_v12  ;;  %v5065_v12 = vld [vmem:[%s5978_s22 + $0x1a0] ss:$8 sps:$4 sm:$0xff]   ;;  %v2901_v6 = vld [vmem:[#allocation2 + $0xf0] sm:$0xff]  ;;  %3874 = vmatprep.subr.bf16.mxu1 %v5083_v2  ;;  %v5098_v29 = vld [vmem:[%s5986_s29 + $0x54] ss:$8 sps:$4 sm:$0xff]  }
 0x44a   : > { %3329 = vmatprep.subr.bf16.mxu0 %v5008_v37  ;;  %v5070_v37 = vld [vmem:[%s5978_s22 + $0x1b4] ss:$8 sps:$4 sm:$0xff]   ;;  %v5085_v17 = vld [vmem:[%s5986_s29] ss:$8 sps:$4 sm:$0xff]   ;;  %v5094_v27 = vld [vmem:[%s5986_s29 + $0x30] ss:$8 sps:$4 sm:$0xff]  }
 0x44b   : > { %3875 = vmatpush1.bf16.msra.mxu1 %v5085_v17  ;;  %v5095_v35 = vld [vmem:[%s5986_s29 + $0x44] ss:$8 sps:$4 sm:$0xff]   ;;  %v5100_v58 = vld [vmem:[%s5986_s29 + $0x50] ss:$8 sps:$4 sm:$0xff]   ;;  %v5109_v5 = vld [vmem:[%s5986_s29 + $0x80] ss:$8 sps:$4 sm:$0xff]  }
 0x44c   : > { %v5110_v26 = vld [vmem:[%s5986_s29 + $0x94] ss:$8 sps:$4 sm:$0xff]   ;;  %v5113_v0 = vld [vmem:[%s5986_s29 + $0xa4] ss:$8 sps:$4 sm:$0xff]   ;;  %v5115_v62 = vld [vmem:[%s5986_s29 + $0xa0] ss:$8 sps:$4 sm:$0xff]  }
 0x44d   : > { %3330 = vmatpush1.bf16.msra.mxu0 %v5010_v33  ;;  %v5068_v33 = vld [vmem:[%s5978_s22 + $0x1b0] ss:$8 sps:$4 sm:$0xff]  }
 0x44e   : > { %3331 = vmatprep.subr.bf16.mxu0 %v5011_v28  ;;  %v5073_v28 = vld [vmem:[%s5978_s22 + $0x1c4] ss:$8 sps:$4 sm:$0xff]  }
 0x451   : > { %3332 = vmatpush1.bf16.msra.mxu0 %v5013_v46  ;;  %v5071_v46 = vld [vmem:[%s5978_s22 + $0x1c0] ss:$8 sps:$4 sm:$0xff]  }
 0x452   : > { %3333 = vmatprep.subr.bf16.mxu0 %v5014_v41  ;;  %v5076_v41 = vld [vmem:[%s5978_s22 + $0x1d4] ss:$8 sps:$4 sm:$0xff]  }
 0x455   : > { %3334 = vmatpush1.bf16.msra.mxu0 %v5016_v30  ;;  %v5074_v30 = vld [vmem:[%s5978_s22 + $0x1d0] ss:$8 sps:$4 sm:$0xff]  }
 0x456   : > { %3335 = vmatprep.subr.bf16.mxu0 %v5017_v50  ;;  %v5079_v50 = vld [vmem:[%s5978_s22 + $0x1e4] ss:$8 sps:$4 sm:$0xff]  }
 0x459   : > { %3336 = vmatpush1.bf16.msra.mxu0 %v5019_v23  ;;  %v5077_v23 = vld [vmem:[%s5978_s22 + $0x1e0] ss:$8 sps:$4 sm:$0xff]  }
 0x45a   : > { %3337 = vmatprep.subr.bf16.mxu0 %v5020_v19  ;;  %v5082_v19 = vld [vmem:[%s5978_s22 + $0x1f4] ss:$8 sps:$4 sm:$0xff]  }
 0x45d   : > { %3338 = vmatpush1.bf16.msra.mxu0 %v5022_v1  ;;  %v5080_v1 = vld [vmem:[%s5978_s22 + $0x1f0] ss:$8 sps:$4 sm:$0xff]  }
 0x45e   : > { %3339 = vmatprep.subr.bf16.mxu0 %v5023_v40  ;;  %v2873_v40 = vld [vmem:[#allocation2 + $0x10] sm:$0xff] }
 0x461   : > { %3340 = vmatpush1.bf16.msra.mxu0 %v5025_v3  ;;  %v2877_v3 = vld [vmem:[#allocation2 + $0x30] sm:$0xff] }
 0x462   : > { %3341 = vmatprep.subr.bf16.mxu0 %v5026_v60  ;;  %v2882_v60 = vld [vmem:[#allocation2 + $0x58] sm:$0xff] }
 0x465   : > { %3342 = vmatpush1.bf16.msra.mxu0 %v5028_v14  ;;  %v2886_v14 = vld [vmem:[#allocation2 + $0x78] sm:$0xff] }
 0x466   : > { %3343 = vmatprep.subr.bf16.mxu0 %v5029_v61  ;;  %v2905_v61 = vpack.c.bf16 %v2877_v3, %v2873_v40 }
 0x469   : > { %3344 = vmatpush1.bf16.msra.mxu0 %v5031_v7  ;;  %v2910_v7 = vpack.c.bf16 %v2886_v14, %v2882_v60 }
 0x46a   : > { %3345 = vmatprep.subr.bf16.mxu0 %v5032_v39  ;;  %v2881_v39 = vld [vmem:[#allocation2 + $0x50] sm:$0xff] }
 0x46d   : > { %3346 = vmatpush1.bf16.msra.mxu0 %v5034_v16  ;;  %v2885_v16 = vld [vmem:[#allocation2 + $0x70] sm:$0xff] }
 0x46e   : > { %3388 = vmatprep.subr.bf16.mxu0 %v5037_v4  ;;  %v2909_v4 = vpack.c.bf16 %v2885_v16, %v2881_v39 }
 0x470   : > { %3348 = vmatmul.mubr.bf16.vlgmr.msra.gmra.mrb[0].mxu0 %v2903_v32  ;;  %v2898_v32 = vld [vmem:[#allocation2 + $0xd8] sm:$0xff] }
 0x471   : > { %3389 = vmatpush1.bf16.msra.mxu0 %v5035_v54  ;;  %3357 = vmatprep.mubr.bf16.mxu0 %v2908_v18  ;;  %v2893_v54 = vld [vmem:[#allocation2 + $0xb0] sm:$0xff]  ;;  %v2902_v18 = vld [vmem:[#allocation2 + $0xf8] sm:$0xff] }
 0x472   : > { %3390 = vmatprep.subr.bf16.mxu0 %v5040_v52  ;;  %v2913_v52 = vpack.c.bf16 %v2893_v54, %v2889_v49 }
 0x475   : > { %3391 = vmatpush1.bf16.msra.mxu0 %v5038_v34  ;;  %v2918_v34 = vpack.c.bf16 %v2902_v18, %v2898_v32 }
 0x476   : > { %3392 = vmatprep.subr.bf16.mxu0 %v5043_v53  ;;  %v2917_v53 = vpack.c.bf16 %v2901_v6, %v2897_v31 }
 0x478   : > { %3358 = vmatmul.mubr.bf16.gmra.mrb[4].mxu0 %v2907_v13  ;;  %v5086_v13 = vld [vmem:[%s5986_s29 + $0x14] ss:$8 sps:$4 sm:$0xff]  }
 0x479   : > { %3393 = vmatpush1.bf16.msra.mxu0 %v5041_v25  ;;  %3367 = vmatprep.mubr.bf16.mxu0 %v2912_v43  ;;  %v5088_v25 = vld [vmem:[%s5986_s29 + $0x10] ss:$8 sps:$4 sm:$0xff]   ;;  %v5089_v43 = vld [vmem:[%s5986_s29 + $0x24] ss:$8 sps:$4 sm:$0xff]  }
 0x47a   : > { %3394 = vmatprep.subr.bf16.mxu0 %v5046_v56  ;;  %3876 = vmatprep.subr.bf16.mxu1 %v5086_v13  ;;  %v5091_v56 = vld [vmem:[%s5986_s29 + $0x20] ss:$8 sps:$4 sm:$0xff]  }
 0x47b   : > { %3877 = vmatpush1.bf16.msra.mxu1 %v5088_v25 }
 0x47c   : > { %3878 = vmatprep.subr.bf16.mxu1 %v5089_v43 }
 0x47d   : > { %3395 = vmatpush1.bf16.msra.mxu0 %v5044_v42  ;;  %v5092_v42 = vld [vmem:[%s5986_s29 + $0x34] ss:$8 sps:$4 sm:$0xff]  }
 0x47e   : > { %3396 = vmatprep.subr.bf16.mxu0 %v5049_v44  ;;  %v5097_v44 = vld [vmem:[%s5986_s29 + $0x40] ss:$8 sps:$4 sm:$0xff]  }
 0x47f   : > { %3879 = vmatpush1.bf16.msra.mxu1 %v5091_v56 }
 0x480   : > { %3368 = vmatmul.mubr.bf16.gmra.mrb[8].mxu0 %v2911_v59  ;;  %3880 = vmatprep.subr.bf16.mxu1 %v5092_v42  ;;  %v5101_v59 = vld [vmem:[%s5986_s29 + $0x64] ss:$8 sps:$4 sm:$0xff]  }
 0x481   : > { %3397 = vmatpush1.bf16.msra.mxu0 %v5047_v47  ;;  %3377 = vmatprep.mubr.bf16.mxu0 %v2916_v10  ;;  %v5103_v47 = vld [vmem:[%s5986_s29 + $0x60] ss:$8 sps:$4 sm:$0xff]   ;;  %v5104_v10 = vld [vmem:[%s5986_s29 + $0x74] ss:$8 sps:$4 sm:$0xff]  }
 0x482   : > { %3398 = vmatprep.subr.bf16.mxu0 %v5052_v48  ;;  %v5106_v48 = vld [vmem:[%s5986_s29 + $0x70] ss:$8 sps:$4 sm:$0xff]  }
 0x483   : > { %3881 = vmatpush1.bf16.msra.mxu1 %v5094_v27 }
 0x484   : > { %3882 = vmatprep.subr.bf16.mxu1 %v5095_v35 }
 0x485   : > { %3399 = vmatpush1.bf16.msra.mxu0 %v5050_v55  ;;  %v5107_v55 = vld [vmem:[%s5986_s29 + $0x84] ss:$8 sps:$4 sm:$0xff]  }
 0x486   : > { %3400 = vmatprep.subr.bf16.mxu0 %v5055_v51  ;;  %v5112_v51 = vld [vmem:[%s5986_s29 + $0x90] ss:$8 sps:$4 sm:$0xff]  }
 0x487   : > { %3883 = vmatpush1.bf16.msra.mxu1 %v5097_v44 }
 0x488   : > { %3378 = vmatmul.mubr.bf16.gmra.mrb[12].mxu0 %v2915_v38  ;;  %3884 = vmatprep.subr.bf16.mxu1 %v5098_v29  ;;  %v5116_v38 = vld [vmem:[%s5986_s29 + $0xb4] ss:$8 sps:$4 sm:$0xff]  }
 0x489   : > { %3401 = vmatpush1.bf16.msra.mxu0 %v5053_v63  ;;  %3420 = vmatprep.mubr.bf16.mxu0 %v2906_v36  ;;  %v5118_v63 = vld [vmem:[%s5986_s29 + $0xb0] ss:$8 sps:$4 sm:$0xff]   ;;  %v5119_v36 = vld [vmem:[%s5986_s29 + $0xc4] ss:$8 sps:$4 sm:$0xff]  }
 0x48a   : > { %3402 = vmatprep.subr.bf16.mxu0 %v5058_v9  ;;  %v5121_v9 = vld [vmem:[%s5986_s29 + $0xc0] ss:$8 sps:$4 sm:$0xff]  }
 0x48b   : > { %3885 = vmatpush1.bf16.msra.mxu1 %v5100_v58 }
 0x48c   : > { %3886 = vmatprep.subr.bf16.mxu1 %v5101_v59 }
 0x48d   : > { %3403 = vmatpush1.bf16.msra.mxu0 %v5056_v22  ;;  %v5122_v22 = vld [vmem:[%s5986_s29 + $0xd4] ss:$8 sps:$4 sm:$0xff]  }
 0x48e   : > { %3404 = vmatprep.subr.bf16.mxu0 %v5061_v20  ;;  %v5124_v20 = vld [vmem:[%s5986_s29 + $0xd0] ss:$8 sps:$4 sm:$0xff]  }
 0x48f   : > { %3887 = vmatpush1.bf16.msra.mxu1 %v5103_v47 }
 0x490   : > { %3888 = vmatprep.subr.bf16.mxu1 %v5104_v10 }
 0x491   : > { %3405 = vmatpush1.bf16.msra.mxu0 %v5059_v8  ;;  %v5125_v8 = vld [vmem:[%s5986_s29 + $0xe4] ss:$8 sps:$4 sm:$0xff]  }
 0x492   : > { %3406 = vmatprep.subr.bf16.mxu0 %v5064_v24  ;;  %v5127_v24 = vld [vmem:[%s5986_s29 + $0xe0] ss:$8 sps:$4 sm:$0xff]  }
 0x493   : > { %3889 = vmatpush1.bf16.msra.mxu1 %v5106_v48 }
 0x494   : > { %3890 = vmatprep.subr.bf16.mxu1 %v5107_v55 }
 0x495   : > { %3407 = vmatpush1.bf16.msra.mxu0 %v5062_v21  ;;  %v5128_v21 = vld [vmem:[%s5986_s29 + $0xf4] ss:$8 sps:$4 sm:$0xff]  }
 0x496   : > { %3408 = vmatprep.subr.bf16.mxu0 %v5067_v57  ;;  %v5130_v57 = vld [vmem:[%s5986_s29 + $0xf0] ss:$8 sps:$4 sm:$0xff]  }
 0x497   : > { %3891 = vmatpush1.bf16.msra.mxu1 %v5109_v5 }
 0x498   : > { %3892 = vmatprep.subr.bf16.mxu1 %v5110_v26 }
 0x499   : > { %3409 = vmatpush1.bf16.msra.mxu0 %v5065_v12  ;;  %v2985_v12 = vlaneseq }
 0x49a   : > { %3410 = vmatprep.subr.bf16.mxu0 %v5070_v37 }
 0x49b   : > { %3893 = vmatpush1.bf16.msra.mxu1 %v5112_v51  ;;  %v6778_v37 = vshrl.u32 %v2985_v12, 7 }
 0x49c   : > { %3894 = vmatprep.subr.bf16.mxu1 %v5113_v0 }
 0x49d   : > { %3411 = vmatpush1.bf16.msra.mxu0 %v5068_v33  ;;  %v6781_v33 = vsub.s32 1, %v6778_v37 }
 0x49e   : > { %3412 = vmatprep.subr.bf16.mxu0 %v5073_v28  ;;  %v2983_v28 = vld [vmem:[%s5984_s20] ss:$4 sm:$0x3] }
 0x49f   : > { %3895 = vmatpush1.bf16.msra.mxu1 %v5115_v62 }
 0x4a0   : > { %3896 = vmatprep.subr.bf16.mxu1 %v5116_v38 }
 0x4a1   : > { %3413 = vmatpush1.bf16.msra.mxu0 %v5071_v46  ;;  %v6785_v46 = vsub.s32 0, %v6778_v37 }
 0x4a2   : > { %3414 = vmatprep.subr.bf16.mxu0 %v5076_v41 }
 0x4a3   : > { %3897 = vmatpush1.bf16.msra.mxu1 %v5118_v63 }
 0x4a4   : > { %3898 = vmatprep.subr.bf16.mxu1 %v5119_v36 }
 0x4a5   : > { %3415 = vmatpush1.bf16.msra.mxu0 %v5074_v30 }
 0x4a6   : > { %3416 = vmatprep.subr.bf16.mxu0 %v5079_v50  ;;  %v6788_v50 = vrot.slane %v2983_v28, %v6781_v33 }
 0x4a7   : > { %3899 = vmatpush1.bf16.msra.mxu1 %v5121_v9 }
 0x4a8   : > { %3900 = vmatprep.subr.bf16.mxu1 %v5122_v22 }
 0x4a9   : > { %3417 = vmatpush1.bf16.msra.mxu0 %v5077_v23 }
 0x4aa   : > { %3418 = vmatprep.subr.bf16.mxu0 %v5082_v19  ;;  %v2988_v19 = vrot.slane %v2983_v28, %v6785_v46 }
 0x4ab   : > { %3901 = vmatpush1.bf16.msra.mxu1 %v5124_v20 }
 0x4ac   : > { %3902 = vmatprep.subr.bf16.mxu1 %v5125_v8 }
 0x4ad   : > { %3419 = vmatpush1.bf16.msra.mxu0 %v5080_v1 }
 0x4af   : > { %3903 = vmatpush1.bf16.msra.mxu1 %v5127_v24 }
 0x4b0   : > { %3421 = vmatmul.mubr.bf16.vlgmr.msra.gmra.mrb[0].mxu0 %v2905_v61  ;;  %3904 = vmatprep.subr.bf16.mxu1 %v5128_v21 }
 0x4b1   : > { %3430 = vmatprep.mubr.bf16.mxu0 %v2910_v7 }
 0x4b3   : > { %3905 = vmatpush1.bf16.msra.mxu1 %v5130_v57 }
 0x4b8   : > { %3431 = vmatmul.mubr.bf16.gmra.mrb[4].mxu0 %v2909_v4 }
 0x4b9   : > { %3440 = vmatprep.mubr.bf16.mxu0 %v2914_v45 }
 0x4c0   : > { %3441 = vmatmul.mubr.bf16.gmra.mrb[8].mxu0 %v2913_v52 }
 0x4c1   : > { %3450 = vmatprep.mubr.bf16.mxu0 %v2918_v34 }
 0x4c8   : > { %3451 = vmatmul.mubr.bf16.gmra.mrb[12].mxu0 %v2917_v53 }
 0x583   : > { %v3422_v41 = vpop.f32.mrb[0].mxu0 }
 0x584   : > { %v3424_v30 = vpop.f32.mrb[1].mxu0  ;;  %v6799_v14 = vadd.f32 %v3422_v41, %v2988_v19 }
 0x585   : > { %v3426_v23 = vpop.f32.mrb[2].mxu0  ;;  %v6797_v60 = vadd.f32 %v3424_v30, %v6788_v50 }
 0x586   : > { %v3428_v1 = vpop.f32.mrb[3].mxu0  ;;  %v6794_v3 = vadd.f32 %v3426_v23, %v2988_v19  ;;  %v3494_v54 = vmul.f32 %v6799_v14, %v6799_v14 }
 0x587   : > { %v6792_v40 = vadd.f32 %v3428_v1, %v6788_v50  ;;  %v3495_v11 = vmul.f32 %v6797_v60, %v6797_v60 }
 0x588   : > { %v3496_v39 = vmul.f32 %v6794_v3, %v6794_v3  ;;  %v3465_v32 = vadd.f32 %v6794_v3, %v6799_v14 }
 0x589   : > { %v3497_v61 = vmul.f32 %v6792_v40, %v6792_v40  ;;  %v3478_v4 = vadd.f32 %v6792_v40, %v6797_v60 }
 0x58a   : > { %v3510_v17 = vadd.f32 %v3496_v39, %v3494_v54 }
 0x58b   : > { %v3432_v7 = vpop.f32.mrb[4].mxu0  ;;  %v3523_v31 = vadd.f32 %v3497_v61, %v3495_v11 }
 0x58c   : > { %v6805_v16 = vadd.f32 %v3432_v7, %v2988_v19  ;;  %v3434_v15 = vpop.f32.mrb[5].mxu0 }
 0x58d   : > { %v6812_v45 = vadd.f32 %v3434_v15, %v6788_v50  ;;  %v3436_v49 = vpop.f32.mrb[6].mxu0 }
 0x58e   : > { %v3498_v18 = vmul.f32 %v6805_v16, %v6805_v16  ;;  %v6820_v52 = vadd.f32 %v3436_v49, %v2988_v19  ;;  %v3438_v34 = vpop.f32.mrb[7].mxu0  ;;  %v3466_v13 = vadd.f32 %v6805_v16, %v3465_v32 }
 0x58f   : > { %v3479_v6 = vadd.f32 %v6812_v45, %v3478_v4  ;;  %v3499_v53 = vmul.f32 %v6812_v45, %v6812_v45  ;;  %v6826_v2 = vadd.f32 %v3438_v34, %v6788_v50 }
 0x590   : > { %v3511_v42 = vadd.f32 %v3510_v17, %v3498_v18  ;;  %v3500_v27 = vmul.f32 %v6820_v52, %v6820_v52  ;;  %v3467_v29 = vadd.f32 %v6820_v52, %v3466_v13 }
 0x591   : > { %v3524_v25 = vadd.f32 %v3523_v31, %v3499_v53  ;;  %v3480_v43 = vadd.f32 %v6826_v2, %v3479_v6  ;;  %v3501_v56 = vmul.f32 %v6826_v2, %v6826_v2 }
 0x592   : > { %v3512_v48 = vadd.f32 %v3511_v42, %v3500_v27 }
 0x593   : > { %v3525_v35 = vadd.f32 %v3524_v25, %v3501_v56  ;;  %v3442_v44 = vpop.f32.mrb[8].mxu0 }
 0x594   : > { %v6835_v58 = vadd.f32 %v3442_v44, %v2988_v19  ;;  %v3444_v59 = vpop.f32.mrb[9].mxu0 }
 0x595   : > { %v6838_v47 = vadd.f32 %v3444_v59, %v6788_v50  ;;  %v3446_v10 = vpop.f32.mrb[10].mxu0 }
 0x596   : > { %v3468_v55 = vadd.f32 %v6835_v58, %v3467_v29  ;;  %v3502_v5 = vmul.f32 %v6835_v58, %v6835_v58  ;;  %v6843_v26 = vadd.f32 %v3446_v10, %v2988_v19  ;;  %v3448_v51 = vpop.f32.mrb[11].mxu0 }
 0x597   : > { %v3481_v0 = vadd.f32 %v6838_v47, %v3480_v43  ;;  %v3503_v62 = vmul.f32 %v6838_v47, %v6838_v47  ;;  %v6849_v38 = vadd.f32 %v3448_v51, %v6788_v50 }
 0x598   : > { %v3513_v63 = vadd.f32 %v3512_v48, %v3502_v5  ;;  %v3469_v36 = vadd.f32 %v6843_v26, %v3468_v55  ;;  %v3504_v9 = vmul.f32 %v6843_v26, %v6843_v26 }
 0x599   : > { %v3526_v22 = vadd.f32 %v3525_v35, %v3503_v62  ;;  %v3482_v20 = vadd.f32 %v6849_v38, %v3481_v0  ;;  %v3505_v8 = vmul.f32 %v6849_v38, %v6849_v38 }
 0x59a   : > { %v3514_v24 = vadd.f32 %v3513_v63, %v3504_v9 }
 0x59b   : > { %v3527_v21 = vadd.f32 %v3526_v22, %v3505_v8  ;;  %v3452_v57 = vpop.f32.mrb[12].mxu0 }
 0x59c   : > { %v6857_v12 = vadd.f32 %v3452_v57, %v2988_v19  ;;  %v3454_v28 = vpop.f32.mrb[13].mxu0 }
 0x59d   : > { %v6860_v41 = vadd.f32 %v3454_v28, %v6788_v50  ;;  %v3456_v30 = vpop.f32.mrb[14].mxu0 }
 0x59e   : > { %v3470_v23 = vadd.f32 %v6857_v12, %v3469_v36  ;;  %v3506_v1 = vmul.f32 %v6857_v12, %v6857_v12  ;;  %v6865_v61 = vadd.f32 %v3456_v30, %v2988_v19  ;;  %v3458_v7 = vpop.f32.mrb[15].mxu0 }
 0x59f   : > { %v3483_v39 = vadd.f32 %v6860_v41, %v3482_v20  ;;  %v3507_v15 = vmul.f32 %v6860_v41, %v6860_v41  ;;  %v4576_v11 = vadd.f32 %v3458_v7, %v6788_v50 }
 0x5a0   : > { %v3515_v4 = vadd.f32 %v3514_v24, %v3506_v1  ;;  %v3471_v49 = vadd.f32 %v6865_v61, %v3470_v23  ;;  %v3508_v54 = vmul.f32 %v6865_v61, %v6865_v61 }
 0x5a1   : > { %v3528_v32 = vadd.f32 %v3527_v21, %v3507_v15  ;;  %v3484_v18 = vadd.f32 %v4576_v11, %v3483_v39  ;;  %v3509_v34 = vmul.f32 %v4576_v11, %v4576_v11  ;;  %v5557_v15 = vmov 1966171168  }
 0x5a2   : > { %v3472_v31 = vrot.slane %v3471_v49, 4  ;;  %v3516_v19 = vadd.f32 %v3515_v4, %v3508_v54  ;;  %v3552_v4 = vunpack.c.l.s4 %v5557_v15 }
 0x5a3   : > { %v3485_v6 = vrot.slane %v3484_v18, 4  ;;  %v3529_v53 = vadd.f32 %v3528_v32, %v3509_v34 }
 0x5a4   : > { %v3473_v17 = vadd.f32 %v3472_v31, %v3471_v49  ;;  %v3517_v13 = vrot.slane %v3516_v19, 4  ;;  %v3553_v49 = vunpack.c.0.s8 %v3552_v4 }
 0x5a5   : > { %v3486_v25 = vadd.f32 %v3485_v6, %v3484_v18  ;;  %v3530_v43 = vrot.slane %v3529_v53, 4 }
 0x5a6   : > { %v3474_v56 = vrot.slane %v3473_v17, 2  ;;  %v3518_v42 = vadd.f32 %v3517_v13, %v3516_v19  ;;  %v3556_v32 = vsub.s32 %v3553_v49, %v6778_v37  ;;  %v4486_v19 = vld [vmem:[%s5984_s20 + $0x1] ss:$4 sm:$0x3] }
 0x5a7   : > { %v3487_v50 = vrot.slane %v3486_v25, 2  ;;  %v3531_v27 = vadd.f32 %v3530_v43, %v3529_v53 }
 0x5a8   : > { %v3475_v35 = vadd.f32 %v3474_v56, %v3473_v17  ;;  %v3519_v44 = vrot.slane %v3518_v42, 2 }
 0x5a9   : > { %v3488_v29 = vadd.f32 %v3487_v50, %v3486_v25  ;;  %v3532_v59 = vrot.slane %v3531_v27, 2 }
 0x5aa   : > { %v3476_v10 = vrot.slane %v3475_v35, 1  ;;  %v3520_v48 = vadd.f32 %v3519_v44, %v3518_v42 }
 0x5ab   : > { %v3489_v55 = vrot.slane %v3488_v29, 1  ;;  %v3533_v5 = vadd.f32 %v3532_v59, %v3531_v27 }
 0x5ac   : > { %v3477_v51 = vadd.f32 %v3476_v10, %v3475_v35  ;;  %v3521_v0 = vrot.slane %v3520_v48, 1 }
 0x5ad   : > { %v3490_v62 = vadd.f32 %v3489_v55, %v3488_v29  ;;  %v3534_v63 = vrot.slane %v3533_v5, 1  ;;  %v4487_v55 = vld [vmem:[%s5984_s20 + $0x2] ss:$4 sm:$0x3] }
 0x5ae   : > { %v3492_v36 = vmul.f32 0.015625, %v3477_v51  ;;  %v3522_v9 = vadd.f32 %v3521_v0, %v3520_v48 }
 0x5af   : > { %v3493_v22 = vmul.f32 0.015625, %v3490_v62  ;;  %v3535_v20 = vadd.f32 %v3534_v63, %v3533_v5 }
 0x5b0   : > { %v3536_v8 = vmul.f32 0.015625, %v3522_v9  ;;  %v3538_v24 = vmul.f32 %v3492_v36, %v3492_v36 }
 0x5b1   : > { %v3537_v21 = vmul.f32 0.015625, %v3535_v20  ;;  %v3539_v57 = vmul.f32 %v3493_v22, %v3493_v22 }
 0x5b2   : > { %v3540_v28 = vsub.f32 %v3536_v8, %v3538_v24 }
 0x5b3   : > { %v3541_v30 = vsub.f32 %v3537_v21, %v3539_v57 }
 0x5b4   : > { %v3542_v23 = vmax.f32 %v3540_v28, 0.0 }
 0x5b5   : > { %v3543_v1 = vmax.f32 %v3541_v30, 0.0 }
 0x5b6   : > { %v3544_v7 = vadd.f32 1e-05, %v3542_v23 }
 0x5b7   : > { %v3545_v39 = vadd.f32 1e-05, %v3543_v1 }
 0x5b8   : > { %5131 = vrsqrt.f32 %v3544_v7 }
 0x5b9   : > { %5133 = vrsqrt.f32 %v3545_v39 }
 0x5c2   : > { %v5132_v54 = vpop.eup %5131 }
 0x5c3   : > { %v5134_v18 = vpop.eup %5133 }
 0x5c4   : > { %v3550_v34 = vcombine.low %v5132_v54, %v5134_v18 }
 0x5c6   : > { %v3557_v31 = vrot.slane %v3550_v34, %v3556_v32 }
 0x5c8   : > { %v3564_v6 = vrot.slane %v3557_v31, %v3556_v32 }
 0x5ca   : > { %v3566_v53 = vmul.f32 %v4486_v19, %v3564_v6 }
 0x5cc   : > { %v3571_v17 = vrot.slane %v3566_v53, %v6785_v46  ;;  %v3575_v13 = vrot.slane %v3566_v53, %v6781_v33 }
 0x5ce   : > { %v3578_v25 = vmul.f32 %v3571_v17, %v3492_v36  ;;  %v3579_v43 = vmul.f32 %v3575_v13, %v3493_v22  ;;  %v3614_v56 = vmul.f32 %v4576_v11, %v3575_v13  ;;  %v3604_v42 = vmul.f32 %v6812_v45, %v3575_v13 }
 0x5cf   : > { %v3606_v27 = vmul.f32 %v6826_v2, %v3575_v13  ;;  %v3605_v37 = vmul.f32 %v6820_v52, %v3571_v17  ;;  %v3608_v35 = vmul.f32 %v6838_v47, %v3575_v13  ;;  %v3610_v44 = vmul.f32 %v6849_v38, %v3575_v13 }
 0x5d0   : > { %v3582_v50 = vcombine.low %v3578_v25, %v3579_v43  ;;  %v3607_v29 = vmul.f32 %v6835_v58, %v3571_v17  ;;  %v3609_v59 = vmul.f32 %v6843_v26, %v3571_v17  ;;  %v3612_v48 = vmul.f32 %v6860_v41, %v3575_v13 }
 0x5d1   : > { %v3611_v11 = vmul.f32 %v6857_v12, %v3571_v17  ;;  %v3613_v45 = vmul.f32 %v6865_v61, %v3571_v17  ;;  %v3600_v52 = vmul.f32 %v6797_v60, %v3575_v13  ;;  %v3602_v47 = vmul.f32 %v6792_v40, %v3575_v13 }
 0x5d2   : > { %v3589_v10 = vrot.slane %v3582_v50, %v3556_v32  ;;  %v3599_v26 = vmul.f32 %v6799_v14, %v3571_v17  ;;  %v3601_v51 = vmul.f32 %v6794_v3, %v3571_v17  ;;  %v3603_v41 = vmul.f32 %v6805_v16, %v3571_v17  ;;  %v3659_v50 = vld [vmem:[#allocation3 + $0x8] sm:$0xff] }
 0x5d4   : > { %v3596_v5 = vrot.slane %v3589_v10, %v3556_v32 }
 0x5d6   : > { %v3598_v2 = vsub.f32 %v4487_v55, %v3596_v5  ;;  %v3662_v55 = vld [vmem:[#allocation3 + $0x20] sm:$0xff]  ;;  %v3663_v5 = vld [vmem:[#allocation3 + $0x28] sm:$0xff] }
 0x5d8   : > { %v3619_v38 = vrot.slane %v3598_v2, %v6785_v46  ;;  %v3623_v58 = vrot.slane %v3598_v2, %v6781_v33 }
 0x5da   : > { %v3627_v12 = vadd.f32 %v3623_v58, %v3600_v52  ;;  %v3629_v0 = vadd.f32 %v3623_v58, %v3602_v47  ;;  %v3626_v61 = vadd.f32 %v3619_v38, %v3599_v26  ;;  %v3628_v62 = vadd.f32 %v3619_v38, %v3601_v51  ;;  %v3664_v52 = vld [vmem:[#allocation3 + $0x30] sm:$0xff] }
 0x5db   : > { %v3631_v63 = vadd.f32 %v3623_v58, %v3604_v42  ;;  %v3633_v36 = vadd.f32 %v3623_v58, %v3606_v27  ;;  %v3630_v9 = vadd.f32 %v3619_v38, %v3603_v41  ;;  %v3632_v60 = vadd.f32 %v3619_v38, %v3605_v37  ;;  %v3660_v37 = vld [vmem:[#allocation3 + $0x10] sm:$0xff] }
 0x5dc   : > { %v3643_v22 = vmax.f32 %v3627_v12, 0.0  ;;  %v3645_v40 = vmax.f32 %v3629_v0, 0.0  ;;  %v3642_v20 = vmax.f32 %v3626_v61, 0.0  ;;  %v3644_v8 = vmax.f32 %v3628_v62, 0.0  ;;  %v3666_v61 = vld [vmem:[#allocation3 + $0x40] sm:$0xff]  ;;  %v3667_v62 = vld [vmem:[#allocation3 + $0x48] sm:$0xff] }
 0x5dd   : > { %v3647_v24 = vmax.f32 %v3631_v63, 0.0  ;;  %v3649_v21 = vmax.f32 %v3633_v36, 0.0  ;;  %v3646_v57 = vmax.f32 %v3630_v9, 0.0  ;;  %v3648_v14 = vmax.f32 %v3632_v60, 0.0  ;;  %v3668_v36 = vld [vmem:[#allocation3 + $0x50] sm:$0xff] }
 0x5de   : > { %v3675_v28 = vpack.c.bf16 %v3645_v40, %v3643_v22  ;;  %v3674_v3 = vpack.c.bf16 %v3644_v8, %v3642_v20  ;;  %v3635_v30 = vadd.f32 %v3623_v58, %v3608_v35  ;;  %v3637_v16 = vadd.f32 %v3623_v58, %v3610_v44  ;;  %v3669_v22 = vld [vmem:[#allocation3 + $0x58] sm:$0xff] }
 0x5df   : > { %v3677_v23 = vpack.c.bf16 %v3649_v21, %v3647_v24  ;;  %v3676_v1 = vpack.c.bf16 %v3648_v14, %v3646_v57  ;;  %v3634_v7 = vadd.f32 %v3619_v38, %v3607_v29  ;;  %v3636_v39 = vadd.f32 %v3619_v38, %v3609_v59  ;;  %v3661_v29 = vld [vmem:[#allocation3 + $0x18] sm:$0xff]  ;;  %v3670_v57 = vld [vmem:[#allocation3 + $0x60] sm:$0xff]  ;;  %v3671_v14 = vld [vmem:[#allocation3 + $0x68] sm:$0xff] }
 0x5e0   : > { %3906 = vmatprep.mubr.bf16.mxu1 %v3675_v28  ;;  %v3651_v15 = vmax.f32 %v3635_v30, 0.0  ;;  %v3653_v4 = vmax.f32 %v3637_v16, 0.0  ;;  %v3639_v49 = vadd.f32 %v3623_v58, %v3612_v48  ;;  %v3641_v54 = vadd.f32 %v3623_v58, %v3614_v56  ;;  %v3658_v56 = vld [vmem:[#allocation3] sm:$0xff]  ;;  %v3665_v58 = vld [vmem:[#allocation3 + $0x38] sm:$0xff] }
 0x5e1   : > { %3907 = vmatmul.mubr.bf16.vlgmr.msra.gmra.mrb[0].mxu1 %v3674_v3  ;;  %v3650_v32 = vmax.f32 %v3634_v7, 0.0  ;;  %v3652_v18 = vmax.f32 %v3636_v39, 0.0  ;;  %v3638_v34 = vadd.f32 %v3619_v38, %v3611_v11  ;;  %v3640_v31 = vadd.f32 %v3619_v38, %v3613_v45  ;;  %v3672_v3 = vld [vmem:[#allocation3 + $0x70] sm:$0xff] }
 0x5e2   : > { %3916 = vmatprep.mubr.bf16.mxu1 %v3677_v23  ;;  %v3679_v19 = vpack.c.bf16 %v3653_v4, %v3651_v15  ;;  %v3655_v6 = vmax.f32 %v3639_v49, 0.0  ;;  %v3657_v53 = vmax.f32 %v3641_v54, 0.0  ;;  %v3673_v23 = vld [vmem:[#allocation3 + $0x78] sm:$0xff] }
 0x5e3   : > { %v3678_v17 = vpack.c.bf16 %v3652_v18, %v3650_v32  ;;  %v3654_v13 = vmax.f32 %v3638_v34, 0.0  ;;  %v3656_v25 = vmax.f32 %v3640_v31, 0.0  ;;  %v3999_v54 = vld [vmem:[#allocation15 + $0x18] sm:$0x3] (!%p4520_p12) }
 0x5e4   : > { %v3681_v43 = vpack.c.bf16 %v3657_v53, %v3655_v6  ;;  %v4004_v18 = vrot.slane (!%p4520_p12), %v3999_v54, %v6785_v46  ;;  %v4008_v34 = vrot.slane (!%p4520_p12), %v3999_v54, %v6781_v33 }
 0x5e5   : > { %v3680_v42 = vpack.c.bf16 %v3656_v25, %v3654_v13 }
 0x5e9   : > { %3917 = vmatmul.mubr.bf16.gmra.mrb[4].mxu1 %v3676_v1 }
 0x5ea   : > { %3926 = vmatprep.mubr.bf16.mxu1 %v3679_v19 }
 0x5f1   : > { %3927 = vmatmul.mubr.bf16.gmra.mrb[8].mxu1 %v3678_v17 }
 0x5f2   : > { %3936 = vmatprep.mubr.bf16.mxu1 %v3681_v43 }
 0x5f9   : > { %3937 = vmatmul.mubr.bf16.gmra.mrb[12].mxu1 %v3680_v42 }
 0x6b4   : > { %v3908_v27 = vpop.f32.mrb[0].mxu1 }
 0x6b5   : > { %v3947_v35 = vadd.f32 %v3908_v27, %v3658_v56  ;;  %v3910_v44 = vpop.f32.mrb[1].mxu1 }
 0x6b6   : > { %v3948_v59 = vadd.f32 %v3910_v44, %v3659_v50  ;;  %v3912_v10 = vpop.f32.mrb[2].mxu1 }
 0x6b7   : > { %3963 = vst [vmem:[#allocation3] sm:$0xff] %v3947_v35  ;;  %v3949_v48 = vadd.f32 %v3912_v10, %v3660_v37  ;;  %v3914_v11 = vpop.f32.mrb[3].mxu1 }
 0x6b8   : > { %3964 = vst [vmem:[#allocation3 + $0x8] sm:$0xff] %v3948_v59  ;;  %v3950_v45 = vadd.f32 %v3914_v11, %v3661_v29 }
 0x6b9   : > { %3965 = vst [vmem:[#allocation3 + $0x10] sm:$0xff] %v3949_v48 }
 0x6ba   : > { %3966 = vst [vmem:[#allocation3 + $0x18] sm:$0xff] %v3950_v45 }
 0x6bc   : > { %v3918_v2 = vpop.f32.mrb[4].mxu1 }
 0x6bd   : > { %v3951_v47 = vadd.f32 %v3918_v2, %v3662_v55  ;;  %v3920_v38 = vpop.f32.mrb[5].mxu1 }
 0x6be   : > { %v3952_v26 = vadd.f32 %v3920_v38, %v3663_v5  ;;  %v3922_v51 = vpop.f32.mrb[6].mxu1  ;;  %v3983_v49 = vld [vmem:[#allocation3] sm:$0xff] (!%p4520_p12) }
 0x6bf   : > { %3967 = vst [vmem:[#allocation3 + $0x20] sm:$0xff] %v3951_v47  ;;  %v3953_v41 = vadd.f32 %v3922_v51, %v3664_v52  ;;  %v3924_v12 = vpop.f32.mrb[7].mxu1  ;;  %v3984_v32 = vld [vmem:[#allocation3 + $0x8] sm:$0xff] (!%p4520_p12)  ;;  %v4011_v53 = vadd.f32 (!%p4520_p12), %v4004_v18, %v3983_v49 }
 0x6c0   : > { %3968 = vst [vmem:[#allocation3 + $0x28] sm:$0xff] %v3952_v26  ;;  %v3954_v0 = vadd.f32 %v3924_v12, %v3665_v58  ;;  %v3985_v31 = vld [vmem:[#allocation3 + $0x10] sm:$0xff] (!%p4520_p12)  ;;  %v4012_v17 = vadd.f32 (!%p4520_p12), %v4008_v34, %v3984_v32 }
 0x6c1   : > { %3969 = vst [vmem:[#allocation3 + $0x30] sm:$0xff] %v3953_v41  ;;  %v3986_v19 = vld [vmem:[#allocation3 + $0x18] sm:$0xff] (!%p4520_p12)  ;;  %v4013_v13 = vadd.f32 (!%p4520_p12), %v4004_v18, %v3985_v31  ;;  %5135 = vtanh.f32 (!%p4520_p12), %v4011_v53 }
 0x6c2   : > { %3970 = vst [vmem:[#allocation3 + $0x38] sm:$0xff] %v3954_v0  ;;  %v4014_v43 = vadd.f32 (!%p4520_p12), %v4008_v34, %v3986_v19  ;;  %5137 = vtanh.f32 (!%p4520_p12), %v4012_v17 }
 0x6c3   : > { %5139 = vtanh.f32 (!%p4520_p12), %v4013_v13 }
 0x6c4   : > { %v3928_v63 = vpop.f32.mrb[8].mxu1  ;;  %5141 = vtanh.f32 (!%p4520_p12), %v4014_v43 }
 0x6c5   : > { %v3955_v9 = vadd.f32 %v3928_v63, %v3666_v61  ;;  %v3930_v60 = vpop.f32.mrb[9].mxu1 }
 0x6c6   : > { %v3956_v40 = vadd.f32 %v3930_v60, %v3667_v62  ;;  %v3932_v20 = vpop.f32.mrb[10].mxu1  ;;  %v3987_v6 = vld [vmem:[#allocation3 + $0x20] sm:$0xff] (!%p4520_p12) }
 0x6c7   : > { %3971 = vst [vmem:[#allocation3 + $0x40] sm:$0xff] %v3955_v9  ;;  %v3957_v8 = vadd.f32 %v3932_v20, %v3668_v36  ;;  %v3934_v24 = vpop.f32.mrb[11].mxu1  ;;  %v3988_v25 = vld [vmem:[#allocation3 + $0x28] sm:$0xff] (!%p4520_p12)  ;;  %v4015_v56 = vadd.f32 (!%p4520_p12), %v4004_v18, %v3987_v6 }
 0x6c8   : > { %3972 = vst [vmem:[#allocation3 + $0x48] sm:$0xff] %v3956_v40  ;;  %v3958_v21 = vadd.f32 %v3934_v24, %v3669_v22  ;;  %v3989_v42 = vld [vmem:[#allocation3 + $0x30] sm:$0xff] (!%p4520_p12)  ;;  %v4016_v27 = vadd.f32 (!%p4520_p12), %v4008_v34, %v3988_v25 }
 0x6c9   : > { %3973 = vst [vmem:[#allocation3 + $0x50] sm:$0xff] %v3957_v8  ;;  %v3990_v50 = vld [vmem:[#allocation3 + $0x38] sm:$0xff] (!%p4520_p12)  ;;  %v4017_v35 = vadd.f32 (!%p4520_p12), %v4004_v18, %v3989_v42  ;;  %5143 = vtanh.f32 (!%p4520_p12), %v4015_v56 }
 0x6ca   : > { %3974 = vst [vmem:[#allocation3 + $0x58] sm:$0xff] %v3958_v21  ;;  %v4018_v33 = vadd.f32 (!%p4520_p12), %v4008_v34, %v3990_v50  ;;  %5145 = vtanh.f32 (!%p4520_p12), %v4016_v27 }
 0x6cb   : > { %5147 = vtanh.f32 (!%p4520_p12), %v4017_v35  ;;  %v5136_v38 = vpop.eup (!%p4520_p12), %5135 }
 0x6cc   : > { %v3938_v28 = vpop.f32.mrb[12].mxu1  ;;  %3982 = sbr.rel (%p4520_p12) target bundleno = 1768 (0x6e8), region = 108  ;;  %5149 = vtanh.f32 (!%p4520_p12), %v4018_v33  ;;  %v5138_v26 = vpop.eup (!%p4520_p12), %5137  ;;  %4043 = vst [vmem:[#allocation21] sm:$0xff] (!%p4520_p12), %v5136_v38 }
 0x6cd   : > { %v3959_v30 = vadd.f32 %v3938_v28, %v3670_v57  ;;  %v3940_v16 = vpop.f32.mrb[13].mxu1  ;;  %v5140_v41 = vpop.eup (!%p4520_p12), %5139  ;;  %4044 = vst [vmem:[#allocation21 + $0x8] sm:$0xff] (!%p4520_p12), %v5138_v26 }
 0x6ce   : > { %v3960_v1 = vadd.f32 %v3940_v16, %v3671_v14  ;;  %v3942_v7 = vpop.f32.mrb[14].mxu1  ;;  %v3991_v37 = vld [vmem:[#allocation3 + $0x40] sm:$0xff] (!%p4520_p12)  ;;  %v5142_v12 = vpop.eup (!%p4520_p12), %5141  ;;  %4045 = vst [vmem:[#allocation21 + $0x10] sm:$0xff] (!%p4520_p12), %v5140_v41 }
 0x6cf   : > { %3975 = vst [vmem:[#allocation3 + $0x60] sm:$0xff] %v3959_v30  ;;  %v3961_v39 = vadd.f32 %v3942_v7, %v3672_v3  ;;  %v3944_v15 = vpop.f32.mrb[15].mxu1  ;;  %v3992_v46 = vld [vmem:[#allocation3 + $0x48] sm:$0xff] (!%p4520_p12)  ;;  %v4019_v29 = vadd.f32 (!%p4520_p12), %v4004_v18, %v3991_v37  ;;  %4046 = vst [vmem:[#allocation21 + $0x18] sm:$0xff] (!%p4520_p12), %v5142_v12 }
 0x6d0   : > { %3976 = vst [vmem:[#allocation3 + $0x68] sm:$0xff] %v3960_v1  ;;  %v3962_v4 = vadd.f32 %v3944_v15, %v3673_v23  ;;  %v3993_v44 = vld [vmem:[#allocation3 + $0x50] sm:$0xff] (!%p4520_p12)  ;;  %v4020_v10 = vadd.f32 (!%p4520_p12), %v4008_v34, %v3992_v46 }
 0x6d1   : > { %3977 = vst [vmem:[#allocation3 + $0x70] sm:$0xff] %v3961_v39  ;;  %v3994_v59 = vld [vmem:[#allocation3 + $0x58] sm:$0xff] (!%p4520_p12)  ;;  %v4021_v11 = vadd.f32 (!%p4520_p12), %v4004_v18, %v3993_v44  ;;  %5151 = vtanh.f32 (!%p4520_p12), %v4019_v29 }
 0x6d2   : > { %3978 = vst [vmem:[#allocation3 + $0x78] sm:$0xff] %v3962_v4  ;;  %v4022_v55 = vadd.f32 (!%p4520_p12), %v4008_v34, %v3994_v59  ;;  %5153 = vtanh.f32 (!%p4520_p12), %v4020_v10 }
 0x6d3   : > { %5155 = vtanh.f32 %v4021_v11  ;;  %v5144_v0 = vpop.eup %5143 }
 0x6d4   : > { %5157 = vtanh.f32 %v4022_v55  ;;  %v5146_v61 = vpop.eup %5145  ;;  %4047 = vst [vmem:[#allocation21 + $0x20] sm:$0xff] %v5144_v0 }
 0x6d5   : > { %v5148_v62 = vpop.eup %5147  ;;  %4048 = vst [vmem:[#allocation21 + $0x28] sm:$0xff] %v5146_v61 }
 0x6d6   : > { %v3995_v48 = vld [vmem:[#allocation3 + $0x60] sm:$0xff]  ;;  %v5150_v63 = vpop.eup %5149  ;;  %4049 = vst [vmem:[#allocation21 + $0x30] sm:$0xff] %v5148_v62 }
 0x6d7   : > { %v3996_v45 = vld [vmem:[#allocation3 + $0x68] sm:$0xff]  ;;  %v4023_v2 = vadd.f32 %v4004_v18, %v3995_v48  ;;  %4050 = vst [vmem:[#allocation21 + $0x38] sm:$0xff] %v5150_v63 }
 0x6d8   : > { %v3997_v5 = vld [vmem:[#allocation3 + $0x70] sm:$0xff]  ;;  %v4024_v47 = vadd.f32 %v4008_v34, %v3996_v45 }
 0x6d9   : > { %v3998_v52 = vld [vmem:[#allocation3 + $0x78] sm:$0xff]  ;;  %v4025_v58 = vadd.f32 %v4004_v18, %v3997_v5  ;;  %5159 = vtanh.f32 %v4023_v2 }
 0x6da   : > { %v4026_v51 = vadd.f32 %v4008_v34, %v3998_v52  ;;  %5161 = vtanh.f32 %v4024_v47 }
 0x6db   : > { %5163 = vtanh.f32 %v4025_v58  ;;  %v5152_v36 = vpop.eup %5151 }
 0x6dc   : > { %5165 = vtanh.f32 %v4026_v51  ;;  %v5154_v9 = vpop.eup %5153  ;;  %4051 = vst [vmem:[#allocation21 + $0x40] sm:$0xff] %v5152_v36 }
 0x6dd   : > { %v5156_v60 = vpop.eup %5155  ;;  %4052 = vst [vmem:[#allocation21 + $0x48] sm:$0xff] %v5154_v9 }
 0x6de   : > { %v5158_v22 = vpop.eup %5157  ;;  %4053 = vst [vmem:[#allocation21 + $0x50] sm:$0xff] %v5156_v60 }
 0x6df   : > { %4054 = vst [vmem:[#allocation21 + $0x58] sm:$0xff] %v5158_v22 }
 0x6e3   : > { %v5160_v40 = vpop.eup %5159 }
 0x6e4   : > { %v5162_v20 = vpop.eup %5161  ;;  %4055 = vst [vmem:[#allocation21 + $0x60] sm:$0xff] %v5160_v40 }
 0x6e5   : > { %v5164_v8 = vpop.eup %5163  ;;  %4056 = vst [vmem:[#allocation21 + $0x68] sm:$0xff] %v5162_v20 }
 0x6e6   : > { %v5166_v24 = vpop.eup %5165  ;;  %4057 = vst [vmem:[#allocation21 + $0x70] sm:$0xff] %v5164_v8 }
 0x6e7   : > { %4058 = vst [vmem:[#allocation21 + $0x78] sm:$0xff] %v5166_v24 }
 0x6e8 PF: > { %p4678_p0 = scmp.eq.s32.totalorder %s5637_s17, 3  ;;  %s5558_s25 = smov [#allocation21]  }
 0x6e9   : > { %s4065_s7 = sshll.u32 %s5558_s25, 4  ;;  %s4066_s7 = int_to_ptr.vmem [resolvable:$true] %s4065_s7 }
 0x6ea   : > { %s5453_s16 = scalar_lea.vmem %s4066_s7, 2048  ;;  %p5460_p9 = scmp.lt.s32.totalorder %s4066_s7, %s4066_s7 }
 0x6eb   : > { %p5454_p5 = scmp.ne.s32.totalorder %s4066_s7, %s5453_s16  ;;  %p5461_p10 = scmp.lt.s32.totalorder %s5453_s16, %s5453_s16 }
 0x6ed   : > { %p5455_p3 = pnand %p5454_p5, %p4678_p0  ;;  %p5462_p4 = por %p5461_p10, %p5460_p9 }
 0x6ef   : > { %p5456_p13 = pneg %p5455_p3 }
 0x6f1   : > { %p5463_p11 = pnand %p5462_p4, %p5456_p13 }
 0x6f3   : > { %5466 = shalt.err (!%p5463_p11)
}
 0x6f4   : > { %s7044_s26 = sld [smem:[#allocation44_spill]] }
 0x6fa   : > { %s5467_s15 = scalar_lea.hbm %s7044_s26, 2048 }
 0x6fb   : > { %p5468_p6 = scmp.ne.s32.totalorder %s7044_s26, %s5467_s15  ;;  %p5473_p1 = scmp.lt.u32.totalorder %s5467_s15, %s7044_s26 }
 0x6fd   : > { %p5469_p8 = pnand %p5468_p6, %p4678_p0 }
 0x6ff   : > { %p5470_p2 = pneg %p5469_p8 }
 0x701   : > { %p5475_p7 = pnand %p5473_p1, %p5470_p2 }
 0x703   : > { %5478 = shalt.err (!%p5475_p7)
}
 0x704   : > { %s5559_s27 = smov 256   ;;  %s5560_s10 = smov 16  }
 0x705   : > { %4628 = dma.vmem_to_hbm [thread:$0]  (%p4678_p0), %s4066_s7, 2048, %s7044_s26, [#allocation6], %s5559_s27, %s5559_s27, %s5560_s10  }
 0x706   : > { %5520 = dma.done.wait (%p4678_p0), [#allocation6], 2048  }
 0x707   : > { %5522 = vsyncadd (%p4678_p0), [#allocation6], 4294965248 }
 0x708 PF: > { %s7045_s16 = sld [smem:[#allocation31_spill]]  ;;  %s7046_s30 = sld [smem:[#allocation29_spill]] }
 0x709   : > { %s7047_s15 = sld [smem:[#allocation32_spill]]  ;;  %s7048_s13 = smov %s5529_s14 }
 0x70e   : > { %p28_p12 = scmp.ge.s32.totalorder %s7045_s16, 6   ;;  %s7049_s14 = smov %s7046_s30 }
 0x710   :  { %30 = sbr.rel (!%p28_p12) target bundleno = 16 (0x10), region = 160 }
 0x717   :  { %4081 = vsyncpa [#allocation5], 1 }
 0x718   :  { %4083 = vsyncpa [#allocation5 + $0x1], 1 }
 0x719   :  { %4084 = vsyncpa [#allocation8], 1 }
 0x71a   :  { %4085 = vsyncpa [#allocation11], 1 }
 0x71b   :  { %4086 = vsyncpa [#allocation14], 1 }
 0x71c   :  { %4087 = vsyncpa [#allocation17], 1 }
 0x71d   :  { %4089 = vsyncpa [#allocation17 + $0x1], 1 }
 0x71e   :  { %4090 = vsyncpa [#allocation20], 1 }
 0x71f   :  { %4092 = vsyncpa [#allocation20 + $0x1], 1 }
 0x720   :  { %4093 = vsyncpa [#allocation6], 1 }
 0x721   :  { %4095 = vsyncpa [#allocation6 + $0x1], 1 }

</bundles_post_ra>
